<compile_context>
chip_gen: v7x
topology: tpu7x:2x2x1
jax: 0.10.0
libtpu: 0.0.40
codegen_flags: <defaults>
</compile_context>

<pallas_src>
import functools

import jax
import jax.numpy as jnp
from jax import lax
from jax.experimental import pallas as pl
from jax.experimental.pallas import tpu as pltpu


# ----------------------------------------------------------------------------
# align_corners=True 1-D resize indices / weights
# ----------------------------------------------------------------------------
def _grid1d(in_size, out_size):
    if out_size == 1:
        src = jnp.zeros((1,), jnp.float32)
    else:
        src = jnp.arange(out_size, dtype=jnp.float32) * (
            (in_size - 1) / (out_size - 1)
        )
    i0 = jnp.clip(jnp.floor(src).astype(jnp.int32), 0, in_size - 1)
    i1 = jnp.clip(i0 + 1, 0, in_size - 1)
    w = src - i0.astype(jnp.float32)
    return i0, i1, w


def _bilinear_align_corners(x, out_h, out_w):
    """x: (B, H, W, C) -> (B, out_h, out_w, C); reference only."""
    _, H, W, _ = x.shape
    r0, r1, wr = _grid1d(H, out_h)
    c0, c1, wc = _grid1d(W, out_w)
    xr = (x[:, r0] * (1.0 - wr)[None, :, None, None]
          + x[:, r1] * wr[None, :, None, None])
    return (xr[:, :, c0] * (1.0 - wc)[None, None, :, None]
            + xr[:, :, c1] * wc[None, None, :, None])


# ----------------------------------------------------------------------------
# Pass 1: build x1 tile in VMEM (edge row-upsample + reverse attention + halo),
#         3x3 conv via 9 shifted MXU matmuls, fused BN partial stats,
#         channel-major bf16 y output.
# ----------------------------------------------------------------------------
def rcg_conv_kernel(r0_ref, r1_ref, w0_ref, w1_ref,          # SMEM prefetch
                    pre_ref, f_ref, pre_top_ref, f_top_ref,
                    pre_bot_ref, f_bot_ref, t_ref, w_ref, b1_ref,
                    y_ref, s_ref,                             # outputs
                    xcat_ref):                                # VMEM scratch
    i = pl.program_id(1)
    bh, W, Cf = f_ref.shape
    Cin = xcat_ref.shape[-1]
    M = bh * W
    cdtype = xcat_ref.dtype

    # --- conv zero-padding columns (borders of the tile) ---------------------
    zcol = jnp.zeros((bh + 2, 1, Cin), cdtype)
    xcat_ref[:, 0:1, :] = zcol
    xcat_ref[:, W + 1:W + 2, :] = zcol

    # --- reverse-attention channels r = (1 - sigmoid(pre)) * f ---------------
    # (sigmoid lands on the EUP, multiplies on the VPU; hidden under the MXU)
    r_c = (1.0 - jax.nn.sigmoid(pre_ref[...])) * f_ref[...].astype(jnp.float32)
    xcat_ref[1:bh + 1, 1:W + 1, Cf:] = r_c.astype(cdtype)
    r_t = (1.0 - jax.nn.sigmoid(pre_top_ref[...])) * f_top_ref[...].astype(
        jnp.float32)
    xcat_ref[0:1, 1:W + 1, Cf:] = r_t[None].astype(cdtype)
    r_b = (1.0 - jax.nn.sigmoid(pre_bot_ref[...])) * f_bot_ref[...].astype(
        jnp.float32)
    xcat_ref[bh + 1:bh + 2, 1:W + 1, Cf:] = r_b[None].astype(cdtype)

    # --- edge channels: align_corners row interpolation from the VMEM-resident
    #     column-interpolated edge slab; halo rows get weight 0 (zero padding).
    for y in range(bh + 2):
        gy = i * bh + y                        # padded-global row in [0, H+1]
        row = (w0_ref[gy] * t_ref[r0_ref[gy]].astype(jnp.float32)
               + w1_ref[gy] * t_ref[r1_ref[gy]].astype(jnp.float32))
        xcat_ref[y, 1:W + 1, :Cf] = row.astype(cdtype)

    # --- 3x3 conv: 9 shifted (M, 128) @ (128, 64) MXU matmuls ----------------
    acc = jnp.zeros((M, Cf), jnp.float32)
    for dy in range(3):
        for dx in range(3):
            win = xcat_ref[dy:dy + bh, dx:dx + W, :].reshape(M, Cin)
            acc = acc + jnp.dot(win, w_ref[dy, dx],
                                preferred_element_type=jnp.float32)
    yv = acc + b1_ref[...]                                   # (M, 64) f32

    # --- fused BN partial stats: one lane-dense (1, 128) MXU pass ------------
    yy = jnp.concatenate([yv, yv * yv], axis=-1)             # (M, 128)
    s_ref[...] = jnp.dot(jnp.ones((1, M), jnp.float32), yy,
                         preferred_element_type=jnp.float32)

    # --- channel-major (lane-dense) bf16 y for pass 2 ------------------------
    y_ref[...] = jnp.transpose(yy)[:Cf, :].astype(y_ref.dtype)


# ----------------------------------------------------------------------------
# Pass 2: BN affine + ReLU + 1x1 sigmoid gate + residual, channel-major.
# ----------------------------------------------------------------------------
def rcg_post_kernel(y_ref, f_ref, scale_ref, shift_ref, w2_ref, b2_ref, o_ref):
    # y_ref: (64, M) bf16; f_ref/o_ref: (64, M) f32; scale/shift: (64, 1)
    x2 = jnp.maximum(
        y_ref[...].astype(jnp.float32) * scale_ref[...] + shift_ref[...], 0.0)
    gate = jax.nn.sigmoid(
        jnp.dot(w2_ref[...], x2, preferred_element_type=jnp.float32)
        + b2_ref[...])                                       # (1, M)
    o_ref[...] = gate * x2 + f_ref[...]


# ----------------------------------------------------------------------------
# Wrapper
# ----------------------------------------------------------------------------
@functools.partial(jax.jit, static_argnames=("block_h", "use_bf16_matmul"))
def rcg_forward(pre, edge, f, params, *, block_h=32, use_bf16_matmul=True):
    """pre: (B,1,H,W), edge: (B,64,He,We), f: (B,64,H,W) -- NCHW like PyTorch."""
    B, Cf, H, W = f.shape
    Cin = 2 * Cf
    He, We = edge.shape[2], edge.shape[3]

    # Row-block size: divides H, and bh*W a multiple of 128 (lane-dense output)
    # unless there is a single block (full-dim equality then applies).
    bh = None
    for cand in range(min(block_h, H), 0, -1):
        if H % cand == 0 and ((cand * W) % 128 == 0 or H // cand == 1):
            bh = cand
            break
    if bh is None:
        bh = H  # TODO(synk): whole-image fallback for 128-unfriendly W; fine at
        #                    small H, revisit VMEM budget for very large images.
    nH = H // bh
    M = bh * W

    stream_dtype = jnp.bfloat16 if use_bf16_matmul else jnp.float32

    # ---- layout prep: one NHWC cast/copy of f; everything else is cheap -----
    f_nhwc = jnp.transpose(f, (0, 2, 3, 1)).astype(stream_dtype)   # (B,H,W,Cf)
    pre_nhwc = jnp.transpose(pre, (0, 2, 3, 1)).astype(jnp.float32)  # (B,H,W,1)

    # 1-row conv halos per block (zeros at the image border) -- tiny gathers.
    idx = jnp.arange(nH)
    top_idx = idx * bh - 1
    bot_idx = idx * bh + bh

    def halo(arr, rows, valid):
        g = arr[:, jnp.clip(rows, 0, H - 1)]
        return jnp.where(valid[None, :, None, None], g, 0)

    f_top = halo(f_nhwc, top_idx, top_idx >= 0)          # (B, nH, W, Cf)
    f_bot = halo(f_nhwc, bot_idx, bot_idx < H)
    pre_top = halo(pre_nhwc, top_idx, top_idx >= 0)      # (B, nH, W, 1)
    pre_bot = halo(pre_nhwc, bot_idx, bot_idx < H)

    # Edge: column interpolation at LOW row resolution in the wrapper (small);
    # row interpolation happens in-kernel (no full-res edge1 ever hits HBM).
    edge_nhwc = jnp.transpose(edge, (0, 2, 3, 1)).astype(jnp.float32)
    c0, c1, wc = _grid1d(We, W)
    t_edge = (edge_nhwc[:, :, c0, :] * (1.0 - wc)[None, None, :, None]
              + edge_nhwc[:, :, c1, :] * wc[None, None, :, None])  # (B,He,W,Cf)

    # Row tables over padded rows gy in [0, H+1]; boundary rows -> weight 0.
    r0, r1, wr = _grid1d(He, H)
    z_i = jnp.zeros((1,), jnp.int32)
    z_f = jnp.zeros((1,), jnp.float32)
    r0_tab = jnp.concatenate([z_i, r0, z_i])
    r1_tab = jnp.concatenate([z_i, r1, z_i])
    w0_tab = jnp.concatenate([z_f, 1.0 - wr, z_f])
    w1_tab = jnp.concatenate([z_f, wr, z_f])

    w_hwio = jnp.transpose(params["conv1_w"], (2, 3, 1, 0)).astype(stream_dtype)
    b1 = params["conv1_b"].reshape(1, Cf).astype(jnp.float32)

    cparams = pltpu.CompilerParams(
        dimension_semantics=("parallel", "parallel"),
        vmem_limit_bytes=32 * 1024 * 1024,   # tiles are small; safe on v5e-v7x
    )

    grid_spec = pltpu.PrefetchScalarGridSpec(
        num_scalar_prefetch=4,
        grid=(B, nH),
        in_specs=[
            pl.BlockSpec((None, bh, W, 1), lambda b, i, *_: (b, i, 0, 0)),
            pl.BlockSpec((None, bh, W, Cf), lambda b, i, *_: (b, i, 0, 0)),
            pl.BlockSpec((None, None, W, 1), lambda b, i, *_: (b, i, 0, 0)),
            pl.BlockSpec((None, None, W, Cf), lambda b, i, *_: (b, i, 0, 0)),
            pl.BlockSpec((None, None, W, 1), lambda b, i, *_: (b, i, 0, 0)),
            pl.BlockSpec((None, None, W, Cf), lambda b, i, *_: (b, i, 0, 0)),
            pl.BlockSpec((None, He, W, Cf), lambda b, i, *_: (b, 0, 0, 0)),
            pl.BlockSpec((3, 3, Cin, Cf), lambda b, i, *_: (0, 0, 0, 0)),
            pl.BlockSpec((1, Cf), lambda b, i, *_: (0, 0)),
        ],
        out_specs=(
            pl.BlockSpec((None, Cf, M), lambda b, i, *_: (b, 0, i)),
            pl.BlockSpec((None, None, 1, Cin), lambda b, i, *_: (b, i, 0, 0)),
        ),
        scratch_shapes=[pltpu.VMEM((bh + 2, W + 2, Cin), stream_dtype)],
    )

    y_cm, s = pl.pallas_call(
        rcg_conv_kernel,
        grid_spec=grid_spec,
        out_shape=(
            jax.ShapeDtypeStruct((B, Cf, H * W), stream_dtype),
            jax.ShapeDtypeStruct((B, nH, 1, Cin), jnp.float32),
        ),
        compiler_params=cparams,
    )(r0_tab, r1_tab, w0_tab, w1_tab,
      pre_nhwc, f_nhwc, pre_top, f_top, pre_bot, f_bot, t_edge, w_hwio, b1)

    # Global training-mode BN stats from the per-tile partial sums (tiny).
    n = jnp.float32(B * H * W)
    s_sum = jnp.sum(s, axis=(0, 1))                  # (1, 128) = [sum | sumsq]
    mean = s_sum[:, :Cf] / n
    var = jnp.maximum(s_sum[:, Cf:] / n - mean * mean, 0.0)
    gamma = params["bn_gamma"].reshape(1, Cf).astype(jnp.float32)
    beta = params["bn_beta"].reshape(1, Cf).astype(jnp.float32)
    scale_row = gamma * lax.rsqrt(var + 1e-5)
    shift_row = beta - mean * scale_row
    scale = scale_row.reshape(Cf, 1)
    shift = shift_row.reshape(Cf, 1)
    w2 = params["mlp_w"].reshape(1, Cf).astype(jnp.float32)
    b2 = params["mlp_b"].reshape(1, 1).astype(jnp.float32)

    f_cm = f.reshape(B, Cf, H * W).astype(jnp.float32)   # free NCHW view

    out_cm = pl.pallas_call(
        rcg_post_kernel,
        grid=(B, nH),
        in_specs=[
            pl.BlockSpec((None, Cf, M), lambda b, i: (b, 0, i)),
            pl.BlockSpec((None, Cf, M), lambda b, i: (b, 0, i)),
            pl.BlockSpec((Cf, 1), lambda b, i: (0, 0)),
            pl.BlockSpec((Cf, 1), lambda b, i: (0, 0)),
            pl.BlockSpec((1, Cf), lambda b, i: (0, 0)),
            pl.BlockSpec((1, 1), lambda b, i: (0, 0)),
        ],
        out_specs=pl.BlockSpec((None, Cf, M), lambda b, i: (b, 0, i)),
        out_shape=jax.ShapeDtypeStruct((B, Cf, H * W), jnp.float32),
        compiler_params=cparams,
    )(y_cm, f_cm, scale, shift, w2, b2)

    return out_cm.reshape(B, Cf, H, W)                   # already NCHW, free


# ----------------------------------------------------------------------------
# Pure-JAX reference (for validation only)
# ----------------------------------------------------------------------------
def rcg_reference(pre, edge, f, params):
    B, Cf, H, W = f.shape
    pre_n = jnp.transpose(pre, (0, 2, 3, 1)).astype(jnp.float32)
    f_n = jnp.transpose(f, (0, 2, 3, 1)).astype(jnp.float32)
    edge_n = jnp.transpose(edge, (0, 2, 3, 1)).astype(jnp.float32)

    r = (1.0 - jax.nn.sigmoid(pre_n)) * f_n
    edge1 = _bilinear_align_corners(edge_n, H, W)
    x1 = jnp.concatenate([edge1, r], axis=-1)

    w = jnp.transpose(params["conv1_w"], (2, 3, 1, 0)).astype(jnp.float32)
    y = lax.conv_general_dilated(
        x1, w, window_strides=(1, 1), padding="SAME",
        dimension_numbers=("NHWC", "HWIO", "NHWC"),
    ) + params["conv1_b"].reshape(1, 1, 1, Cf)

    mean = jnp.mean(y, axis=(0, 1, 2), keepdims=True)
    var = jnp.mean((y - mean) ** 2, axis=(0, 1, 2), keepdims=True)
    x2 = (y - mean) * lax.rsqrt(var + 1e-5) * params["bn_gamma"].reshape(
        1, 1, 1, Cf) + params["bn_beta"].reshape(1, 1, 1, Cf)
    x2 = jnp.maximum(x2, 0.0)

    w2 = params["mlp_w"].reshape(1, Cf)
    x3 = jax.nn.sigmoid(jnp.einsum("bhwc,oc->bhwo", x2, w2) + params["mlp_b"])
    out = x3 * x2 + f_n
    return jnp.transpose(out, (0, 3, 1, 2))


# ----------------------------------------------------------------------------
# Main
# ----------------------------------------------------------------------------
if __name__ == "__main__":
    key = jax.random.PRNGKey(0)
    ks = jax.random.split(key, 9)

    B, C, H, W = 2, 64, 16, 16
    He, We = 8, 8

    params = {
        "conv1_w": jax.random.normal(ks[0], (64, 128, 3, 3), jnp.float32) * 0.05,
        "conv1_b": jax.random.normal(ks[1], (64,), jnp.float32) * 0.05,
        "bn_gamma": jax.random.uniform(ks[2], (64,), jnp.float32, 0.5, 1.5),
        "bn_beta": jax.random.normal(ks[3], (64,), jnp.float32) * 0.05,
        "mlp_w": jax.random.normal(ks[4], (1, 64, 1, 1), jnp.float32) * 0.1,
        "mlp_b": jax.random.normal(ks[5], (1,), jnp.float32) * 0.05,
    }

    pre = jax.random.normal(ks[6], (B, 1, H, W), jnp.float32)
    edge = jax.random.normal(ks[7], (B, C, He, We), jnp.float32)
    f = jax.random.normal(ks[8], (B, C, H, W), jnp.float32)

    ref = jax.block_until_ready(rcg_reference(pre, edge, f, params))

    # f32 operand path (tight check)
    out32 = jax.block_until_ready(
        rcg_forward(pre, edge, f, params, use_bf16_matmul=False))
    assert out32.shape == (B, C, H, W)
    err32 = float(jnp.max(jnp.abs(out32 - ref)))
    assert err32 < 2e-3, err32

    # default bf16-MXU-operand path (looser check: bf16 operands, bf16 y)
    out16 = jax.block_until_ready(rcg_forward(pre, edge, f, params))
    assert out16.shape == (B, C, H, W)
    err16 = float(jnp.max(jnp.abs(out16 - ref)))
    assert err16 < 5e-2, err16

    print("KERNEL_OK")
</pallas_src>

<mosaic_0001>
module attributes {stable_mosaic.version = 11 : i64} {
  func.func @rcg_post_kernel(%arg0: i32, %arg1: i32, %arg2: memref<1x64x256xf32, #tpu.memory_space<vmem>>, %arg3: memref<1x64x256xf32, #tpu.memory_space<vmem>>, %arg4: memref<64x1xf32, #tpu.memory_space<vmem>>, %arg5: memref<64x1xf32, #tpu.memory_space<vmem>>, %arg6: memref<1x64xf32, #tpu.memory_space<vmem>>, %arg7: memref<1x1xf32, #tpu.memory_space<vmem>>, %arg8: memref<1x64x256xf32, #tpu.memory_space<vmem>>) attributes {dimension_semantics = [#tpu.dimension_semantics<parallel>, #tpu.dimension_semantics<parallel>], iteration_bounds = array<i64: 2, 1>, scalar_prefetch = 0 : i64, scratch_operands = 0 : i64, tpu.core_type = #tpu.core_type<tc>, window_params = [{transform_indices = @transform_0, window_bounds = array<i64: 1, 64, 256>}, {transform_indices = @transform_1, window_bounds = array<i64: 1, 64, 256>}, {pipeline_mode = #tpu.pipeline_mode<synchronous>, transform_indices = @transform_2, window_bounds = array<i64: 64, 1>}, {pipeline_mode = #tpu.pipeline_mode<synchronous>, transform_indices = @transform_3, window_bounds = array<i64: 64, 1>}, {pipeline_mode = #tpu.pipeline_mode<synchronous>, transform_indices = @transform_4, window_bounds = array<i64: 1, 64>}, {pipeline_mode = #tpu.pipeline_mode<synchronous>, transform_indices = @transform_5, window_bounds = array<i64: 1, 1>}, {transform_indices = @transform_6, window_bounds = array<i64: 1, 64, 256>}]} {
    %c0 = arith.constant 0 : index
    %c0_0 = arith.constant 0 : index
    %c0_1 = arith.constant 0 : index
    %0 = vector.load %arg2[%c0, %c0_0, %c0_1] : memref<1x64x256xf32, #tpu.memory_space<vmem>>, vector<1x64x256xf32>
    %1 = vector.shape_cast %0 : vector<1x64x256xf32> to vector<64x256xf32>
    %c0_2 = arith.constant 0 : index
    %c0_3 = arith.constant 0 : index
    %2 = vector.load %arg4[%c0_2, %c0_3] : memref<64x1xf32, #tpu.memory_space<vmem>>, vector<64x1xf32>
    %3 = vector.broadcast %2 : vector<64x1xf32> to vector<64x256xf32>
    %4 = arith.mulf %1, %3 : vector<64x256xf32>
    %c0_4 = arith.constant 0 : index
    %c0_5 = arith.constant 0 : index
    %5 = vector.load %arg5[%c0_4, %c0_5] : memref<64x1xf32, #tpu.memory_space<vmem>>, vector<64x1xf32>
    %6 = vector.broadcast %5 : vector<64x1xf32> to vector<64x256xf32>
    %7 = arith.addf %4, %6 : vector<64x256xf32>
    %cst = arith.constant 0.000000e+00 : f32
    %8 = vector.broadcast %cst : f32 to vector<64x256xf32>
    %9 = arith.maximumf %7, %8 : vector<64x256xf32>
    %c0_6 = arith.constant 0 : index
    %c0_7 = arith.constant 0 : index
    %10 = vector.load %arg6[%c0_6, %c0_7] : memref<1x64xf32, #tpu.memory_space<vmem>>, vector<1x64xf32>
    %cst_8 = arith.constant dense<0.000000e+00> : vector<1x256xf32>
    %11 = tpu.matmul %10, %9, %cst_8 {dimension_numbers = #tpu.dot_dimension_numbers<[1], [0], [0], [1], [0, 0, 1, 1], [], []>} : vector<1x64xf32>, vector<64x256xf32>, vector<1x256xf32> -> vector<1x256xf32>
    %c0_9 = arith.constant 0 : index
    %c0_10 = arith.constant 0 : index
    %12 = vector.load %arg7[%c0_9, %c0_10] : memref<1x1xf32, #tpu.memory_space<vmem>>, vector<1x1xf32>
    %13 = vector.broadcast %12 : vector<1x1xf32> to vector<1x256xf32>
    %14 = arith.addf %11, %13 : vector<1x256xf32>
    %15 = arith.negf %14 : vector<1x256xf32>
    %16 = math.exp %15 : vector<1x256xf32>
    %cst_11 = arith.constant 1.000000e+00 : f32
    %17 = vector.broadcast %cst_11 : f32 to vector<1x256xf32>
    %18 = arith.addf %17, %16 : vector<1x256xf32>
    %19 = arith.divf %17, %18 : vector<1x256xf32>
    %20 = vector.broadcast %19 : vector<1x256xf32> to vector<64x256xf32>
    %21 = arith.mulf %20, %9 : vector<64x256xf32>
    %c0_12 = arith.constant 0 : index
    %c0_13 = arith.constant 0 : index
    %c0_14 = arith.constant 0 : index
    %22 = vector.load %arg3[%c0_12, %c0_13, %c0_14] : memref<1x64x256xf32, #tpu.memory_space<vmem>>, vector<1x64x256xf32>
    %23 = vector.shape_cast %22 : vector<1x64x256xf32> to vector<64x256xf32>
    %24 = arith.addf %21, %23 : vector<64x256xf32>
    %c0_15 = arith.constant 0 : index
    %c0_16 = arith.constant 0 : index
    %c0_17 = arith.constant 0 : index
    %25 = vector.load %arg8[%c0_15, %c0_16, %c0_17] : memref<1x64x256xf32, #tpu.memory_space<vmem>>, vector<1x64x256xf32>
    %26 = vector.shape_cast %25 : vector<1x64x256xf32> to vector<64x256xf32>
    %27 = vector.shape_cast %24 : vector<64x256xf32> to vector<1x64x256xf32>
    tpu.vector_store %arg8[%c0_15, %c0_16, %c0_17], %27 {strides = array<i32>} : memref<1x64x256xf32, #tpu.memory_space<vmem>>, vector<1x64x256xf32>,
    return
  }
  func.func @transform_0(%arg0: i32, %arg1: i32) -> (i32, i32, i32) {
    %c0_i32 = arith.constant 0 : i32
    %c0_i32_0 = arith.constant 0 : i32
    return %arg0, %c0_i32, %arg1 : i32, i32, i32
  }
  func.func @transform_1(%arg0: i32, %arg1: i32) -> (i32, i32, i32) {
    %c0_i32 = arith.constant 0 : i32
    %c0_i32_0 = arith.constant 0 : i32
    return %arg0, %c0_i32, %arg1 : i32, i32, i32
  }
  func.func @transform_2(%arg0: i32, %arg1: i32) -> (i32, i32) {
    %c0_i32 = arith.constant 0 : i32
    %c0_i32_0 = arith.constant 0 : i32
    %c0_i32_1 = arith.constant 0 : i32
    return %c0_i32, %c0_i32_0 : i32, i32
  }
  func.func @transform_3(%arg0: i32, %arg1: i32) -> (i32, i32) {
    %c0_i32 = arith.constant 0 : i32
    %c0_i32_0 = arith.constant 0 : i32
    %c0_i32_1 = arith.constant 0 : i32
    return %c0_i32, %c0_i32_0 : i32, i32
  }
  func.func @transform_4(%arg0: i32, %arg1: i32) -> (i32, i32) {
    %c0_i32 = arith.constant 0 : i32
    %c0_i32_0 = arith.constant 0 : i32
    %c0_i32_1 = arith.constant 0 : i32
    return %c0_i32, %c0_i32_0 : i32, i32
  }
  func.func @transform_5(%arg0: i32, %arg1: i32) -> (i32, i32) {
    %c0_i32 = arith.constant 0 : i32
    %c0_i32_0 = arith.constant 0 : i32
    %c0_i32_1 = arith.constant 0 : i32
    return %c0_i32, %c0_i32_0 : i32, i32
  }
  func.func @transform_6(%arg0: i32, %arg1: i32) -> (i32, i32, i32) {
    %c0_i32 = arith.constant 0 : i32
    %c0_i32_0 = arith.constant 0 : i32
    return %arg0, %c0_i32, %arg1 : i32, i32, i32
  }
}

module attributes {stable_mosaic.version = 11 : i64} {
  func.func @rcg_conv_kernel(%arg0: i32, %arg1: i32, %arg2: memref<18xi32, #tpu.memory_space<smem>>, %arg3: memref<18xi32, #tpu.memory_space<smem>>, %arg4: memref<18xf32, #tpu.memory_space<smem>>, %arg5: memref<18xf32, #tpu.memory_space<smem>>, %arg6: memref<1x16x16x1xf32, #tpu.memory_space<vmem>>, %arg7: memref<1x16x16x64xf32, #tpu.memory_space<vmem>>, %arg8: memref<1x1x16x1xf32, #tpu.memory_space<vmem>>, %arg9: memref<1x1x16x64xf32, #tpu.memory_space<vmem>>, %arg10: memref<1x1x16x1xf32, #tpu.memory_space<vmem>>, %arg11: memref<1x1x16x64xf32, #tpu.memory_space<vmem>>, %arg12: memref<1x8x16x64xf32, #tpu.memory_space<vmem>>, %arg13: memref<3x3x128x64xf32, #tpu.memory_space<vmem>>, %arg14: memref<1x64xf32, #tpu.memory_space<vmem>>, %arg15: memref<1x64x256xf32, #tpu.memory_space<vmem>>, %arg16: memref<1x1x1x128xf32, #tpu.memory_space<vmem>>, %arg17: memref<18x18x128xf32, #tpu.memory_space<vmem>>) attributes {dimension_semantics = [#tpu.dimension_semantics<parallel>, #tpu.dimension_semantics<parallel>], iteration_bounds = array<i64: 2, 1>, scalar_prefetch = 4 : i64, scratch_operands = 1 : i64, tpu.core_type = #tpu.core_type<tc>, window_params = [{transform_indices = @transform_0, window_bounds = array<i64: 1, 16, 16, 1>}, {transform_indices = @transform_1, window_bounds = array<i64: 1, 16, 16, 64>}, {transform_indices = @transform_2, window_bounds = array<i64: 1, 1, 16, 1>}, {transform_indices = @transform_3, window_bounds = array<i64: 1, 1, 16, 64>}, {transform_indices = @transform_4, window_bounds = array<i64: 1, 1, 16, 1>}, {transform_indices = @transform_5, window_bounds = array<i64: 1, 1, 16, 64>}, {transform_indices = @transform_6, window_bounds = array<i64: 1, 8, 16, 64>}, {pipeline_mode = #tpu.pipeline_mode<synchronous>, transform_indices = @transform_7, window_bounds = array<i64: 3, 3, 128, 64>}, {pipeline_mode = #tpu.pipeline_mode<synchronous>, transform_indices = @transform_8, window_bounds = array<i64: 1, 64>}, {transform_indices = @transform_9, window_bounds = array<i64: 1, 64, 256>}, {transform_indices = @transform_10, window_bounds = array<i64: 1, 1, 1, 128>}]} {
    %cst = arith.constant 0.000000e+00 : f32
    %0 = vector.broadcast %cst : f32 to vector<18x1x128xf32>
    %c0 = arith.constant 0 : index
    %c0_0 = arith.constant 0 : index
    %c0_1 = arith.constant 0 : index
    %1 = vector.load %arg17[%c0, %c0_0, %c0_1] : memref<18x18x128xf32, #tpu.memory_space<vmem>>, vector<18x1x128xf32>
    tpu.vector_store %arg17[%c0, %c0_0, %c0_1], %0 {strides = array<i32>} : memref<18x18x128xf32, #tpu.memory_space<vmem>>, vector<18x1x128xf32>,
    %c0_2 = arith.constant 0 : index
    %c17 = arith.constant 17 : index
    %c0_3 = arith.constant 0 : index
    %2 = vector.load %arg17[%c0_2, %c17, %c0_3] : memref<18x18x128xf32, #tpu.memory_space<vmem>>, vector<18x1x128xf32>
    tpu.vector_store %arg17[%c0_2, %c17, %c0_3], %0 {strides = array<i32>} : memref<18x18x128xf32, #tpu.memory_space<vmem>>, vector<18x1x128xf32>,
    %c0_4 = arith.constant 0 : index
    %c0_5 = arith.constant 0 : index
    %c0_6 = arith.constant 0 : index
    %c0_7 = arith.constant 0 : index
    %3 = vector.load %arg6[%c0_4, %c0_5, %c0_6, %c0_7] : memref<1x16x16x1xf32, #tpu.memory_space<vmem>>, vector<1x16x16x1xf32>
    %4 = vector.shape_cast %3 : vector<1x16x16x1xf32> to vector<16x16x1xf32>
    %5 = arith.negf %4 : vector<16x16x1xf32>
    %6 = math.exp %5 : vector<16x16x1xf32>
    %cst_8 = arith.constant 1.000000e+00 : f32
    %7 = vector.broadcast %cst_8 : f32 to vector<16x16x1xf32>
    %8 = arith.addf %7, %6 : vector<16x16x1xf32>
    %9 = arith.divf %7, %8 : vector<16x16x1xf32>
    %cst_9 = arith.constant 1.000000e+00 : f32
    %10 = vector.broadcast %cst_9 : f32 to vector<16x16x1xf32>
    %11 = arith.subf %10, %9 : vector<16x16x1xf32>
    %c0_10 = arith.constant 0 : index
    %c0_11 = arith.constant 0 : index
    %c0_12 = arith.constant 0 : index
    %c0_13 = arith.constant 0 : index
    %12 = vector.load %arg7[%c0_10, %c0_11, %c0_12, %c0_13] : memref<1x16x16x64xf32, #tpu.memory_space<vmem>>, vector<1x16x16x64xf32>
    %13 = vector.shape_cast %12 : vector<1x16x16x64xf32> to vector<16x16x64xf32>
    %14 = vector.broadcast %11 : vector<16x16x1xf32> to vector<16x16x64xf32>
    %15 = arith.mulf %14, %13 : vector<16x16x64xf32>
    %c1 = arith.constant 1 : index
    %c1_14 = arith.constant 1 : index
    %c64 = arith.constant 64 : index
    %16 = vector.load %arg17[%c1, %c1_14, %c64] : memref<18x18x128xf32, #tpu.memory_space<vmem>>, vector<16x16x64xf32>
    tpu.vector_store %arg17[%c1, %c1_14, %c64], %15 {strides = array<i32>} : memref<18x18x128xf32, #tpu.memory_space<vmem>>, vector<16x16x64xf32>,
    %c0_15 = arith.constant 0 : index
    %c0_16 = arith.constant 0 : index
    %c0_17 = arith.constant 0 : index
    %c0_18 = arith.constant 0 : index
    %17 = vector.load %arg8[%c0_15, %c0_16, %c0_17, %c0_18] : memref<1x1x16x1xf32, #tpu.memory_space<vmem>>, vector<1x1x16x1xf32>
    %18 = vector.shape_cast %17 : vector<1x1x16x1xf32> to vector<16x1xf32>
    %19 = arith.negf %18 : vector<16x1xf32>
    %20 = math.exp %19 : vector<16x1xf32>
    %cst_19 = arith.constant 1.000000e+00 : f32
    %21 = vector.broadcast %cst_19 : f32 to vector<16x1xf32>
    %22 = arith.addf %21, %20 : vector<16x1xf32>
    %23 = arith.divf %21, %22 : vector<16x1xf32>
    %cst_20 = arith.constant 1.000000e+00 : f32
    %24 = vector.broadcast %cst_20 : f32 to vector<16x1xf32>
    %25 = arith.subf %24, %23 : vector<16x1xf32>
    %c0_21 = arith.constant 0 : index
    %c0_22 = arith.constant 0 : index
    %c0_23 = arith.constant 0 : index
    %c0_24 = arith.constant 0 : index
    %26 = vector.load %arg9[%c0_21, %c0_22, %c0_23, %c0_24] : memref<1x1x16x64xf32, #tpu.memory_space<vmem>>, vector<1x1x16x64xf32>
    %27 = vector.shape_cast %26 : vector<1x1x16x64xf32> to vector<16x64xf32>
    %28 = vector.broadcast %25 : vector<16x1xf32> to vector<16x64xf32>
    %29 = arith.mulf %28, %27 : vector<16x64xf32>
    %30 = vector.shape_cast %29 : vector<16x64xf32> to vector<1x16x64xf32>
    %c0_25 = arith.constant 0 : index
    %c1_26 = arith.constant 1 : index
    %c64_27 = arith.constant 64 : index
    %31 = vector.load %arg17[%c0_25, %c1_26, %c64_27] : memref<18x18x128xf32, #tpu.memory_space<vmem>>, vector<1x16x64xf32>
    tpu.vector_store %arg17[%c0_25, %c1_26, %c64_27], %30 {strides = array<i32>} : memref<18x18x128xf32, #tpu.memory_space<vmem>>, vector<1x16x64xf32>,
    %c0_28 = arith.constant 0 : index
    %c0_29 = arith.constant 0 : index
    %c0_30 = arith.constant 0 : index
    %c0_31 = arith.constant 0 : index
    %32 = vector.load %arg10[%c0_28, %c0_29, %c0_30, %c0_31] : memref<1x1x16x1xf32, #tpu.memory_space<vmem>>, vector<1x1x16x1xf32>
    %33 = vector.shape_cast %32 : vector<1x1x16x1xf32> to vector<16x1xf32>
    %34 = arith.negf %33 : vector<16x1xf32>
    %35 = math.exp %34 : vector<16x1xf32>
    %cst_32 = arith.constant 1.000000e+00 : f32
    %36 = vector.broadcast %cst_32 : f32 to vector<16x1xf32>
    %37 = arith.addf %36, %35 : vector<16x1xf32>
    %38 = arith.divf %36, %37 : vector<16x1xf32>
    %cst_33 = arith.constant 1.000000e+00 : f32
    %39 = vector.broadcast %cst_33 : f32 to vector<16x1xf32>
    %40 = arith.subf %39, %38 : vector<16x1xf32>
    %c0_34 = arith.constant 0 : index
    %c0_35 = arith.constant 0 : index
    %c0_36 = arith.constant 0 : index
    %c0_37 = arith.constant 0 : index
    %41 = vector.load %arg11[%c0_34, %c0_35, %c0_36, %c0_37] : memref<1x1x16x64xf32, #tpu.memory_space<vmem>>, vector<1x1x16x64xf32>
    %42 = vector.shape_cast %41 : vector<1x1x16x64xf32> to vector<16x64xf32>
    %43 = vector.broadcast %40 : vector<16x1xf32> to vector<16x64xf32>
    %44 = arith.mulf %43, %42 : vector<16x64xf32>
    %45 = vector.shape_cast %44 : vector<16x64xf32> to vector<1x16x64xf32>
    %c17_38 = arith.constant 17 : index
    %c1_39 = arith.constant 1 : index
    %c64_40 = arith.constant 64 : index
    %46 = vector.load %arg17[%c17_38, %c1_39, %c64_40] : memref<18x18x128xf32, #tpu.memory_space<vmem>>, vector<1x16x64xf32>
    tpu.vector_store %arg17[%c17_38, %c1_39, %c64_40], %45 {strides = array<i32>} : memref<18x18x128xf32, #tpu.memory_space<vmem>>, vector<1x16x64xf32>,
    %c16_i32 = arith.constant 16 : i32
    %47 = arith.muli %arg1, %c16_i32 : i32
    %c0_i32 = arith.constant 0 : i32
    %48 = arith.addi %47, %c0_i32 : i32
    %49 = arith.index_cast %48 : i32 to index
    %50 = memref.load %arg4[%49] : memref<18xf32, #tpu.memory_space<smem>>
    %51 = arith.index_cast %48 : i32 to index
    %52 = memref.load %arg2[%51] : memref<18xi32, #tpu.memory_space<smem>>
    %c0_41 = arith.constant 0 : index
    %53 = arith.index_cast %52 : i32 to index
    %c0_42 = arith.constant 0 : index
    %c0_43 = arith.constant 0 : index
    %54 = vector.load %arg12[%c0_41, %53, %c0_42, %c0_43] : memref<1x8x16x64xf32, #tpu.memory_space<vmem>>, vector<1x1x16x64xf32>
    %55 = vector.shape_cast %54 : vector<1x1x16x64xf32> to vector<16x64xf32>
    %56 = vector.broadcast %50 : f32 to vector<16x64xf32>
    %57 = arith.mulf %56, %55 : vector<16x64xf32>
    %58 = arith.index_cast %48 : i32 to index
    %59 = memref.load %arg5[%58] : memref<18xf32, #tpu.memory_space<smem>>
    %60 = arith.index_cast %48 : i32 to index
    %61 = memref.load %arg3[%60] : memref<18xi32, #tpu.memory_space<smem>>
    %c0_44 = arith.constant 0 : index
    %62 = arith.index_cast %61 : i32 to index
    %c0_45 = arith.constant 0 : index
    %c0_46 = arith.constant 0 : index
    %63 = vector.load %arg12[%c0_44, %62, %c0_45, %c0_46] : memref<1x8x16x64xf32, #tpu.memory_space<vmem>>, vector<1x1x16x64xf32>
    %64 = vector.shape_cast %63 : vector<1x1x16x64xf32> to vector<16x64xf32>
    %65 = vector.broadcast %59 : f32 to vector<16x64xf32>
    %66 = arith.mulf %65, %64 : vector<16x64xf32>
    %67 = arith.addf %57, %66 : vector<16x64xf32>
    %c0_47 = arith.constant 0 : index
    %c1_48 = arith.constant 1 : index
    %c0_49 = arith.constant 0 : index
    %68 = vector.load %arg17[%c0_47, %c1_48, %c0_49] : memref<18x18x128xf32, #tpu.memory_space<vmem>>, vector<1x16x64xf32>
    %69 = vector.shape_cast %68 : vector<1x16x64xf32> to vector<16x64xf32>
    %70 = vector.shape_cast %67 : vector<16x64xf32> to vector<1x16x64xf32>
    tpu.vector_store %arg17[%c0_47, %c1_48, %c0_49], %70 {strides = array<i32>} : memref<18x18x128xf32, #tpu.memory_space<vmem>>, vector<1x16x64xf32>,
    %c16_i32_50 = arith.constant 16 : i32
    %71 = arith.muli %arg1, %c16_i32_50 : i32
    %c1_i32 = arith.constant 1 : i32
    %72 = arith.addi %71, %c1_i32 : i32
    %73 = arith.index_cast %72 : i32 to index
    %74 = memref.load %arg4[%73] : memref<18xf32, #tpu.memory_space<smem>>
    %75 = arith.index_cast %72 : i32 to index
    %76 = memref.load %arg2[%75] : memref<18xi32, #tpu.memory_space<smem>>
    %c0_51 = arith.constant 0 : index
    %77 = arith.index_cast %76 : i32 to index
    %c0_52 = arith.constant 0 : index
    %c0_53 = arith.constant 0 : index
    %78 = vector.load %arg12[%c0_51, %77, %c0_52, %c0_53] : memref<1x8x16x64xf32, #tpu.memory_space<vmem>>, vector<1x1x16x64xf32>
    %79 = vector.shape_cast %78 : vector<1x1x16x64xf32> to vector<16x64xf32>
    %80 = vector.broadcast %74 : f32 to vector<16x64xf32>
    %81 = arith.mulf %80, %79 : vector<16x64xf32>
    %82 = arith.index_cast %72 : i32 to index
    %83 = memref.load %arg5[%82] : memref<18xf32, #tpu.memory_space<smem>>
    %84 = arith.index_cast %72 : i32 to index
    %85 = memref.load %arg3[%84] : memref<18xi32, #tpu.memory_space<smem>>
    %c0_54 = arith.constant 0 : index
    %86 = arith.index_cast %85 : i32 to index
    %c0_55 = arith.constant 0 : index
    %c0_56 = arith.constant 0 : index
    %87 = vector.load %arg12[%c0_54, %86, %c0_55, %c0_56] : memref<1x8x16x64xf32, #tpu.memory_space<vmem>>, vector<1x1x16x64xf32>
    %88 = vector.shape_cast %87 : vector<1x1x16x64xf32> to vector<16x64xf32>
    %89 = vector.broadcast %83 : f32 to vector<16x64xf32>
    %90 = arith.mulf %89, %88 : vector<16x64xf32>
    %91 = arith.addf %81, %90 : vector<16x64xf32>
    %c1_57 = arith.constant 1 : index
    %c1_58 = arith.constant 1 : index
    %c0_59 = arith.constant 0 : index
    %92 = vector.load %arg17[%c1_57, %c1_58, %c0_59] : memref<18x18x128xf32, #tpu.memory_space<vmem>>, vector<1x16x64xf32>
    %93 = vector.shape_cast %92 : vector<1x16x64xf32> to vector<16x64xf32>
    %94 = vector.shape_cast %91 : vector<16x64xf32> to vector<1x16x64xf32>
    tpu.vector_store %arg17[%c1_57, %c1_58, %c0_59], %94 {strides = array<i32>} : memref<18x18x128xf32, #tpu.memory_space<vmem>>, vector<1x16x64xf32>,
    %c16_i32_60 = arith.constant 16 : i32
    %95 = arith.muli %arg1, %c16_i32_60 : i32
    %c2_i32 = arith.constant 2 : i32
    %96 = arith.addi %95, %c2_i32 : i32
    %97 = arith.index_cast %96 : i32 to index
    %98 = memref.load %arg4[%97] : memref<18xf32, #tpu.memory_space<smem>>
    %99 = arith.index_cast %96 : i32 to index
    %100 = memref.load %arg2[%99] : memref<18xi32, #tpu.memory_space<smem>>
    %c0_61 = arith.constant 0 : index
    %101 = arith.index_cast %100 : i32 to index
    %c0_62 = arith.constant 0 : index
    %c0_63 = arith.constant 0 : index
    %102 = vector.load %arg12[%c0_61, %101, %c0_62, %c0_63] : memref<1x8x16x64xf32, #tpu.memory_space<vmem>>, vector<1x1x16x64xf32>
    %103 = vector.shape_cast %102 : vector<1x1x16x64xf32> to vector<16x64xf32>
    %104 = vector.broadcast %98 : f32 to vector<16x64xf32>
    %105 = arith.mulf %104, %103 : vector<16x64xf32>
    %106 = arith.index_cast %96 : i32 to index
    %107 = memref.load %arg5[%106] : memref<18xf32, #tpu.memory_space<smem>>
    %108 = arith.index_cast %96 : i32 to index
    %109 = memref.load %arg3[%108] : memref<18xi32, #tpu.memory_space<smem>>
    %c0_64 = arith.constant 0 : index
    %110 = arith.index_cast %109 : i32 to index
    %c0_65 = arith.constant 0 : index
    %c0_66 = arith.constant 0 : index
    %111 = vector.load %arg12[%c0_64, %110, %c0_65, %c0_66] : memref<1x8x16x64xf32, #tpu.memory_space<vmem>>, vector<1x1x16x64xf32>
    %112 = vector.shape_cast %111 : vector<1x1x16x64xf32> to vector<16x64xf32>
    %113 = vector.broadcast %107 : f32 to vector<16x64xf32>
    %114 = arith.mulf %113, %112 : vector<16x64xf32>
    %115 = arith.addf %105, %114 : vector<16x64xf32>
    %c2 = arith.constant 2 : index
    %c1_67 = arith.constant 1 : index
    %c0_68 = arith.constant 0 : index
    %116 = vector.load %arg17[%c2, %c1_67, %c0_68] : memref<18x18x128xf32, #tpu.memory_space<vmem>>, vector<1x16x64xf32>
    %117 = vector.shape_cast %116 : vector<1x16x64xf32> to vector<16x64xf32>
    %118 = vector.shape_cast %115 : vector<16x64xf32> to vector<1x16x64xf32>
    tpu.vector_store %arg17[%c2, %c1_67, %c0_68], %118 {strides = array<i32>} : memref<18x18x128xf32, #tpu.memory_space<vmem>>, vector<1x16x64xf32>,
    %c16_i32_69 = arith.constant 16 : i32
    %119 = arith.muli %arg1, %c16_i32_69 : i32
    %c3_i32 = arith.constant 3 : i32
    %120 = arith.addi %119, %c3_i32 : i32
    %121 = arith.index_cast %120 : i32 to index
    %122 = memref.load %arg4[%121] : memref<18xf32, #tpu.memory_space<smem>>
    %123 = arith.index_cast %120 : i32 to index
    %124 = memref.load %arg2[%123] : memref<18xi32, #tpu.memory_space<smem>>
    %c0_70 = arith.constant 0 : index
    %125 = arith.index_cast %124 : i32 to index
    %c0_71 = arith.constant 0 : index
    %c0_72 = arith.constant 0 : index
    %126 = vector.load %arg12[%c0_70, %125, %c0_71, %c0_72] : memref<1x8x16x64xf32, #tpu.memory_space<vmem>>, vector<1x1x16x64xf32>
    %127 = vector.shape_cast %126 : vector<1x1x16x64xf32> to vector<16x64xf32>
    %128 = vector.broadcast %122 : f32 to vector<16x64xf32>
    %129 = arith.mulf %128, %127 : vector<16x64xf32>
    %130 = arith.index_cast %120 : i32 to index
    %131 = memref.load %arg5[%130] : memref<18xf32, #tpu.memory_space<smem>>
    %132 = arith.index_cast %120 : i32 to index
    %133 = memref.load %arg3[%132] : memref<18xi32, #tpu.memory_space<smem>>
    %c0_73 = arith.constant 0 : index
    %134 = arith.index_cast %133 : i32 to index
    %c0_74 = arith.constant 0 : index
    %c0_75 = arith.constant 0 : index
    %135 = vector.load %arg12[%c0_73, %134, %c0_74, %c0_75] : memref<1x8x16x64xf32, #tpu.memory_space<vmem>>, vector<1x1x16x64xf32>
    %136 = vector.shape_cast %135 : vector<1x1x16x64xf32> to vector<16x64xf32>
    %137 = vector.broadcast %131 : f32 to vector<16x64xf32>
    %138 = arith.mulf %137, %136 : vector<16x64xf32>
    %139 = arith.addf %129, %138 : vector<16x64xf32>
    %c3 = arith.constant 3 : index
    %c1_76 = arith.constant 1 : index
    %c0_77 = arith.constant 0 : index
    %140 = vector.load %arg17[%c3, %c1_76, %c0_77] : memref<18x18x128xf32, #tpu.memory_space<vmem>>, vector<1x16x64xf32>
    %141 = vector.shape_cast %140 : vector<1x16x64xf32> to vector<16x64xf32>
    %142 = vector.shape_cast %139 : vector<16x64xf32> to vector<1x16x64xf32>
    tpu.vector_store %arg17[%c3, %c1_76, %c0_77], %142 {strides = array<i32>} : memref<18x18x128xf32, #tpu.memory_space<vmem>>, vector<1x16x64xf32>,
    %c16_i32_78 = arith.constant 16 : i32
    %143 = arith.muli %arg1, %c16_i32_78 : i32
    %c4_i32 = arith.constant 4 : i32
    %144 = arith.addi %143, %c4_i32 : i32
    %145 = arith.index_cast %144 : i32 to index
    %146 = memref.load %arg4[%145] : memref<18xf32, #tpu.memory_space<smem>>
    %147 = arith.index_cast %144 : i32 to index
    %148 = memref.load %arg2[%147] : memref<18xi32, #tpu.memory_space<smem>>
    %c0_79 = arith.constant 0 : index
    %149 = arith.index_cast %148 : i32 to index
    %c0_80 = arith.constant 0 : index
    %c0_81 = arith.constant 0 : index
    %150 = vector.load %arg12[%c0_79, %149, %c0_80, %c0_81] : memref<1x8x16x64xf32, #tpu.memory_space<vmem>>, vector<1x1x16x64xf32>
    %151 = vector.shape_cast %150 : vector<1x1x16x64xf32> to vector<16x64xf32>
    %152 = vector.broadcast %146 : f32 to vector<16x64xf32>
    %153 = arith.mulf %152, %151 : vector<16x64xf32>
    %154 = arith.index_cast %144 : i32 to index
    %155 = memref.load %arg5[%154] : memref<18xf32, #tpu.memory_space<smem>>
    %156 = arith.index_cast %144 : i32 to index
    %157 = memref.load %arg3[%156] : memref<18xi32, #tpu.memory_space<smem>>
    %c0_82 = arith.constant 0 : index
    %158 = arith.index_cast %157 : i32 to index
    %c0_83 = arith.constant 0 : index
    %c0_84 = arith.constant 0 : index
    %159 = vector.load %arg12[%c0_82, %158, %c0_83, %c0_84] : memref<1x8x16x64xf32, #tpu.memory_space<vmem>>, vector<1x1x16x64xf32>
    %160 = vector.shape_cast %159 : vector<1x1x16x64xf32> to vector<16x64xf32>
    %161 = vector.broadcast %155 : f32 to vector<16x64xf32>
    %162 = arith.mulf %161, %160 : vector<16x64xf32>
    %163 = arith.addf %153, %162 : vector<16x64xf32>
    %c4 = arith.constant 4 : index
    %c1_85 = arith.constant 1 : index
    %c0_86 = arith.constant 0 : index
    %164 = vector.load %arg17[%c4, %c1_85, %c0_86] : memref<18x18x128xf32, #tpu.memory_space<vmem>>, vector<1x16x64xf32>
    %165 = vector.shape_cast %164 : vector<1x16x64xf32> to vector<16x64xf32>
    %166 = vector.shape_cast %163 : vector<16x64xf32> to vector<1x16x64xf32>
    tpu.vector_store %arg17[%c4, %c1_85, %c0_86], %166 {strides = array<i32>} : memref<18x18x128xf32, #tpu.memory_space<vmem>>, vector<1x16x64xf32>,
    %c16_i32_87 = arith.constant 16 : i32
    %167 = arith.muli %arg1, %c16_i32_87 : i32
    %c5_i32 = arith.constant 5 : i32
    %168 = arith.addi %167, %c5_i32 : i32
    %169 = arith.index_cast %168 : i32 to index
    %170 = memref.load %arg4[%169] : memref<18xf32, #tpu.memory_space<smem>>
    %171 = arith.index_cast %168 : i32 to index
    %172 = memref.load %arg2[%171] : memref<18xi32, #tpu.memory_space<smem>>
    %c0_88 = arith.constant 0 : index
    %173 = arith.index_cast %172 : i32 to index
    %c0_89 = arith.constant 0 : index
    %c0_90 = arith.constant 0 : index
    %174 = vector.load %arg12[%c0_88, %173, %c0_89, %c0_90] : memref<1x8x16x64xf32, #tpu.memory_space<vmem>>, vector<1x1x16x64xf32>
    %175 = vector.shape_cast %174 : vector<1x1x16x64xf32> to vector<16x64xf32>
    %176 = vector.broadcast %170 : f32 to vector<16x64xf32>
    %177 = arith.mulf %176, %175 : vector<16x64xf32>
    %178 = arith.index_cast %168 : i32 to index
    %179 = memref.load %arg5[%178] : memref<18xf32, #tpu.memory_space<smem>>
    %180 = arith.index_cast %168 : i32 to index
    %181 = memref.load %arg3[%180] : memref<18xi32, #tpu.memory_space<smem>>
    %c0_91 = arith.constant 0 : index
    %182 = arith.index_cast %181 : i32 to index
    %c0_92 = arith.constant 0 : index
    %c0_93 = arith.constant 0 : index
    %183 = vector.load %arg12[%c0_91, %182, %c0_92, %c0_93] : memref<1x8x16x64xf32, #tpu.memory_space<vmem>>, vector<1x1x16x64xf32>
    %184 = vector.shape_cast %183 : vector<1x1x16x64xf32> to vector<16x64xf32>
    %185 = vector.broadcast %179 : f32 to vector<16x64xf32>
    %186 = arith.mulf %185, %184 : vector<16x64xf32>
    %187 = arith.addf %177, %186 : vector<16x64xf32>
    %c5 = arith.constant 5 : index
    %c1_94 = arith.constant 1 : index
    %c0_95 = arith.constant 0 : index
    %188 = vector.load %arg17[%c5, %c1_94, %c0_95] : memref<18x18x128xf32, #tpu.memory_space<vmem>>, vector<1x16x64xf32>
    %189 = vector.shape_cast %188 : vector<1x16x64xf32> to vector<16x64xf32>
    %190 = vector.shape_cast %187 : vector<16x64xf32> to vector<1x16x64xf32>
    tpu.vector_store %arg17[%c5, %c1_94, %c0_95], %190 {strides = array<i32>} : memref<18x18x128xf32, #tpu.memory_space<vmem>>, vector<1x16x64xf32>,
    %c16_i32_96 = arith.constant 16 : i32
    %191 = arith.muli %arg1, %c16_i32_96 : i32
    %c6_i32 = arith.constant 6 : i32
    %192 = arith.addi %191, %c6_i32 : i32
    %193 = arith.index_cast %192 : i32 to index
    %194 = memref.load %arg4[%193] : memref<18xf32, #tpu.memory_space<smem>>
    %195 = arith.index_cast %192 : i32 to index
    %196 = memref.load %arg2[%195] : memref<18xi32, #tpu.memory_space<smem>>
    %c0_97 = arith.constant 0 : index
    %197 = arith.index_cast %196 : i32 to index
    %c0_98 = arith.constant 0 : index
    %c0_99 = arith.constant 0 : index
    %198 = vector.load %arg12[%c0_97, %197, %c0_98, %c0_99] : memref<1x8x16x64xf32, #tpu.memory_space<vmem>>, vector<1x1x16x64xf32>
    %199 = vector.shape_cast %198 : vector<1x1x16x64xf32> to vector<16x64xf32>
    %200 = vector.broadcast %194 : f32 to vector<16x64xf32>
    %201 = arith.mulf %200, %199 : vector<16x64xf32>
    %202 = arith.index_cast %192 : i32 to index
    %203 = memref.load %arg5[%202] : memref<18xf32, #tpu.memory_space<smem>>
    %204 = arith.index_cast %192 : i32 to index
    %205 = memref.load %arg3[%204] : memref<18xi32, #tpu.memory_space<smem>>
    %c0_100 = arith.constant 0 : index
    %206 = arith.index_cast %205 : i32 to index
    %c0_101 = arith.constant 0 : index
    %c0_102 = arith.constant 0 : index
    %207 = vector.load %arg12[%c0_100, %206, %c0_101, %c0_102] : memref<1x8x16x64xf32, #tpu.memory_space<vmem>>, vector<1x1x16x64xf32>
    %208 = vector.shape_cast %207 : vector<1x1x16x64xf32> to vector<16x64xf32>
    %209 = vector.broadcast %203 : f32 to vector<16x64xf32>
    %210 = arith.mulf %209, %208 : vector<16x64xf32>
    %211 = arith.addf %201, %210 : vector<16x64xf32>
    %c6 = arith.constant 6 : index
    %c1_103 = arith.constant 1 : index
    %c0_104 = arith.constant 0 : index
    %212 = vector.load %arg17[%c6, %c1_103, %c0_104] : memref<18x18x128xf32, #tpu.memory_space<vmem>>, vector<1x16x64xf32>
    %213 = vector.shape_cast %212 : vector<1x16x64xf32> to vector<16x64xf32>
    %214 = vector.shape_cast %211 : vector<16x64xf32> to vector<1x16x64xf32>
    tpu.vector_store %arg17[%c6, %c1_103, %c0_104], %214 {strides = array<i32>} : memref<18x18x128xf32, #tpu.memory_space<vmem>>, vector<1x16x64xf32>,
    %c16_i32_105 = arith.constant 16 : i32
    %215 = arith.muli %arg1, %c16_i32_105 : i32
    %c7_i32 = arith.constant 7 : i32
    %216 = arith.addi %215, %c7_i32 : i32
    %217 = arith.index_cast %216 : i32 to index
    %218 = memref.load %arg4[%217] : memref<18xf32, #tpu.memory_space<smem>>
    %219 = arith.index_cast %216 : i32 to index
    %220 = memref.load %arg2[%219] : memref<18xi32, #tpu.memory_space<smem>>
    %c0_106 = arith.constant 0 : index
    %221 = arith.index_cast %220 : i32 to index
    %c0_107 = arith.constant 0 : index
    %c0_108 = arith.constant 0 : index
    %222 = vector.load %arg12[%c0_106, %221, %c0_107, %c0_108] : memref<1x8x16x64xf32, #tpu.memory_space<vmem>>, vector<1x1x16x64xf32>
    %223 = vector.shape_cast %222 : vector<1x1x16x64xf32> to vector<16x64xf32>
    %224 = vector.broadcast %218 : f32 to vector<16x64xf32>
    %225 = arith.mulf %224, %223 : vector<16x64xf32>
    %226 = arith.index_cast %216 : i32 to index
    %227 = memref.load %arg5[%226] : memref<18xf32, #tpu.memory_space<smem>>
    %228 = arith.index_cast %216 : i32 to index
    %229 = memref.load %arg3[%228] : memref<18xi32, #tpu.memory_space<smem>>
    %c0_109 = arith.constant 0 : index
    %230 = arith.index_cast %229 : i32 to index
    %c0_110 = arith.constant 0 : index
    %c0_111 = arith.constant 0 : index
    %231 = vector.load %arg12[%c0_109, %230, %c0_110, %c0_111] : memref<1x8x16x64xf32, #tpu.memory_space<vmem>>, vector<1x1x16x64xf32>
    %232 = vector.shape_cast %231 : vector<1x1x16x64xf32> to vector<16x64xf32>
    %233 = vector.broadcast %227 : f32 to vector<16x64xf32>
    %234 = arith.mulf %233, %232 : vector<16x64xf32>
    %235 = arith.addf %225, %234 : vector<16x64xf32>
    %c7 = arith.constant 7 : index
    %c1_112 = arith.constant 1 : index
    %c0_113 = arith.constant 0 : index
    %236 = vector.load %arg17[%c7, %c1_112, %c0_113] : memref<18x18x128xf32, #tpu.memory_space<vmem>>, vector<1x16x64xf32>
    %237 = vector.shape_cast %236 : vector<1x16x64xf32> to vector<16x64xf32>
    %238 = vector.shape_cast %235 : vector<16x64xf32> to vector<1x16x64xf32>
    tpu.vector_store %arg17[%c7, %c1_112, %c0_113], %238 {strides = array<i32>} : memref<18x18x128xf32, #tpu.memory_space<vmem>>, vector<1x16x64xf32>,
    %c16_i32_114 = arith.constant 16 : i32
    %239 = arith.muli %arg1, %c16_i32_114 : i32
    %c8_i32 = arith.constant 8 : i32
    %240 = arith.addi %239, %c8_i32 : i32
    %241 = arith.index_cast %240 : i32 to index
    %242 = memref.load %arg4[%241] : memref<18xf32, #tpu.memory_space<smem>>
    %243 = arith.index_cast %240 : i32 to index
    %244 = memref.load %arg2[%243] : memref<18xi32, #tpu.memory_space<smem>>
    %c0_115 = arith.constant 0 : index
    %245 = arith.index_cast %244 : i32 to index
    %c0_116 = arith.constant 0 : index
    %c0_117 = arith.constant 0 : index
    %246 = vector.load %arg12[%c0_115, %245, %c0_116, %c0_117] : memref<1x8x16x64xf32, #tpu.memory_space<vmem>>, vector<1x1x16x64xf32>
    %247 = vector.shape_cast %246 : vector<1x1x16x64xf32> to vector<16x64xf32>
    %248 = vector.broadcast %242 : f32 to vector<16x64xf32>
    %249 = arith.mulf %248, %247 : vector<16x64xf32>
    %250 = arith.index_cast %240 : i32 to index
    %251 = memref.load %arg5[%250] : memref<18xf32, #tpu.memory_space<smem>>
    %252 = arith.index_cast %240 : i32 to index
    %253 = memref.load %arg3[%252] : memref<18xi32, #tpu.memory_space<smem>>
    %c0_118 = arith.constant 0 : index
    %254 = arith.index_cast %253 : i32 to index
    %c0_119 = arith.constant 0 : index
    %c0_120 = arith.constant 0 : index
    %255 = vector.load %arg12[%c0_118, %254, %c0_119, %c0_120] : memref<1x8x16x64xf32, #tpu.memory_space<vmem>>, vector<1x1x16x64xf32>
    %256 = vector.shape_cast %255 : vector<1x1x16x64xf32> to vector<16x64xf32>
    %257 = vector.broadcast %251 : f32 to vector<16x64xf32>
    %258 = arith.mulf %257, %256 : vector<16x64xf32>
    %259 = arith.addf %249, %258 : vector<16x64xf32>
    %c8 = arith.constant 8 : index
    %c1_121 = arith.constant 1 : index
    %c0_122 = arith.constant 0 : index
    %260 = vector.load %arg17[%c8, %c1_121, %c0_122] : memref<18x18x128xf32, #tpu.memory_space<vmem>>, vector<1x16x64xf32>
    %261 = vector.shape_cast %260 : vector<1x16x64xf32> to vector<16x64xf32>
    %262 = vector.shape_cast %259 : vector<16x64xf32> to vector<1x16x64xf32>
    tpu.vector_store %arg17[%c8, %c1_121, %c0_122], %262 {strides = array<i32>} : memref<18x18x128xf32, #tpu.memory_space<vmem>>, vector<1x16x64xf32>,
    %c16_i32_123 = arith.constant 16 : i32
    %263 = arith.muli %arg1, %c16_i32_123 : i32
    %c9_i32 = arith.constant 9 : i32
    %264 = arith.addi %263, %c9_i32 : i32
    %265 = arith.index_cast %264 : i32 to index
    %266 = memref.load %arg4[%265] : memref<18xf32, #tpu.memory_space<smem>>
    %267 = arith.index_cast %264 : i32 to index
    %268 = memref.load %arg2[%267] : memref<18xi32, #tpu.memory_space<smem>>
    %c0_124 = arith.constant 0 : index
    %269 = arith.index_cast %268 : i32 to index
    %c0_125 = arith.constant 0 : index
    %c0_126 = arith.constant 0 : index
    %270 = vector.load %arg12[%c0_124, %269, %c0_125, %c0_126] : memref<1x8x16x64xf32, #tpu.memory_space<vmem>>, vector<1x1x16x64xf32>
    %271 = vector.shape_cast %270 : vector<1x1x16x64xf32> to vector<16x64xf32>
    %272 = vector.broadcast %266 : f32 to vector<16x64xf32>
    %273 = arith.mulf %272, %271 : vector<16x64xf32>
    %274 = arith.index_cast %264 : i32 to index
    %275 = memref.load %arg5[%274] : memref<18xf32, #tpu.memory_space<smem>>
    %276 = arith.index_cast %264 : i32 to index
    %277 = memref.load %arg3[%276] : memref<18xi32, #tpu.memory_space<smem>>
    %c0_127 = arith.constant 0 : index
    %278 = arith.index_cast %277 : i32 to index
    %c0_128 = arith.constant 0 : index
    %c0_129 = arith.constant 0 : index
    %279 = vector.load %arg12[%c0_127, %278, %c0_128, %c0_129] : memref<1x8x16x64xf32, #tpu.memory_space<vmem>>, vector<1x1x16x64xf32>
    %280 = vector.shape_cast %279 : vector<1x1x16x64xf32> to vector<16x64xf32>
    %281 = vector.broadcast %275 : f32 to vector<16x64xf32>
    %282 = arith.mulf %281, %280 : vector<16x64xf32>
    %283 = arith.addf %273, %282 : vector<16x64xf32>
    %c9 = arith.constant 9 : index
    %c1_130 = arith.constant 1 : index
    %c0_131 = arith.constant 0 : index
    %284 = vector.load %arg17[%c9, %c1_130, %c0_131] : memref<18x18x128xf32, #tpu.memory_space<vmem>>, vector<1x16x64xf32>
    %285 = vector.shape_cast %284 : vector<1x16x64xf32> to vector<16x64xf32>
    %286 = vector.shape_cast %283 : vector<16x64xf32> to vector<1x16x64xf32>
    tpu.vector_store %arg17[%c9, %c1_130, %c0_131], %286 {strides = array<i32>} : memref<18x18x128xf32, #tpu.memory_space<vmem>>, vector<1x16x64xf32>,
    %c16_i32_132 = arith.constant 16 : i32
    %287 = arith.muli %arg1, %c16_i32_132 : i32
    %c10_i32 = arith.constant 10 : i32
    %288 = arith.addi %287, %c10_i32 : i32
    %289 = arith.index_cast %288 : i32 to index
    %290 = memref.load %arg4[%289] : memref<18xf32, #tpu.memory_space<smem>>
    %291 = arith.index_cast %288 : i32 to index
    %292 = memref.load %arg2[%291] : memref<18xi32, #tpu.memory_space<smem>>
    %c0_133 = arith.constant 0 : index
    %293 = arith.index_cast %292 : i32 to index
    %c0_134 = arith.constant 0 : index
    %c0_135 = arith.constant 0 : index
    %294 = vector.load %arg12[%c0_133, %293, %c0_134, %c0_135] : memref<1x8x16x64xf32, #tpu.memory_space<vmem>>, vector<1x1x16x64xf32>
    %295 = vector.shape_cast %294 : vector<1x1x16x64xf32> to vector<16x64xf32>
    %296 = vector.broadcast %290 : f32 to vector<16x64xf32>
    %297 = arith.mulf %296, %295 : vector<16x64xf32>
    %298 = arith.index_cast %288 : i32 to index
    %299 = memref.load %arg5[%298] : memref<18xf32, #tpu.memory_space<smem>>
    %300 = arith.index_cast %288 : i32 to index
    %301 = memref.load %arg3[%300] : memref<18xi32, #tpu.memory_space<smem>>
    %c0_136 = arith.constant 0 : index
    %302 = arith.index_cast %301 : i32 to index
    %c0_137 = arith.constant 0 : index
    %c0_138 = arith.constant 0 : index
    %303 = vector.load %arg12[%c0_136, %302, %c0_137, %c0_138] : memref<1x8x16x64xf32, #tpu.memory_space<vmem>>, vector<1x1x16x64xf32>
    %304 = vector.shape_cast %303 : vector<1x1x16x64xf32> to vector<16x64xf32>
    %305 = vector.broadcast %299 : f32 to vector<16x64xf32>
    %306 = arith.mulf %305, %304 : vector<16x64xf32>
    %307 = arith.addf %297, %306 : vector<16x64xf32>
    %c10 = arith.constant 10 : index
    %c1_139 = arith.constant 1 : index
    %c0_140 = arith.constant 0 : index
    %308 = vector.load %arg17[%c10, %c1_139, %c0_140] : memref<18x18x128xf32, #tpu.memory_space<vmem>>, vector<1x16x64xf32>
    %309 = vector.shape_cast %308 : vector<1x16x64xf32> to vector<16x64xf32>
    %310 = vector.shape_cast %307 : vector<16x64xf32> to vector<1x16x64xf32>
    tpu.vector_store %arg17[%c10, %c1_139, %c0_140], %310 {strides = array<i32>} : memref<18x18x128xf32, #tpu.memory_space<vmem>>, vector<1x16x64xf32>,
    %c16_i32_141 = arith.constant 16 : i32
    %311 = arith.muli %arg1, %c16_i32_141 : i32
    %c11_i32 = arith.constant 11 : i32
    %312 = arith.addi %311, %c11_i32 : i32
    %313 = arith.index_cast %312 : i32 to index
    %314 = memref.load %arg4[%313] : memref<18xf32, #tpu.memory_space<smem>>
    %315 = arith.index_cast %312 : i32 to index
    %316 = memref.load %arg2[%315] : memref<18xi32, #tpu.memory_space<smem>>
    %c0_142 = arith.constant 0 : index
    %317 = arith.index_cast %316 : i32 to index
    %c0_143 = arith.constant 0 : index
    %c0_144 = arith.constant 0 : index
    %318 = vector.load %arg12[%c0_142, %317, %c0_143, %c0_144] : memref<1x8x16x64xf32, #tpu.memory_space<vmem>>, vector<1x1x16x64xf32>
    %319 = vector.shape_cast %318 : vector<1x1x16x64xf32> to vector<16x64xf32>
    %320 = vector.broadcast %314 : f32 to vector<16x64xf32>
    %321 = arith.mulf %320, %319 : vector<16x64xf32>
    %322 = arith.index_cast %312 : i32 to index
    %323 = memref.load %arg5[%322] : memref<18xf32, #tpu.memory_space<smem>>
    %324 = arith.index_cast %312 : i32 to index
    %325 = memref.load %arg3[%324] : memref<18xi32, #tpu.memory_space<smem>>
    %c0_145 = arith.constant 0 : index
    %326 = arith.index_cast %325 : i32 to index
    %c0_146 = arith.constant 0 : index
    %c0_147 = arith.constant 0 : index
    %327 = vector.load %arg12[%c0_145, %326, %c0_146, %c0_147] : memref<1x8x16x64xf32, #tpu.memory_space<vmem>>, vector<1x1x16x64xf32>
    %328 = vector.shape_cast %327 : vector<1x1x16x64xf32> to vector<16x64xf32>
    %329 = vector.broadcast %323 : f32 to vector<16x64xf32>
    %330 = arith.mulf %329, %328 : vector<16x64xf32>
    %331 = arith.addf %321, %330 : vector<16x64xf32>
    %c11 = arith.constant 11 : index
    %c1_148 = arith.constant 1 : index
    %c0_149 = arith.constant 0 : index
    %332 = vector.load %arg17[%c11, %c1_148, %c0_149] : memref<18x18x128xf32, #tpu.memory_space<vmem>>, vector<1x16x64xf32>
    %333 = vector.shape_cast %332 : vector<1x16x64xf32> to vector<16x64xf32>
    %334 = vector.shape_cast %331 : vector<16x64xf32> to vector<1x16x64xf32>
    tpu.vector_store %arg17[%c11, %c1_148, %c0_149], %334 {strides = array<i32>} : memref<18x18x128xf32, #tpu.memory_space<vmem>>, vector<1x16x64xf32>,
    %c16_i32_150 = arith.constant 16 : i32
    %335 = arith.muli %arg1, %c16_i32_150 : i32
    %c12_i32 = arith.constant 12 : i32
    %336 = arith.addi %335, %c12_i32 : i32
    %337 = arith.index_cast %336 : i32 to index
    %338 = memref.load %arg4[%337] : memref<18xf32, #tpu.memory_space<smem>>
    %339 = arith.index_cast %336 : i32 to index
    %340 = memref.load %arg2[%339] : memref<18xi32, #tpu.memory_space<smem>>
    %c0_151 = arith.constant 0 : index
    %341 = arith.index_cast %340 : i32 to index
    %c0_152 = arith.constant 0 : index
    %c0_153 = arith.constant 0 : index
    %342 = vector.load %arg12[%c0_151, %341, %c0_152, %c0_153] : memref<1x8x16x64xf32, #tpu.memory_space<vmem>>, vector<1x1x16x64xf32>
    %343 = vector.shape_cast %342 : vector<1x1x16x64xf32> to vector<16x64xf32>
    %344 = vector.broadcast %338 : f32 to vector<16x64xf32>
    %345 = arith.mulf %344, %343 : vector<16x64xf32>
    %346 = arith.index_cast %336 : i32 to index
    %347 = memref.load %arg5[%346] : memref<18xf32, #tpu.memory_space<smem>>
    %348 = arith.index_cast %336 : i32 to index
    %349 = memref.load %arg3[%348] : memref<18xi32, #tpu.memory_space<smem>>
    %c0_154 = arith.constant 0 : index
    %350 = arith.index_cast %349 : i32 to index
    %c0_155 = arith.constant 0 : index
    %c0_156 = arith.constant 0 : index
    %351 = vector.load %arg12[%c0_154, %350, %c0_155, %c0_156] : memref<1x8x16x64xf32, #tpu.memory_space<vmem>>, vector<1x1x16x64xf32>
    %352 = vector.shape_cast %351 : vector<1x1x16x64xf32> to vector<16x64xf32>
    %353 = vector.broadcast %347 : f32 to vector<16x64xf32>
    %354 = arith.mulf %353, %352 : vector<16x64xf32>
    %355 = arith.addf %345, %354 : vector<16x64xf32>
    %c12 = arith.constant 12 : index
    %c1_157 = arith.constant 1 : index
    %c0_158 = arith.constant 0 : index
    %356 = vector.load %arg17[%c12, %c1_157, %c0_158] : memref<18x18x128xf32, #tpu.memory_space<vmem>>, vector<1x16x64xf32>
    %357 = vector.shape_cast %356 : vector<1x16x64xf32> to vector<16x64xf32>
    %358 = vector.shape_cast %355 : vector<16x64xf32> to vector<1x16x64xf32>
    tpu.vector_store %arg17[%c12, %c1_157, %c0_158], %358 {strides = array<i32>} : memref<18x18x128xf32, #tpu.memory_space<vmem>>, vector<1x16x64xf32>,
    %c16_i32_159 = arith.constant 16 : i32
    %359 = arith.muli %arg1, %c16_i32_159 : i32
    %c13_i32 = arith.constant 13 : i32
    %360 = arith.addi %359, %c13_i32 : i32
    %361 = arith.index_cast %360 : i32 to index
    %362 = memref.load %arg4[%361] : memref<18xf32, #tpu.memory_space<smem>>
    %363 = arith.index_cast %360 : i32 to index
    %364 = memref.load %arg2[%363] : memref<18xi32, #tpu.memory_space<smem>>
    %c0_160 = arith.constant 0 : index
    %365 = arith.index_cast %364 : i32 to index
    %c0_161 = arith.constant 0 : index
    %c0_162 = arith.constant 0 : index
    %366 = vector.load %arg12[%c0_160, %365, %c0_161, %c0_162] : memref<1x8x16x64xf32, #tpu.memory_space<vmem>>, vector<1x1x16x64xf32>
    %367 = vector.shape_cast %366 : vector<1x1x16x64xf32> to vector<16x64xf32>
    %368 = vector.broadcast %362 : f32 to vector<16x64xf32>
    %369 = arith.mulf %368, %367 : vector<16x64xf32>
    %370 = arith.index_cast %360 : i32 to index
    %371 = memref.load %arg5[%370] : memref<18xf32, #tpu.memory_space<smem>>
    %372 = arith.index_cast %360 : i32 to index
    %373 = memref.load %arg3[%372] : memref<18xi32, #tpu.memory_space<smem>>
    %c0_163 = arith.constant 0 : index
    %374 = arith.index_cast %373 : i32 to index
    %c0_164 = arith.constant 0 : index
    %c0_165 = arith.constant 0 : index
    %375 = vector.load %arg12[%c0_163, %374, %c0_164, %c0_165] : memref<1x8x16x64xf32, #tpu.memory_space<vmem>>, vector<1x1x16x64xf32>
    %376 = vector.shape_cast %375 : vector<1x1x16x64xf32> to vector<16x64xf32>
    %377 = vector.broadcast %371 : f32 to vector<16x64xf32>
    %378 = arith.mulf %377, %376 : vector<16x64xf32>
    %379 = arith.addf %369, %378 : vector<16x64xf32>
    %c13 = arith.constant 13 : index
    %c1_166 = arith.constant 1 : index
    %c0_167 = arith.constant 0 : index
    %380 = vector.load %arg17[%c13, %c1_166, %c0_167] : memref<18x18x128xf32, #tpu.memory_space<vmem>>, vector<1x16x64xf32>
    %381 = vector.shape_cast %380 : vector<1x16x64xf32> to vector<16x64xf32>
    %382 = vector.shape_cast %379 : vector<16x64xf32> to vector<1x16x64xf32>
    tpu.vector_store %arg17[%c13, %c1_166, %c0_167], %382 {strides = array<i32>} : memref<18x18x128xf32, #tpu.memory_space<vmem>>, vector<1x16x64xf32>,
    %c16_i32_168 = arith.constant 16 : i32
    %383 = arith.muli %arg1, %c16_i32_168 : i32
    %c14_i32 = arith.constant 14 : i32
    %384 = arith.addi %383, %c14_i32 : i32
    %385 = arith.index_cast %384 : i32 to index
    %386 = memref.load %arg4[%385] : memref<18xf32, #tpu.memory_space<smem>>
    %387 = arith.index_cast %384 : i32 to index
    %388 = memref.load %arg2[%387] : memref<18xi32, #tpu.memory_space<smem>>
    %c0_169 = arith.constant 0 : index
    %389 = arith.index_cast %388 : i32 to index
    %c0_170 = arith.constant 0 : index
    %c0_171 = arith.constant 0 : index
    %390 = vector.load %arg12[%c0_169, %389, %c0_170, %c0_171] : memref<1x8x16x64xf32, #tpu.memory_space<vmem>>, vector<1x1x16x64xf32>
    %391 = vector.shape_cast %390 : vector<1x1x16x64xf32> to vector<16x64xf32>
    %392 = vector.broadcast %386 : f32 to vector<16x64xf32>
    %393 = arith.mulf %392, %391 : vector<16x64xf32>
    %394 = arith.index_cast %384 : i32 to index
    %395 = memref.load %arg5[%394] : memref<18xf32, #tpu.memory_space<smem>>
    %396 = arith.index_cast %384 : i32 to index
    %397 = memref.load %arg3[%396] : memref<18xi32, #tpu.memory_space<smem>>
    %c0_172 = arith.constant 0 : index
    %398 = arith.index_cast %397 : i32 to index
    %c0_173 = arith.constant 0 : index
    %c0_174 = arith.constant 0 : index
    %399 = vector.load %arg12[%c0_172, %398, %c0_173, %c0_174] : memref<1x8x16x64xf32, #tpu.memory_space<vmem>>, vector<1x1x16x64xf32>
    %400 = vector.shape_cast %399 : vector<1x1x16x64xf32> to vector<16x64xf32>
    %401 = vector.broadcast %395 : f32 to vector<16x64xf32>
    %402 = arith.mulf %401, %400 : vector<16x64xf32>
    %403 = arith.addf %393, %402 : vector<16x64xf32>
    %c14 = arith.constant 14 : index
    %c1_175 = arith.constant 1 : index
    %c0_176 = arith.constant 0 : index
    %404 = vector.load %arg17[%c14, %c1_175, %c0_176] : memref<18x18x128xf32, #tpu.memory_space<vmem>>, vector<1x16x64xf32>
    %405 = vector.shape_cast %404 : vector<1x16x64xf32> to vector<16x64xf32>
    %406 = vector.shape_cast %403 : vector<16x64xf32> to vector<1x16x64xf32>
    tpu.vector_store %arg17[%c14, %c1_175, %c0_176], %406 {strides = array<i32>} : memref<18x18x128xf32, #tpu.memory_space<vmem>>, vector<1x16x64xf32>,
    %c16_i32_177 = arith.constant 16 : i32
    %407 = arith.muli %arg1, %c16_i32_177 : i32
    %c15_i32 = arith.constant 15 : i32
    %408 = arith.addi %407, %c15_i32 : i32
    %409 = arith.index_cast %408 : i32 to index
    %410 = memref.load %arg4[%409] : memref<18xf32, #tpu.memory_space<smem>>
    %411 = arith.index_cast %408 : i32 to index
    %412 = memref.load %arg2[%411] : memref<18xi32, #tpu.memory_space<smem>>
    %c0_178 = arith.constant 0 : index
    %413 = arith.index_cast %412 : i32 to index
    %c0_179 = arith.constant 0 : index
    %c0_180 = arith.constant 0 : index
    %414 = vector.load %arg12[%c0_178, %413, %c0_179, %c0_180] : memref<1x8x16x64xf32, #tpu.memory_space<vmem>>, vector<1x1x16x64xf32>
    %415 = vector.shape_cast %414 : vector<1x1x16x64xf32> to vector<16x64xf32>
    %416 = vector.broadcast %410 : f32 to vector<16x64xf32>
    %417 = arith.mulf %416, %415 : vector<16x64xf32>
    %418 = arith.index_cast %408 : i32 to index
    %419 = memref.load %arg5[%418] : memref<18xf32, #tpu.memory_space<smem>>
    %420 = arith.index_cast %408 : i32 to index
    %421 = memref.load %arg3[%420] : memref<18xi32, #tpu.memory_space<smem>>
    %c0_181 = arith.constant 0 : index
    %422 = arith.index_cast %421 : i32 to index
    %c0_182 = arith.constant 0 : index
    %c0_183 = arith.constant 0 : index
    %423 = vector.load %arg12[%c0_181, %422, %c0_182, %c0_183] : memref<1x8x16x64xf32, #tpu.memory_space<vmem>>, vector<1x1x16x64xf32>
    %424 = vector.shape_cast %423 : vector<1x1x16x64xf32> to vector<16x64xf32>
    %425 = vector.broadcast %419 : f32 to vector<16x64xf32>
    %426 = arith.mulf %425, %424 : vector<16x64xf32>
    %427 = arith.addf %417, %426 : vector<16x64xf32>
    %c15 = arith.constant 15 : index
    %c1_184 = arith.constant 1 : index
    %c0_185 = arith.constant 0 : index
    %428 = vector.load %arg17[%c15, %c1_184, %c0_185] : memref<18x18x128xf32, #tpu.memory_space<vmem>>, vector<1x16x64xf32>
    %429 = vector.shape_cast %428 : vector<1x16x64xf32> to vector<16x64xf32>
    %430 = vector.shape_cast %427 : vector<16x64xf32> to vector<1x16x64xf32>
    tpu.vector_store %arg17[%c15, %c1_184, %c0_185], %430 {strides = array<i32>} : memref<18x18x128xf32, #tpu.memory_space<vmem>>, vector<1x16x64xf32>,
    %c16_i32_186 = arith.constant 16 : i32
    %431 = arith.muli %arg1, %c16_i32_186 : i32
    %c16_i32_187 = arith.constant 16 : i32
    %432 = arith.addi %431, %c16_i32_187 : i32
    %433 = arith.index_cast %432 : i32 to index
    %434 = memref.load %arg4[%433] : memref<18xf32, #tpu.memory_space<smem>>
    %435 = arith.index_cast %432 : i32 to index
    %436 = memref.load %arg2[%435] : memref<18xi32, #tpu.memory_space<smem>>
    %c0_188 = arith.constant 0 : index
    %437 = arith.index_cast %436 : i32 to index
    %c0_189 = arith.constant 0 : index
    %c0_190 = arith.constant 0 : index
    %438 = vector.load %arg12[%c0_188, %437, %c0_189, %c0_190] : memref<1x8x16x64xf32, #tpu.memory_space<vmem>>, vector<1x1x16x64xf32>
    %439 = vector.shape_cast %438 : vector<1x1x16x64xf32> to vector<16x64xf32>
    %440 = vector.broadcast %434 : f32 to vector<16x64xf32>
    %441 = arith.mulf %440, %439 : vector<16x64xf32>
    %442 = arith.index_cast %432 : i32 to index
    %443 = memref.load %arg5[%442] : memref<18xf32, #tpu.memory_space<smem>>
    %444 = arith.index_cast %432 : i32 to index
    %445 = memref.load %arg3[%444] : memref<18xi32, #tpu.memory_space<smem>>
    %c0_191 = arith.constant 0 : index
    %446 = arith.index_cast %445 : i32 to index
    %c0_192 = arith.constant 0 : index
    %c0_193 = arith.constant 0 : index
    %447 = vector.load %arg12[%c0_191, %446, %c0_192, %c0_193] : memref<1x8x16x64xf32, #tpu.memory_space<vmem>>, vector<1x1x16x64xf32>
    %448 = vector.shape_cast %447 : vector<1x1x16x64xf32> to vector<16x64xf32>
    %449 = vector.broadcast %443 : f32 to vector<16x64xf32>
    %450 = arith.mulf %449, %448 : vector<16x64xf32>
    %451 = arith.addf %441, %450 : vector<16x64xf32>
    %c16 = arith.constant 16 : index
    %c1_194 = arith.constant 1 : index
    %c0_195 = arith.constant 0 : index
    %452 = vector.load %arg17[%c16, %c1_194, %c0_195] : memref<18x18x128xf32, #tpu.memory_space<vmem>>, vector<1x16x64xf32>
    %453 = vector.shape_cast %452 : vector<1x16x64xf32> to vector<16x64xf32>
    %454 = vector.shape_cast %451 : vector<16x64xf32> to vector<1x16x64xf32>
    tpu.vector_store %arg17[%c16, %c1_194, %c0_195], %454 {strides = array<i32>} : memref<18x18x128xf32, #tpu.memory_space<vmem>>, vector<1x16x64xf32>,
    %c16_i32_196 = arith.constant 16 : i32
    %455 = arith.muli %arg1, %c16_i32_196 : i32
    %c17_i32 = arith.constant 17 : i32
    %456 = arith.addi %455, %c17_i32 : i32
    %457 = arith.index_cast %456 : i32 to index
    %458 = memref.load %arg4[%457] : memref<18xf32, #tpu.memory_space<smem>>
    %459 = arith.index_cast %456 : i32 to index
    %460 = memref.load %arg2[%459] : memref<18xi32, #tpu.memory_space<smem>>
    %c0_197 = arith.constant 0 : index
    %461 = arith.index_cast %460 : i32 to index
    %c0_198 = arith.constant 0 : index
    %c0_199 = arith.constant 0 : index
    %462 = vector.load %arg12[%c0_197, %461, %c0_198, %c0_199] : memref<1x8x16x64xf32, #tpu.memory_space<vmem>>, vector<1x1x16x64xf32>
    %463 = vector.shape_cast %462 : vector<1x1x16x64xf32> to vector<16x64xf32>
    %464 = vector.broadcast %458 : f32 to vector<16x64xf32>
    %465 = arith.mulf %464, %463 : vector<16x64xf32>
    %466 = arith.index_cast %456 : i32 to index
    %467 = memref.load %arg5[%466] : memref<18xf32, #tpu.memory_space<smem>>
    %468 = arith.index_cast %456 : i32 to index
    %469 = memref.load %arg3[%468] : memref<18xi32, #tpu.memory_space<smem>>
    %c0_200 = arith.constant 0 : index
    %470 = arith.index_cast %469 : i32 to index
    %c0_201 = arith.constant 0 : index
    %c0_202 = arith.constant 0 : index
    %471 = vector.load %arg12[%c0_200, %470, %c0_201, %c0_202] : memref<1x8x16x64xf32, #tpu.memory_space<vmem>>, vector<1x1x16x64xf32>
    %472 = vector.shape_cast %471 : vector<1x1x16x64xf32> to vector<16x64xf32>
    %473 = vector.broadcast %467 : f32 to vector<16x64xf32>
    %474 = arith.mulf %473, %472 : vector<16x64xf32>
    %475 = arith.addf %465, %474 : vector<16x64xf32>
    %c17_203 = arith.constant 17 : index
    %c1_204 = arith.constant 1 : index
    %c0_205 = arith.constant 0 : index
    %476 = vector.load %arg17[%c17_203, %c1_204, %c0_205] : memref<18x18x128xf32, #tpu.memory_space<vmem>>, vector<1x16x64xf32>
    %477 = vector.shape_cast %476 : vector<1x16x64xf32> to vector<16x64xf32>
    %478 = vector.shape_cast %475 : vector<16x64xf32> to vector<1x16x64xf32>
    tpu.vector_store %arg17[%c17_203, %c1_204, %c0_205], %478 {strides = array<i32>} : memref<18x18x128xf32, #tpu.memory_space<vmem>>, vector<1x16x64xf32>,
    %cst_206 = arith.constant 0.000000e+00 : f32
    %479 = vector.broadcast %cst_206 : f32 to vector<256x64xf32>
    %c0_207 = arith.constant 0 : index
    %c0_208 = arith.constant 0 : index
    %c0_209 = arith.constant 0 : index
    %480 = vector.load %arg17[%c0_207, %c0_208, %c0_209] : memref<18x18x128xf32, #tpu.memory_space<vmem>>, vector<16x16x128xf32>
    %481 = vector.shape_cast %480 : vector<16x16x128xf32> to vector<256x128xf32>
    %c0_210 = arith.constant 0 : index
    %c0_211 = arith.constant 0 : index
    %c0_212 = arith.constant 0 : index
    %c0_213 = arith.constant 0 : index
    %482 = vector.load %arg13[%c0_210, %c0_211, %c0_212, %c0_213] : memref<3x3x128x64xf32, #tpu.memory_space<vmem>>, vector<1x1x128x64xf32>
    %483 = vector.shape_cast %482 : vector<1x1x128x64xf32> to vector<128x64xf32>
    %cst_214 = arith.constant dense<0.000000e+00> : vector<256x64xf32>
    %484 = tpu.matmul %481, %483, %cst_214 {dimension_numbers = #tpu.dot_dimension_numbers<[1], [0], [0], [1], [0, 0, 1, 1], [], []>} : vector<256x128xf32>, vector<128x64xf32>, vector<256x64xf32> -> vector<256x64xf32>
    %485 = arith.addf %479, %484 : vector<256x64xf32>
    %c0_215 = arith.constant 0 : index
    %c1_216 = arith.constant 1 : index
    %c0_217 = arith.constant 0 : index
    %486 = vector.load %arg17[%c0_215, %c1_216, %c0_217] : memref<18x18x128xf32, #tpu.memory_space<vmem>>, vector<16x16x128xf32>
    %487 = vector.shape_cast %486 : vector<16x16x128xf32> to vector<256x128xf32>
    %c0_218 = arith.constant 0 : index
    %c1_219 = arith.constant 1 : index
    %c0_220 = arith.constant 0 : index
    %c0_221 = arith.constant 0 : index
    %488 = vector.load %arg13[%c0_218, %c1_219, %c0_220, %c0_221] : memref<3x3x128x64xf32, #tpu.memory_space<vmem>>, vector<1x1x128x64xf32>
    %489 = vector.shape_cast %488 : vector<1x1x128x64xf32> to vector<128x64xf32>
    %cst_222 = arith.constant dense<0.000000e+00> : vector<256x64xf32>
    %490 = tpu.matmul %487, %489, %cst_222 {dimension_numbers = #tpu.dot_dimension_numbers<[1], [0], [0], [1], [0, 0, 1, 1], [], []>} : vector<256x128xf32>, vector<128x64xf32>, vector<256x64xf32> -> vector<256x64xf32>
    %491 = arith.addf %485, %490 : vector<256x64xf32>
    %c0_223 = arith.constant 0 : index
    %c2_224 = arith.constant 2 : index
    %c0_225 = arith.constant 0 : index
    %492 = vector.load %arg17[%c0_223, %c2_224, %c0_225] : memref<18x18x128xf32, #tpu.memory_space<vmem>>, vector<16x16x128xf32>
    %493 = vector.shape_cast %492 : vector<16x16x128xf32> to vector<256x128xf32>
    %c0_226 = arith.constant 0 : index
    %c2_227 = arith.constant 2 : index
    %c0_228 = arith.constant 0 : index
    %c0_229 = arith.constant 0 : index
    %494 = vector.load %arg13[%c0_226, %c2_227, %c0_228, %c0_229] : memref<3x3x128x64xf32, #tpu.memory_space<vmem>>, vector<1x1x128x64xf32>
    %495 = vector.shape_cast %494 : vector<1x1x128x64xf32> to vector<128x64xf32>
    %cst_230 = arith.constant dense<0.000000e+00> : vector<256x64xf32>
    %496 = tpu.matmul %493, %495, %cst_230 {dimension_numbers = #tpu.dot_dimension_numbers<[1], [0], [0], [1], [0, 0, 1, 1], [], []>} : vector<256x128xf32>, vector<128x64xf32>, vector<256x64xf32> -> vector<256x64xf32>
    %497 = arith.addf %491, %496 : vector<256x64xf32>
    %c1_231 = arith.constant 1 : index
    %c0_232 = arith.constant 0 : index
    %c0_233 = arith.constant 0 : index
    %498 = vector.load %arg17[%c1_231, %c0_232, %c0_233] : memref<18x18x128xf32, #tpu.memory_space<vmem>>, vector<16x16x128xf32>
    %499 = vector.shape_cast %498 : vector<16x16x128xf32> to vector<256x128xf32>
    %c1_234 = arith.constant 1 : index
    %c0_235 = arith.constant 0 : index
    %c0_236 = arith.constant 0 : index
    %c0_237 = arith.constant 0 : index
    %500 = vector.load %arg13[%c1_234, %c0_235, %c0_236, %c0_237] : memref<3x3x128x64xf32, #tpu.memory_space<vmem>>, vector<1x1x128x64xf32>
    %501 = vector.shape_cast %500 : vector<1x1x128x64xf32> to vector<128x64xf32>
    %cst_238 = arith.constant dense<0.000000e+00> : vector<256x64xf32>
    %502 = tpu.matmul %499, %501, %cst_238 {dimension_numbers = #tpu.dot_dimension_numbers<[1], [0], [0], [1], [0, 0, 1, 1], [], []>} : vector<256x128xf32>, vector<128x64xf32>, vector<256x64xf32> -> vector<256x64xf32>
    %503 = arith.addf %497, %502 : vector<256x64xf32>
    %c1_239 = arith.constant 1 : index
    %c1_240 = arith.constant 1 : index
    %c0_241 = arith.constant 0 : index
    %504 = vector.load %arg17[%c1_239, %c1_240, %c0_241] : memref<18x18x128xf32, #tpu.memory_space<vmem>>, vector<16x16x128xf32>
    %505 = vector.shape_cast %504 : vector<16x16x128xf32> to vector<256x128xf32>
    %c1_242 = arith.constant 1 : index
    %c1_243 = arith.constant 1 : index
    %c0_244 = arith.constant 0 : index
    %c0_245 = arith.constant 0 : index
    %506 = vector.load %arg13[%c1_242, %c1_243, %c0_244, %c0_245] : memref<3x3x128x64xf32, #tpu.memory_space<vmem>>, vector<1x1x128x64xf32>
    %507 = vector.shape_cast %506 : vector<1x1x128x64xf32> to vector<128x64xf32>
    %cst_246 = arith.constant dense<0.000000e+00> : vector<256x64xf32>
    %508 = tpu.matmul %505, %507, %cst_246 {dimension_numbers = #tpu.dot_dimension_numbers<[1], [0], [0], [1], [0, 0, 1, 1], [], []>} : vector<256x128xf32>, vector<128x64xf32>, vector<256x64xf32> -> vector<256x64xf32>
    %509 = arith.addf %503, %508 : vector<256x64xf32>
    %c1_247 = arith.constant 1 : index
    %c2_248 = arith.constant 2 : index
    %c0_249 = arith.constant 0 : index
    %510 = vector.load %arg17[%c1_247, %c2_248, %c0_249] : memref<18x18x128xf32, #tpu.memory_space<vmem>>, vector<16x16x128xf32>
    %511 = vector.shape_cast %510 : vector<16x16x128xf32> to vector<256x128xf32>
    %c1_250 = arith.constant 1 : index
    %c2_251 = arith.constant 2 : index
    %c0_252 = arith.constant 0 : index
    %c0_253 = arith.constant 0 : index
    %512 = vector.load %arg13[%c1_250, %c2_251, %c0_252, %c0_253] : memref<3x3x128x64xf32, #tpu.memory_space<vmem>>, vector<1x1x128x64xf32>
    %513 = vector.shape_cast %512 : vector<1x1x128x64xf32> to vector<128x64xf32>
    %cst_254 = arith.constant dense<0.000000e+00> : vector<256x64xf32>
    %514 = tpu.matmul %511, %513, %cst_254 {dimension_numbers = #tpu.dot_dimension_numbers<[1], [0], [0], [1], [0, 0, 1, 1], [], []>} : vector<256x128xf32>, vector<128x64xf32>, vector<256x64xf32> -> vector<256x64xf32>
    %515 = arith.addf %509, %514 : vector<256x64xf32>
    %c2_255 = arith.constant 2 : index
    %c0_256 = arith.constant 0 : index
    %c0_257 = arith.constant 0 : index
    %516 = vector.load %arg17[%c2_255, %c0_256, %c0_257] : memref<18x18x128xf32, #tpu.memory_space<vmem>>, vector<16x16x128xf32>
    %517 = vector.shape_cast %516 : vector<16x16x128xf32> to vector<256x128xf32>
    %c2_258 = arith.constant 2 : index
    %c0_259 = arith.constant 0 : index
    %c0_260 = arith.constant 0 : index
    %c0_261 = arith.constant 0 : index
    %518 = vector.load %arg13[%c2_258, %c0_259, %c0_260, %c0_261] : memref<3x3x128x64xf32, #tpu.memory_space<vmem>>, vector<1x1x128x64xf32>
    %519 = vector.shape_cast %518 : vector<1x1x128x64xf32> to vector<128x64xf32>
    %cst_262 = arith.constant dense<0.000000e+00> : vector<256x64xf32>
    %520 = tpu.matmul %517, %519, %cst_262 {dimension_numbers = #tpu.dot_dimension_numbers<[1], [0], [0], [1], [0, 0, 1, 1], [], []>} : vector<256x128xf32>, vector<128x64xf32>, vector<256x64xf32> -> vector<256x64xf32>
    %521 = arith.addf %515, %520 : vector<256x64xf32>
    %c2_263 = arith.constant 2 : index
    %c1_264 = arith.constant 1 : index
    %c0_265 = arith.constant 0 : index
    %522 = vector.load %arg17[%c2_263, %c1_264, %c0_265] : memref<18x18x128xf32, #tpu.memory_space<vmem>>, vector<16x16x128xf32>
    %523 = vector.shape_cast %522 : vector<16x16x128xf32> to vector<256x128xf32>
    %c2_266 = arith.constant 2 : index
    %c1_267 = arith.constant 1 : index
    %c0_268 = arith.constant 0 : index
    %c0_269 = arith.constant 0 : index
    %524 = vector.load %arg13[%c2_266, %c1_267, %c0_268, %c0_269] : memref<3x3x128x64xf32, #tpu.memory_space<vmem>>, vector<1x1x128x64xf32>
    %525 = vector.shape_cast %524 : vector<1x1x128x64xf32> to vector<128x64xf32>
    %cst_270 = arith.constant dense<0.000000e+00> : vector<256x64xf32>
    %526 = tpu.matmul %523, %525, %cst_270 {dimension_numbers = #tpu.dot_dimension_numbers<[1], [0], [0], [1], [0, 0, 1, 1], [], []>} : vector<256x128xf32>, vector<128x64xf32>, vector<256x64xf32> -> vector<256x64xf32>
    %527 = arith.addf %521, %526 : vector<256x64xf32>
    %c2_271 = arith.constant 2 : index
    %c2_272 = arith.constant 2 : index
    %c0_273 = arith.constant 0 : index
    %528 = vector.load %arg17[%c2_271, %c2_272, %c0_273] : memref<18x18x128xf32, #tpu.memory_space<vmem>>, vector<16x16x128xf32>
    %529 = vector.shape_cast %528 : vector<16x16x128xf32> to vector<256x128xf32>
    %c2_274 = arith.constant 2 : index
    %c2_275 = arith.constant 2 : index
    %c0_276 = arith.constant 0 : index
    %c0_277 = arith.constant 0 : index
    %530 = vector.load %arg13[%c2_274, %c2_275, %c0_276, %c0_277] : memref<3x3x128x64xf32, #tpu.memory_space<vmem>>, vector<1x1x128x64xf32>
    %531 = vector.shape_cast %530 : vector<1x1x128x64xf32> to vector<128x64xf32>
    %cst_278 = arith.constant dense<0.000000e+00> : vector<256x64xf32>
    %532 = tpu.matmul %529, %531, %cst_278 {dimension_numbers = #tpu.dot_dimension_numbers<[1], [0], [0], [1], [0, 0, 1, 1], [], []>} : vector<256x128xf32>, vector<128x64xf32>, vector<256x64xf32> -> vector<256x64xf32>
    %533 = arith.addf %527, %532 : vector<256x64xf32>
    %c0_279 = arith.constant 0 : index
    %c0_280 = arith.constant 0 : index
    %534 = vector.load %arg14[%c0_279, %c0_280] : memref<1x64xf32, #tpu.memory_space<vmem>>, vector<1x64xf32>
    %535 = vector.broadcast %534 : vector<1x64xf32> to vector<256x64xf32>
    %536 = arith.addf %533, %535 : vector<256x64xf32>
    %537 = arith.mulf %536, %536 : vector<256x64xf32>
    %538 = tpu.concatenate %536, %537 in 1 : vector<256x64xf32>, vector<256x64xf32> -> vector<256x128xf32>
    %cst_281 = arith.constant 1.000000e+00 : f32
    %539 = vector.broadcast %cst_281 : f32 to vector<1x256xf32>
    %cst_282 = arith.constant dense<0.000000e+00> : vector<1x128xf32>
    %540 = tpu.matmul %539, %538, %cst_282 {dimension_numbers = #tpu.dot_dimension_numbers<[1], [0], [0], [1], [0, 0, 1, 1], [], []>} : vector<1x256xf32>, vector<256x128xf32>, vector<1x128xf32> -> vector<1x128xf32>
    %c0_283 = arith.constant 0 : index
    %c0_284 = arith.constant 0 : index
    %c0_285 = arith.constant 0 : index
    %c0_286 = arith.constant 0 : index
    %541 = vector.load %arg16[%c0_283, %c0_284, %c0_285, %c0_286] : memref<1x1x1x128xf32, #tpu.memory_space<vmem>>, vector<1x1x1x128xf32>
    %542 = vector.shape_cast %541 : vector<1x1x1x128xf32> to vector<1x128xf32>
    %543 = vector.shape_cast %540 : vector<1x128xf32> to vector<1x1x1x128xf32>
    tpu.vector_store %arg16[%c0_283, %c0_284, %c0_285, %c0_286], %543 {strides = array<i32>} : memref<1x1x1x128xf32, #tpu.memory_space<vmem>>, vector<1x1x1x128xf32>,
    %544 = tpu.transpose %538, [1, 0] : vector<256x128xf32> -> vector<128x256xf32>
    %545 = vector.extract_strided_slice %544 {offsets = [0, 0], sizes = [64, 256], strides = [1, 1]} : vector<128x256xf32> to vector<64x256xf32>
    %c0_287 = arith.constant 0 : index
    %c0_288 = arith.constant 0 : index
    %c0_289 = arith.constant 0 : index
    %546 = vector.load %arg15[%c0_287, %c0_288, %c0_289] : memref<1x64x256xf32, #tpu.memory_space<vmem>>, vector<1x64x256xf32>
    %547 = vector.shape_cast %546 : vector<1x64x256xf32> to vector<64x256xf32>
    %548 = vector.shape_cast %545 : vector<64x256xf32> to vector<1x64x256xf32>
    tpu.vector_store %arg15[%c0_287, %c0_288, %c0_289], %548 {strides = array<i32>} : memref<1x64x256xf32, #tpu.memory_space<vmem>>, vector<1x64x256xf32>,
    return
  }
  func.func @transform_0(%arg0: i32, %arg1: i32, %arg2: memref<18xi32, #tpu.memory_space<smem>>, %arg3: memref<18xi32, #tpu.memory_space<smem>>, %arg4: memref<18xf32, #tpu.memory_space<smem>>, %arg5: memref<18xf32, #tpu.memory_space<smem>>) -> (i32, i32, i32, i32) {
    %c0_i32 = arith.constant 0 : i32
    %c0_i32_0 = arith.constant 0 : i32
    %c0_i32_1 = arith.constant 0 : i32
    return %arg0, %arg1, %c0_i32, %c0_i32_0 : i32, i32, i32, i32
  }
  func.func @transform_1(%arg0: i32, %arg1: i32, %arg2: memref<18xi32, #tpu.memory_space<smem>>, %arg3: memref<18xi32, #tpu.memory_space<smem>>, %arg4: memref<18xf32, #tpu.memory_space<smem>>, %arg5: memref<18xf32, #tpu.memory_space<smem>>) -> (i32, i32, i32, i32) {
    %c0_i32 = arith.constant 0 : i32
    %c0_i32_0 = arith.constant 0 : i32
    %c0_i32_1 = arith.constant 0 : i32
    return %arg0, %arg1, %c0_i32, %c0_i32_0 : i32, i32, i32, i32
  }
  func.func @transform_2(%arg0: i32, %arg1: i32, %arg2: memref<18xi32, #tpu.memory_space<smem>>, %arg3: memref<18xi32, #tpu.memory_space<smem>>, %arg4: memref<18xf32, #tpu.memory_space<smem>>, %arg5: memref<18xf32, #tpu.memory_space<smem>>) -> (i32, i32, i32, i32) {
    %c0_i32 = arith.constant 0 : i32
    %c0_i32_0 = arith.constant 0 : i32
    %c0_i32_1 = arith.constant 0 : i32
    return %arg0, %arg1, %c0_i32, %c0_i32_0 : i32, i32, i32, i32
  }
  func.func @transform_3(%arg0: i32, %arg1: i32, %arg2: memref<18xi32, #tpu.memory_space<smem>>, %arg3: memref<18xi32, #tpu.memory_space<smem>>, %arg4: memref<18xf32, #tpu.memory_space<smem>>, %arg5: memref<18xf32, #tpu.memory_space<smem>>) -> (i32, i32, i32, i32) {
    %c0_i32 = arith.constant 0 : i32
    %c0_i32_0 = arith.constant 0 : i32
    %c0_i32_1 = arith.constant 0 : i32
    return %arg0, %arg1, %c0_i32, %c0_i32_0 : i32, i32, i32, i32
  }
  func.func @transform_4(%arg0: i32, %arg1: i32, %arg2: memref<18xi32, #tpu.memory_space<smem>>, %arg3: memref<18xi32, #tpu.memory_space<smem>>, %arg4: memref<18xf32, #tpu.memory_space<smem>>, %arg5: memref<18xf32, #tpu.memory_space<smem>>) -> (i32, i32, i32, i32) {
    %c0_i32 = arith.constant 0 : i32
    %c0_i32_0 = arith.constant 0 : i32
    %c0_i32_1 = arith.constant 0 : i32
    return %arg0, %arg1, %c0_i32, %c0_i32_0 : i32, i32, i32, i32
  }
  func.func @transform_5(%arg0: i32, %arg1: i32, %arg2: memref<18xi32, #tpu.memory_space<smem>>, %arg3: memref<18xi32, #tpu.memory_space<smem>>, %arg4: memref<18xf32, #tpu.memory_space<smem>>, %arg5: memref<18xf32, #tpu.memory_space<smem>>) -> (i32, i32, i32, i32) {
    %c0_i32 = arith.constant 0 : i32
    %c0_i32_0 = arith.constant 0 : i32
    %c0_i32_1 = arith.constant 0 : i32
    return %arg0, %arg1, %c0_i32, %c0_i32_0 : i32, i32, i32, i32
  }
  func.func @transform_6(%arg0: i32, %arg1: i32, %arg2: memref<18xi32, #tpu.memory_space<smem>>, %arg3: memref<18xi32, #tpu.memory_space<smem>>, %arg4: memref<18xf32, #tpu.memory_space<smem>>, %arg5: memref<18xf32, #tpu.memory_space<smem>>) -> (i32, i32, i32, i32) {
    %c0_i32 = arith.constant 0 : i32
    %c0_i32_0 = arith.constant 0 : i32
    %c0_i32_1 = arith.constant 0 : i32
    %c0_i32_2 = arith.constant 0 : i32
    return %arg0, %c0_i32, %c0_i32_0, %c0_i32_1 : i32, i32, i32, i32
  }
  func.func @transform_7(%arg0: i32, %arg1: i32, %arg2: memref<18xi32, #tpu.memory_space<smem>>, %arg3: memref<18xi32, #tpu.memory_space<smem>>, %arg4: memref<18xf32, #tpu.memory_space<smem>>, %arg5: memref<18xf32, #tpu.memory_space<smem>>) -> (i32, i32, i32, i32) {
    %c0_i32 = arith.constant 0 : i32
    %c0_i32_0 = arith.constant 0 : i32
    %c0_i32_1 = arith.constant 0 : i32
    %c0_i32_2 = arith.constant 0 : i32
    %c0_i32_3 = arith.constant 0 : i32
    return %c0_i32, %c0_i32_0, %c0_i32_1, %c0_i32_2 : i32, i32, i32, i32
  }
  func.func @transform_8(%arg0: i32, %arg1: i32, %arg2: memref<18xi32, #tpu.memory_space<smem>>, %arg3: memref<18xi32, #tpu.memory_space<smem>>, %arg4: memref<18xf32, #tpu.memory_space<smem>>, %arg5: memref<18xf32, #tpu.memory_space<smem>>) -> (i32, i32) {
    %c0_i32 = arith.constant 0 : i32
    %c0_i32_0 = arith.constant 0 : i32
    %c0_i32_1 = arith.constant 0 : i32
    return %c0_i32, %c0_i32_0 : i32, i32
  }
  func.func @transform_9(%arg0: i32, %arg1: i32, %arg2: memref<18xi32, #tpu.memory_space<smem>>, %arg3: memref<18xi32, #tpu.memory_space<smem>>, %arg4: memref<18xf32, #tpu.memory_space<smem>>, %arg5: memref<18xf32, #tpu.memory_space<smem>>) -> (i32, i32, i32) {
    %c0_i32 = arith.constant 0 : i32
    %c0_i32_0 = arith.constant 0 : i32
    return %arg0, %c0_i32, %arg1 : i32, i32, i32
  }
  func.func @transform_10(%arg0: i32, %arg1: i32, %arg2: memref<18xi32, #tpu.memory_space<smem>>, %arg3: memref<18xi32, #tpu.memory_space<smem>>, %arg4: memref<18xf32, #tpu.memory_space<smem>>, %arg5: memref<18xf32, #tpu.memory_space<smem>>) -> (i32, i32, i32, i32) {
    %c0_i32 = arith.constant 0 : i32
    %c0_i32_0 = arith.constant 0 : i32
    %c0_i32_1 = arith.constant 0 : i32
    return %arg0, %arg1, %c0_i32, %c0_i32_0 : i32, i32, i32, i32
  }
}

</mosaic_0001>

<bundles_post_ra>
// kernel: rcg_forward.3
= control target key start
LH: loop header
LB: loop body
LE: loop exit
PB: predicated region body
PF: predicated region fallthrough
CT: control target
= control target key end

     0   :  { %s899_s23 = smov 0   ;;  %s901_s24 = smov 0   ;;  %s1147_s0 = inlined_call_operand.vmem [shape: f32[2,64,256], index: 0, kind: input, shape index: {}]   ;;  %s1148_s1 = inlined_call_operand.vmem [shape: f32[2,64,256], index: 1, kind: input, shape index: {}]   ;;  %s1149_s2 = inlined_call_operand.vmem [shape: f32[64,1], index: 2, kind: input, shape index: {}]   ;;  %s1150_s3 = inlined_call_operand.vmem [shape: f32[64,1], index: 3, kind: input, shape index: {}]   ;;  %s1151_s4 = inlined_call_operand.vmem [shape: f32[1,64], index: 4, kind: input, shape index: {}]   ;;  %s1152_s5 = inlined_call_operand.<no memory space> [shape: f32[1,1], index: 5, kind: input, shape index: {}]   ;;  %s1153_s6 = inlined_call_operand.vmem [shape: f32[2,64,256], index: 6, kind: output, shape index: {}]  }
   0x1   :  { %v11_v0 = vstv %s1152_s5  ;;  %s903_s25 = smov 0  }
   0x2   :  { %12 = vst [vmem:[#allocation2] sm:$0x1] %v11_v0 }
   0x3 LB: > { %s30_s5 = sadd.s32 1, %s853_s24  ;;  %p768_p0 = scmp.ge.s32.totalorder %s857_s25, 1  ;;  %s857_s25 = sphi %s903_s25, %s18_s25   ;;  %s853_s24 = sphi %s901_s24, %s1155_s24   ;;  %s849_s23 = sphi %s899_s23, %s1154_s23  }
   0x4   : > { %p32_p1 = scmp.ge.s32.totalorder %s30_s5, 2  ;;  %p252_p2 = scmp.lt.s32.totalorder %s857_s25, 3 }
   0x6   : > { %s1157_s5 = smov (%p32_p1, %s30_s5), 0  ;;  %p253_p3 = pnand %p768_p0, %p252_p2 }
   0x7   : > { %v409_v1 = vld [vmem:[%s1150_s3] sm:$0xff] (!%p253_p3)  ;;  %v859_v3 = vmov (!%p253_p3), 0   ;;  %v410_v4 = vld [vmem:[%s1150_s3 + $0x8] sm:$0xff] (!%p253_p3)  ;;  %v348_v6 = vld [vmem:[%s1149_s2 + $0x18] sm:$0xff] (!%p253_p3)  ;;  %v860_v19 = vmov (!%p253_p3), 0.0   ;;  %p300_p4 = scmp.lt.s32.totalorder (!%p253_p3), %s849_s23, 1 }
   0x8   : > { %256 = sbr.rel (%p253_p3) target bundleno = 430 (0x1ae), region = 44  ;;  %v345_v2 = vld [vmem:[%s1149_s2] sm:$0xff] (!%p253_p3)  ;;  %826 = vset.pattern.permute.xlu1 (!%p253_p3), %v859_v3  ;;  %825 = vset.pattern.permute.xlu0 (!%p253_p3), %v859_v3  ;;  %v346_v5 = vld [vmem:[%s1149_s2 + $0x8] sm:$0xff] (!%p253_p3)  ;;  %v347_v7 = vld [vmem:[%s1149_s2 + $0x10] sm:$0xff] (!%p253_p3)  ;;  %vm500_vm0 = vcmask (!%p253_p3), 523264  }
   0x9   : > { %419 = vperm.xlu1 (!%p253_p3), %826, %v409_v1   ;;  %355 = vperm.xlu0 (!%p253_p3), %825, %v345_v2   ;;  %v412_v8 = vld [vmem:[%s1150_s3 + $0x18] sm:$0xff] (!%p253_p3)  ;;  %v411_v9 = vld [vmem:[%s1150_s3 + $0x10] sm:$0xff] (!%p253_p3)  ;;  %v350_v10 = vld [vmem:[%s1149_s2 + $0x28] sm:$0xff] (!%p253_p3) }
   0xa   : > { %v349_v11 = vld [vmem:[%s1149_s2 + $0x20] sm:$0xff] (!%p253_p3)  ;;  %v414_v12 = vld [vmem:[%s1150_s3 + $0x28] sm:$0xff] (!%p253_p3)  ;;  %v352_v14 = vld [vmem:[%s1149_s2 + $0x38] sm:$0xff] (!%p253_p3)  ;;  %568 = vmatprep.mubr.f32.mxu0 (!%p253_p3), %v860_v19 }
   0xb   : > { %v413_v13 = vld [vmem:[%s1150_s3 + $0x20] sm:$0xff] (!%p253_p3)  ;;  %v351_v15 = vld [vmem:[%s1149_s2 + $0x30] sm:$0xff] (!%p253_p3)  ;;  %v416_v16 = vld [vmem:[%s1150_s3 + $0x38] sm:$0xff] (!%p253_p3) }
   0xc   : > { %v415_v17 = vld [vmem:[%s1150_s3 + $0x30] sm:$0xff] (!%p253_p3)  ;;  %v490_v18 = vld [vmem:[#allocation2] sm:$0x1] (!%p253_p3) }
   0xd   : > { %424 = vperm.xlu1 (!%p253_p3), %826, %v410_v4   ;;  %360 = vperm.xlu0 (!%p253_p3), %825, %v346_v5  }
   0xf   : > { %s1159_s23 = smov (!%p300_p4, %s849_s23), 1 }
  0x10   : > { %s969_s13 = sshll.u32 %s1159_s23, 7 }
  0x11   : > { %370 = vperm.xlu1 %826, %v348_v6   ;;  %365 = vperm.xlu0 %825, %v347_v7   ;;  %s975_s16 = scalar_lea.vmem %s1147_s0, %s969_s13  ;;  %s1070_s20 = scalar_lea.vmem %s1148_s1, %s969_s13 }
  0x12   : > { %v329_v20 = vld [vmem:[%s975_s16] sm:$0xff]  ;;  %v330_v21 = vld [vmem:[%s975_s16 + $0x8] sm:$0xff]  ;;  %v331_v26 = vld [vmem:[%s975_s16 + $0x10] sm:$0xff]  ;;  %s1092_s26 = scalar_lea.vmem %s1153_s6, %s969_s13 }
  0x13   : > { %v332_v27 = vld [vmem:[%s975_s16 + $0x18] sm:$0xff]  ;;  %v335_v35 = vld [vmem:[%s975_s16 + $0x30] sm:$0xff]  ;;  %v333_v40 = vld [vmem:[%s975_s16 + $0x20] sm:$0xff] }
  0x14   : > { %v336_v38 = vld [vmem:[%s975_s16 + $0x38] sm:$0xff]  ;;  %v334_v41 = vld [vmem:[%s975_s16 + $0x28] sm:$0xff]  ;;  %v339_v62 = vld [vmem:[%s975_s16 + $0x50] sm:$0xff] }
  0x15   : > { %434 = vperm.xlu1 %826, %v412_v8   ;;  %429 = vperm.xlu0 %825, %v411_v9   ;;  %v340_v0 = vld [vmem:[%s975_s16 + $0x58] sm:$0xff]  ;;  %v337_v2 = vld [vmem:[%s975_s16 + $0x40] sm:$0xff]  ;;  %v338_v3 = vld [vmem:[%s975_s16 + $0x48] sm:$0xff] }
  0x19   : > { %380 = vperm.xlu1 %826, %v350_v10   ;;  %375 = vperm.xlu0 %825, %v349_v11  }
  0x1d   : > { %444 = vperm.xlu1 %826, %v414_v12   ;;  %439 = vperm.xlu0 %825, %v413_v13  }
  0x21   : > { %390 = vperm.xlu1 %826, %v352_v14   ;;  %385 = vperm.xlu0 %825, %v351_v15  }
  0x25   : > { %454 = vperm.xlu1 %826, %v416_v16   ;;  %449 = vperm.xlu0 %825, %v415_v17  }
  0x29   : > { %493 = vperm.xlu0 %825, %v490_v18  }
  0x88   : > { %v420_v22 = vpop.permute.xlu1 %419  ;;  %v356_v23 = vpop.permute.xlu0 %355 }
  0x89   : > { %v393_v24 = vmul.f32 %v356_v23, %v329_v20  ;;  %v394_v25 = vmul.f32 %v356_v23, %v330_v21  ;;  %v343_v20 = vld [vmem:[%s975_s16 + $0x70] sm:$0xff] }
  0x8b   : > { %v981_v32 = vadd.f32 %v420_v22, %v393_v24  ;;  %v983_v33 = vadd.f32 %v420_v22, %v394_v25  ;;  %v344_v22 = vld [vmem:[%s975_s16 + $0x78] sm:$0xff]  ;;  %v341_v24 = vld [vmem:[%s975_s16 + $0x60] sm:$0xff]  ;;  %v342_v25 = vld [vmem:[%s975_s16 + $0x68] sm:$0xff] }
  0x8c   : > { %v425_v28 = vpop.permute.xlu1 %424  ;;  %v361_v29 = vpop.permute.xlu0 %360 }
  0x8d   : > { %v395_v30 = vmul.f32 %v361_v29, %v331_v26  ;;  %v396_v31 = vmul.f32 %v361_v29, %v332_v27  ;;  %v474_v42 = vmax.f32 %v983_v33, 0.0  ;;  %v473_v44 = vmax.f32 %v981_v32, 0.0 }
  0x8f   : > { %v985_v34 = vadd.f32 %v425_v28, %v395_v30  ;;  %v988_v36 = vadd.f32 %v425_v28, %v396_v31 }
  0x90   : > { %v371_v37 = vpop.permute.xlu1 %370  ;;  %v366_v39 = vpop.permute.xlu0 %365 }
  0x91   : > { %v476_v43 = vmax.f32 %v988_v36, 0.0  ;;  %v475_v45 = vmax.f32 %v985_v34, 0.0  ;;  %v399_v46 = vmul.f32 %v371_v37, %v335_v35  ;;  %v400_v47 = vmul.f32 %v371_v37, %v336_v38 }
  0x92   : > { %v397_v48 = vmul.f32 %v366_v39, %v333_v40  ;;  %v398_v49 = vmul.f32 %v366_v39, %v334_v41 }
  0x93   : > { %v783_v52 = vpack.c.bf16 %v476_v43, %v474_v42  ;;  %v785_v53 = vpack.c.bf16 %v475_v45, %v473_v44 }
  0x94   : > { %v435_v50 = vpop.permute.xlu1 %434  ;;  %v430_v51 = vpop.permute.xlu0 %429 }
  0x95   : > { %v1005_v54 = vadd.f32 %v435_v50, %v399_v46  ;;  %v1007_v55 = vadd.f32 %v435_v50, %v400_v47  ;;  %v1009_v56 = vadd.f32 %v430_v51, %v397_v48  ;;  %v1011_v57 = vadd.f32 %v430_v51, %v398_v49  ;;  %784 = vmatprep.subr.bf16.mxu0 %v783_v52  ;;  %v489_v52 = vld [vmem:[%s1151_s4] sm:$0x1] }
  0x96   : > { %786 = vmatpush1.bf16.msra.mxu0 %v785_v53  ;;  %v496_v53 = vlaneseq }
  0x97   : > { %v479_v58 = vmax.f32 %v1005_v54, 0.0  ;;  %v480_v59 = vmax.f32 %v1007_v55, 0.0  ;;  %v477_v60 = vmax.f32 %v1009_v56, 0.0  ;;  %v478_v61 = vmax.f32 %v1011_v57, 0.0 }
  0x98   : > { %v381_v63 = vpop.permute.xlu1 %380  ;;  %v376_v1 = vpop.permute.xlu0 %375 }
  0x99   : > { %v787_v4 = vpack.c.bf16 %v480_v59, %v478_v61  ;;  %v789_v5 = vpack.c.bf16 %v479_v58, %v477_v60  ;;  %v403_v6 = vmul.f32 %v381_v63, %v339_v62  ;;  %v404_v7 = vmul.f32 %v381_v63, %v340_v0 }
  0x9a   : > { %v401_v8 = vmul.f32 %v376_v1, %v337_v2  ;;  %v402_v9 = vmul.f32 %v376_v1, %v338_v3  ;;  %v497_v62 = vshrl.u32 %v496_v53, 7 }
  0x9b   : > { %788 = vmatprep.subr.bf16.mxu0 %v787_v4 }
  0x9c   : > { %v445_v10 = vpop.permute.xlu1 %444  ;;  %v440_v11 = vpop.permute.xlu0 %439  ;;  %790 = vmatpush1.bf16.msra.mxu0 %v789_v5  ;;  %v498_v63 = vsub.s32 0, %v497_v62 }
  0x9d   : > { %v1029_v12 = vadd.f32 %v445_v10, %v403_v6  ;;  %v1031_v13 = vadd.f32 %v445_v10, %v404_v7  ;;  %v1033_v14 = vadd.f32 %v440_v11, %v401_v8  ;;  %v1035_v15 = vadd.f32 %v440_v11, %v402_v9 }
  0x9f   : > { %v483_v16 = vmax.f32 %v1029_v12, 0.0  ;;  %v484_v17 = vmax.f32 %v1031_v13, 0.0  ;;  %v481_v18 = vmax.f32 %v1033_v14, 0.0  ;;  %v482_v19 = vmax.f32 %v1035_v15, 0.0 }
  0xa0   : > { %v391_v21 = vpop.permute.xlu1 %390  ;;  %v386_v23 = vpop.permute.xlu0 %385 }
  0xa1   : > { %v791_v26 = vpack.c.bf16 %v484_v17, %v482_v19  ;;  %v793_v27 = vpack.c.bf16 %v483_v16, %v481_v18  ;;  %v407_v28 = vmul.f32 %v391_v21, %v343_v20  ;;  %v408_v29 = vmul.f32 %v391_v21, %v344_v22 }
  0xa2   : > { %v405_v30 = vmul.f32 %v386_v23, %v341_v24  ;;  %v406_v31 = vmul.f32 %v386_v23, %v342_v25  ;;  %v611_v23 = vld [vmem:[%s1070_s20] sm:$0xff]  ;;  %v613_v24 = vld [vmem:[%s1070_s20 + $0x10] sm:$0xff] }
  0xa3   : > { %792 = vmatprep.subr.bf16.mxu0 %v791_v26  ;;  %v615_v25 = vld [vmem:[%s1070_s20 + $0x20] sm:$0xff]  ;;  %v617_v26 = vld [vmem:[%s1070_s20 + $0x30] sm:$0xff] }
  0xa4   : > { %v455_v35 = vpop.permute.xlu1 %454  ;;  %v450_v37 = vpop.permute.xlu0 %449  ;;  %794 = vmatpush1.bf16.msra.mxu0 %v793_v27  ;;  %v619_v27 = vld [vmem:[%s1070_s20 + $0x40] sm:$0xff] }
  0xa5   : > { %v471_v38 = vadd.f32 %v455_v35, %v407_v28  ;;  %v1053_v39 = vadd.f32 %v455_v35, %v408_v29  ;;  %v469_v40 = vadd.f32 %v450_v37, %v405_v30  ;;  %v1055_v41 = vadd.f32 %v450_v37, %v406_v31  ;;  %v621_v37 = vld [vmem:[%s1070_s20 + $0x50] sm:$0xff] }
  0xa7   : > { %v487_v46 = vmax.f32 %v471_v38, 0.0  ;;  %v488_v47 = vmax.f32 %v1053_v39, 0.0  ;;  %v485_v48 = vmax.f32 %v469_v40, 0.0  ;;  %v486_v49 = vmax.f32 %v1055_v41, 0.0  ;;  %v623_v38 = vld [vmem:[%s1070_s20 + $0x60] sm:$0xff]  ;;  %v625_v40 = vld [vmem:[%s1070_s20 + $0x70] sm:$0xff] }
  0xa8   : > { %v494_v0 = vpop.permute.xlu0 %493 }
  0xa9   : > { %v795_v50 = vpack.c.bf16 %v488_v47, %v486_v49  ;;  %v797_v51 = vpack.c.bf16 %v487_v46, %v485_v48  ;;  %v499_v1 = vrot.slane %v494_v0, %v498_v63 }
  0xab   : > { %796 = vmatprep.subr.bf16.mxu0 %v795_v50  ;;  %v612_v50 = vld [vmem:[%s1070_s20 + $0x8] sm:$0xff] }
  0xac   : > { %798 = vmatpush1.bf16.msra.mxu0 %v797_v51  ;;  %v614_v51 = vld [vmem:[%s1070_s20 + $0x18] sm:$0xff] }
  0xaf   : > { %775 = vmatmul.mubr.msk.f32.vlgmr.msra.gmra.mrb[0].mxu0 %vm500_vm0, %v489_v52  ;;  %v620_v52 = vld [vmem:[%s1070_s20 + $0x48] sm:$0xff] }
 0x182   : > { %v570_v2 = vpop.f32.mrb[0].mxu0 }
 0x183   : > { %v571_v3 = vadd.f32 %v570_v2, %v499_v1  ;;  %v572_v4 = vpop.f32.mrb[1].mxu0  ;;  %v624_v2 = vld [vmem:[%s1070_s20 + $0x68] sm:$0xff] }
 0x184   : > { %v573_v5 = vadd.f32 %v572_v4, %v499_v1  ;;  %v622_v1 = vld [vmem:[%s1070_s20 + $0x58] sm:$0xff] }
 0x185   : > { %v776_v6 = vmul.f32 -1.442695, %v571_v3  ;;  %v626_v3 = vld [vmem:[%s1070_s20 + $0x78] sm:$0xff] }
 0x186   : > { %v777_v7 = vmul.f32 -1.442695, %v573_v5 }
 0x187   : > { %827 = vpow2.f32 %v776_v6 }
 0x188   : > { %829 = vpow2.f32 %v777_v7 }
 0x191   : > { %v828_v8 = vpop.eup %827 }
 0x192   : > { %v830_v9 = vpop.eup %829  ;;  %v581_v10 = vadd.f32 1.0, %v828_v8 }
 0x193   : > { %v582_v11 = vadd.f32 1.0, %v830_v9 }
 0x194   : > { %831 = vrcp.f32 %v581_v10 }
 0x195   : > { %833 = vrcp.f32 %v582_v11 }
 0x19e   : > { %v832_v20 = vpop.eup %831 }
 0x19f   : > { %v834_v21 = vpop.eup %833  ;;  %v590_v22 = vrot.slane %v832_v20, %v498_v63 }
 0x1a0   : > { %v594_v28 = vrot.slane %v834_v21, %v498_v63 }
 0x1a1   : > { %v595_v29 = vmul.f32 %v590_v22, %v473_v44  ;;  %v597_v30 = vmul.f32 %v590_v22, %v475_v45  ;;  %v599_v31 = vmul.f32 %v590_v22, %v477_v60  ;;  %v601_v35 = vmul.f32 %v590_v22, %v479_v58 }
 0x1a2   : > { %v603_v32 = vmul.f32 %v590_v22, %v481_v18  ;;  %v605_v34 = vmul.f32 %v590_v22, %v483_v16  ;;  %v607_v44 = vmul.f32 %v590_v22, %v485_v48  ;;  %v609_v45 = vmul.f32 %v590_v22, %v487_v46  ;;  %v616_v48 = vld [vmem:[%s1070_s20 + $0x28] sm:$0xff]  ;;  %v618_v46 = vld [vmem:[%s1070_s20 + $0x38] sm:$0xff] }
 0x1a3   : > { %v627_v54 = vadd.f32 %v611_v23, %v595_v29  ;;  %v629_v56 = vadd.f32 %v613_v24, %v597_v30  ;;  %v631_v58 = vadd.f32 %v615_v25, %v599_v31  ;;  %v633_v60 = vadd.f32 %v617_v26, %v601_v35 }
 0x1a4   : > { %v635_v14 = vadd.f32 %v619_v27, %v603_v32  ;;  %v637_v18 = vadd.f32 %v621_v37, %v605_v34  ;;  %v639_v12 = vadd.f32 %v623_v38, %v607_v44  ;;  %v641_v16 = vadd.f32 %v625_v40, %v609_v45 }
 0x1a5   : > { %643 = vst [vmem:[%s1092_s26] sm:$0xff] %v627_v54  ;;  %645 = vst [vmem:[%s1092_s26 + $0x10] sm:$0xff] %v629_v56  ;;  %v596_v53 = vmul.f32 %v594_v28, %v474_v42  ;;  %v598_v62 = vmul.f32 %v594_v28, %v476_v43  ;;  %v600_v63 = vmul.f32 %v594_v28, %v478_v61 }
 0x1a6   : > { %647 = vst [vmem:[%s1092_s26 + $0x20] sm:$0xff] %v631_v58  ;;  %649 = vst [vmem:[%s1092_s26 + $0x30] sm:$0xff] %v633_v60  ;;  %v602_v0 = vmul.f32 %v594_v28, %v480_v59  ;;  %v604_v33 = vmul.f32 %v594_v28, %v482_v19  ;;  %v606_v36 = vmul.f32 %v594_v28, %v484_v17 }
 0x1a7   : > { %651 = vst [vmem:[%s1092_s26 + $0x40] sm:$0xff] %v635_v14  ;;  %653 = vst [vmem:[%s1092_s26 + $0x50] sm:$0xff] %v637_v18  ;;  %v608_v42 = vmul.f32 %v594_v28, %v486_v49  ;;  %v610_v43 = vmul.f32 %v594_v28, %v488_v47  ;;  %v628_v55 = vadd.f32 %v612_v50, %v596_v53 }
 0x1a8   : > { %655 = vst [vmem:[%s1092_s26 + $0x60] sm:$0xff] %v639_v12  ;;  %657 = vst [vmem:[%s1092_s26 + $0x70] sm:$0xff] %v641_v16  ;;  %v630_v57 = vadd.f32 %v614_v51, %v598_v62  ;;  %v632_v59 = vadd.f32 %v616_v48, %v600_v63  ;;  %v634_v61 = vadd.f32 %v618_v46, %v602_v0 }
 0x1a9   : > { %v636_v15 = vadd.f32 %v620_v52, %v604_v33  ;;  %v638_v4 = vadd.f32 %v622_v1, %v606_v36  ;;  %v640_v19 = vadd.f32 %v624_v2, %v608_v42  ;;  %v642_v5 = vadd.f32 %v626_v3, %v610_v43  ;;  %644 = vst [vmem:[%s1092_s26 + $0x8] sm:$0xff] %v628_v55 }
 0x1aa   : > { %646 = vst [vmem:[%s1092_s26 + $0x18] sm:$0xff] %v630_v57  ;;  %648 = vst [vmem:[%s1092_s26 + $0x28] sm:$0xff] %v632_v59 }
 0x1ab   : > { %650 = vst [vmem:[%s1092_s26 + $0x38] sm:$0xff] %v634_v61  ;;  %652 = vst [vmem:[%s1092_s26 + $0x48] sm:$0xff] %v636_v15 }
 0x1ac   : > { %654 = vst [vmem:[%s1092_s26 + $0x58] sm:$0xff] %v638_v4  ;;  %656 = vst [vmem:[%s1092_s26 + $0x68] sm:$0xff] %v640_v19 }
 0x1ad   : > { %658 = vst [vmem:[%s1092_s26 + $0x78] sm:$0xff] %v642_v5 }
 0x1ae PF: > { %s18_s25 = sadd.s32 1, %s857_s25   ;;  %s1154_s23 = smov %s853_s24 }
 0x1af   : > { %p15_p5 = scmp.ge.s32.totalorder %s18_s25, 4   ;;  %s1155_s24 = smov %s1157_s5 }
 0x1b1   :  { %17 = sbr.rel (!%p15_p5) target bundleno = 3 (0x3), region = 77 }

// kernel: rcg_forward.2
= control target key start
LH: loop header
LB: loop body
LE: loop exit
PB: predicated region body
PF: predicated region fallthrough
CT: control target
= control target key end

     0   :  { %s9485_s0 = inlined_call_operand.vmem [shape: s32[18], index: 0, kind: input, shape index: {}]   ;;  %s9486_s4 = inlined_call_operand.vmem [shape: f32[2,16,16,1], index: 4, kind: input, shape index: {}]   ;;  %s9487_s5 = inlined_call_operand.vmem [shape: f32[2,16,16,64], index: 5, kind: input, shape index: {}]   ;;  %s9488_s6 = inlined_call_operand.vmem [shape: f32[2,1,16,1], index: 6, kind: input, shape index: {}, may-alias: {6,8}]   ;;  %s9489_s7 = inlined_call_operand.vmem [shape: f32[2,1,16,64], index: 7, kind: input, shape index: {}, may-alias: {7,9}]   ;;  %s9490_s8 = inlined_call_operand.vmem [shape: f32[2,1,16,1], index: 8, kind: input, shape index: {}, may-alias: {6,8}]   ;;  %s9491_s9 = inlined_call_operand.vmem [shape: f32[2,1,16,64], index: 9, kind: input, shape index: {}, may-alias: {7,9}]   ;;  %s9492_s10 = inlined_call_operand.vmem [shape: f32[2,8,16,64], index: 10, kind: input, shape index: {}]   ;;  %s9493_s11 = inlined_call_operand.vmem [shape: f32[3,3,128,64], index: 11, kind: input, shape index: {}]   ;;  %s9494_s12 = inlined_call_operand.vmem [shape: f32[1,64], index: 12, kind: input, shape index: {}]   ;;  %s9495_s13 = inlined_call_operand.vmem [shape: f32[2,64,256], index: 13, kind: output, shape index: {0}]   ;;  %s9496_s14 = inlined_call_operand.vmem [shape: f32[2,1,1,128], index: 14, kind: output, shape index: {1}]   ;;  %s9497_s1 = inlined_call_operand.vmem [shape: s32[18], index: 1, kind: input, shape index: {}]   ;;  %s9498_s2 = inlined_call_operand.vmem [shape: f32[18], index: 2, kind: input, shape index: {}]   ;;  %s9499_s3 = inlined_call_operand.vmem [shape: f32[18], index: 3, kind: input, shape index: {}]  }
   0x1   :  { %9528 = sst [smem:[#allocation30_spill]] %s9486_s4  ;;  %s20_s15 = sshll.u32 %s9485_s0, 4  ;;  %s21_s15 = int_to_ptr.vmem [resolvable:$true] %s20_s15 }
   0x2   :  { %9529 = sst [smem:[#allocation31_spill]] %s9487_s5  ;;  %s24_s18 = sshll.u32 %s9497_s1, 4  ;;  %s25_s18 = int_to_ptr.vmem [resolvable:$true] %s24_s18 }
   0x3   :  { %9530 = sst [smem:[#allocation32_spill]] %s9488_s6  ;;  %s7467_s19 = scalar_lea.vmem %s21_s15, 16 }
   0x4   :  { %9531 = sst [smem:[#allocation33_spill]] %s9489_s7  ;;  %p7468_p0 = scmp.ne.s32.totalorder %s21_s15, %s7467_s19 }
   0x5   :  { %9532 = sst [smem:[#allocation34_spill]] %s9490_s8  ;;  %p7472_p1 = scmp.lt.s32.totalorder %s21_s15, %s21_s15 }
   0x6   :  { %9533 = sst [smem:[#allocation35_spill]] %s9492_s10  ;;  %p7473_p2 = scmp.lt.s32.totalorder %s7467_s19, %s7467_s19 }
   0x8   :  { %p7474_p3 = por %p7473_p2, %p7472_p1 }
   0xa   :  { %p7475_p4 = pnand %p7474_p3, %p7468_p0 }
   0xc   :  { %7478 = shalt.err (!%p7475_p4)  }
   0xd   :  { %s7541_s20 = smov [#allocation4]   ;;  %s7479_s21 = scalar_lea.vmem %s25_s18, 16 }
   0xe   :  { %23 = dma.vmem_to_smem %s21_s15, 16, %s7541_s20, [#allocation3] }
   0xf   :  { %p7480_p5 = scmp.ne.s32.totalorder %s25_s18, %s7479_s21  ;;  %p7484_p6 = scmp.lt.s32.totalorder %s25_s18, %s25_s18 }
  0x10   :  { %p7485_p7 = scmp.lt.s32.totalorder %s7479_s21, %s7479_s21 }
  0x12   :  { %p7486_p8 = por %p7485_p7, %p7484_p6 }
  0x14   :  { %p7487_p9 = pnand %p7486_p8, %p7480_p5 }
  0x16   :  { %7490 = shalt.err (!%p7487_p9)  }
  0x17   :  { %s7542_s0 = smov [#allocation5]   ;;  %s28_s23 = sshll.u32 %s9498_s2, 4  ;;  %s29_s23 = int_to_ptr.vmem [resolvable:$true] %s28_s23 }
  0x18   :  { %27 = dma.vmem_to_smem %s25_s18, 16, %s7542_s0, [#allocation3] }
  0x19   :  { %s32_s26 = sshll.u32 %s9499_s3, 4  ;;  %s7491_s27 = scalar_lea.vmem %s29_s23, 16  ;;  %s33_s26 = int_to_ptr.vmem [resolvable:$true] %s32_s26 }
  0x1a   :  { %p7492_p10 = scmp.ne.s32.totalorder %s29_s23, %s7491_s27  ;;  %p7496_p11 = scmp.lt.s32.totalorder %s29_s23, %s29_s23 }
  0x1b   :  { %p7497_p12 = scmp.lt.s32.totalorder %s7491_s27, %s7491_s27 }
  0x1d   :  { %p7498_p13 = por %p7497_p12, %p7496_p11 }
  0x1f   :  { %p7499_p0 = pnand %p7498_p13, %p7492_p10 }
  0x21   :  { %7502 = shalt.err (!%p7499_p0)  }
  0x22   :  { %s7543_s28 = smov [#allocation6]   ;;  %s7503_s29 = scalar_lea.vmem %s33_s26, 16 }
  0x23   :  { %31 = dma.vmem_to_smem %s29_s23, 16, %s7543_s28, [#allocation3] }
  0x24   :  { %p7504_p1 = scmp.ne.s32.totalorder %s33_s26, %s7503_s29  ;;  %p7508_p2 = scmp.lt.s32.totalorder %s33_s26, %s33_s26 }
  0x25   :  { %p7509_p3 = scmp.lt.s32.totalorder %s7503_s29, %s7503_s29 }
  0x27   :  { %p7510_p4 = por %p7509_p3, %p7508_p2 }
  0x29   :  { %p7511_p5 = pnand %p7510_p4, %p7504_p1 }
  0x2b   :  { %7514 = shalt.err (!%p7511_p5)  }
  0x2c   :  { %s7544_s2 = smov [#allocation7]  }
  0x2d   :  { %35 = dma.vmem_to_smem %s33_s26, 16, %s7544_s2, [#allocation3] }
  0x2e   :  { %7527 = dma.done.wait [#allocation3], 64 }
  0x2f   :  { %7528 = vsyncadd [#allocation3], 4294967232 }
  0x30   :  { %37 = sfence }
  0x31   :  { %s7636_s3 = smov 0   ;;  %s7638_s30 = smov 0  }
  0x32   :  { %s7640_s15 = smov 0  }
  0x33 LB: > { %9534 = sst [smem:[#allocation9_spill]] %s7535_s30  ;;  %s55_s16 = sadd.s32 1, %s7535_s30  ;;  %s7539_s15 = sphi %s7640_s15, %s43_s15   ;;  %s7535_s30 = sphi %s7638_s30, %s9583_s30   ;;  %s7531_s3 = sphi %s7636_s3, %s9582_s3  }
  0x34   : > { %9535 = sst [smem:[#allocation10_spill]] %s7539_s15  ;;  %p5214_p6 = scmp.ge.s32.totalorder %s7539_s15, 1 }
  0x35   : > { %p57_p7 = scmp.ge.s32.totalorder %s55_s16, 2  ;;  %p453_p8 = scmp.lt.s32.totalorder %s7539_s15, 3 }
  0x37   : > { %s9585_s16 = smov (%p57_p7, %s55_s16), 0  ;;  %p454_p9 = pnand %p5214_p6, %p453_p8 }
  0x38   : > { %9536 = sst [smem:[#allocation11_spill]] %s9585_s16 }
  0x39   : > { %457 = sbr.rel (%p454_p9) target bundleno = 1241 (0x4d9), region = 56 }
  0x40   : > { %p558_p10 = scmp.lt.s32.totalorder %s7531_s3, 1  ;;  %v7545_v0 = vmov 0   ;;  %s9537_s4 = sld [smem:[#allocation30_spill]]  ;;  %vm1281_vm0 = vcmask 1048064   ;;  %vm1416_vm1 = vcmask 523264  }
  0x41   : > { %7322 = vset.pattern.permute.xlu1 %v7545_v0  ;;  %7321 = vset.pattern.permute.xlu0 %v7545_v0  ;;  %s9538_s6 = sld [smem:[#allocation32_spill]]  ;;  %s9539_s5 = sld [smem:[#allocation31_spill]] }
  0x42   : > { %s9587_s3 = smov (!%p558_p10, %s7531_s3), 1  ;;  %s9540_s7 = sld [smem:[#allocation33_spill]] }
  0x43   : > { %s5502_s17 = sshll.u32 %s9587_s3, 8  ;;  %s7667_s21 = sshll.u32 %s9587_s3, 4 }
  0x44   : > { %s9500_s19 = smov 64   ;;  %s9542_s8 = sld [smem:[#allocation34_spill]] }
  0x45   : > { %s5270_s24 = sld [smem:[#allocation4 + $0x1]]  ;;  %s1397_s26 = sld [smem:[#allocation4]] }
  0x46   : > { %s7662_s20 = scalar_lea.vmem %s9537_s4, %s5502_s17  ;;  %s1406_s27 = sld [smem:[#allocation5]] }
  0x47   : > { %v673_v1 = vld [vmem:[%s7662_s20 + $0x8] sm:$0xff]  ;;  %v672_v2 = vld [vmem:[%s7662_s20] sm:$0xff]  ;;  %v675_v3 = vld [vmem:[%s7662_s20 + $0x18] sm:$0xff]  ;;  %s587_s22 = scalar_lea.vmem %s9538_s6, %s7667_s21  ;;  %s7747_s1 = scalar_lea.vmem %s9539_s5, %s5502_s17 }
  0x48   : > { %v5232_v4 = vmul.f32 -1.442695, %v673_v1  ;;  %v5231_v5 = vmul.f32 -1.442695, %v672_v2  ;;  %v1315_v6 = vld [vmem:[%s587_s22 + $0x8] sm:$0xff]  ;;  %v1314_v7 = vld [vmem:[%s587_s22] sm:$0xff]  ;;  %s596_s17 = scalar_lea.vmem %s9540_s7, %s7667_s21 }
  0x49   : > { %v674_v8 = vld [vmem:[%s7662_s20 + $0x10] sm:$0xff]  ;;  %v5264_v9 = vmul.f32 -1.442695, %v1315_v6  ;;  %v5263_v10 = vmul.f32 -1.442695, %v1314_v7  ;;  %v677_v13 = vld [vmem:[%s7662_s20 + $0x28] sm:$0xff] }
  0x4a   : > { %7323 = vpow2.f32 %v5232_v4  ;;  %v5234_v11 = vmul.f32 -1.442695, %v675_v3  ;;  %v5233_v12 = vmul.f32 -1.442695, %v674_v8  ;;  %v676_v14 = vld [vmem:[%s7662_s20 + $0x20] sm:$0xff]  ;;  %v679_v15 = vld [vmem:[%s7662_s20 + $0x38] sm:$0xff]  ;;  %s605_s25 = scalar_lea.vmem %s9542_s8, %s7667_s21 }
  0x4b   : > { %7325 = vpow2.f32 %v5231_v5  ;;  %v5236_v16 = vmul.f32 -1.442695, %v677_v13  ;;  %v5235_v17 = vmul.f32 -1.442695, %v676_v14  ;;  %v678_v18 = vld [vmem:[%s7662_s20 + $0x30] sm:$0xff]  ;;  %v681_v19 = vld [vmem:[%s7662_s20 + $0x48] sm:$0xff] }
  0x4c   : > { %7327 = vpow2.f32 %v5264_v9  ;;  %v5238_v20 = vmul.f32 -1.442695, %v679_v15  ;;  %v680_v21 = vld [vmem:[%s7662_s20 + $0x40] sm:$0xff]  ;;  %v5237_v22 = vmul.f32 -1.442695, %v678_v18  ;;  %v683_v23 = vld [vmem:[%s7662_s20 + $0x58] sm:$0xff] }
  0x4d   : > { %7329 = vpow2.f32 %v5263_v10  ;;  %v5240_v24 = vmul.f32 -1.442695, %v681_v19  ;;  %v5239_v25 = vmul.f32 -1.442695, %v680_v21  ;;  %v5242_v26 = vmul.f32 -1.442695, %v683_v23 }
  0x4e   : > { %7331 = vpow2.f32 %v5234_v11  ;;  %v682_v46 = vld [vmem:[%s7662_s20 + $0x50] sm:$0xff]  ;;  %v685_v49 = vld [vmem:[%s7662_s20 + $0x68] sm:$0xff]  ;;  %v684_v52 = vld [vmem:[%s7662_s20 + $0x60] sm:$0xff]  ;;  %s7934_s28 = sld [smem:[#allocation6 + $0x1]]  ;;  %s5271_s29 = sshll.u32 %s5270_s24, 4 }
  0x4f   : > { %7333 = vpow2.f32 %v5233_v12  ;;  %v5241_v55 = vmul.f32 -1.442695, %v682_v46  ;;  %v687_v56 = vld [vmem:[%s7662_s20 + $0x78] sm:$0xff]  ;;  %v5244_v59 = vmul.f32 -1.442695, %v685_v49  ;;  %v686_v60 = vld [vmem:[%s7662_s20 + $0x70] sm:$0xff] }
  0x50   : > { %7335 = vpow2.f32 %v5236_v16  ;;  %v5243_v63 = vmul.f32 -1.442695, %v684_v52  ;;  %v689_v0 = vld [vmem:[%s7662_s20 + $0x88] sm:$0xff]  ;;  %v5246_v3 = vmul.f32 -1.442695, %v687_v56  ;;  %v688_v4 = vld [vmem:[%s7662_s20 + $0x80] sm:$0xff] }
  0x51   : > { %7337 = vpow2.f32 %v5235_v17  ;;  %v5245_v7 = vmul.f32 -1.442695, %v686_v60  ;;  %v691_v8 = vld [vmem:[%s7662_s20 + $0x98] sm:$0xff]  ;;  %v5248_v11 = vmul.f32 -1.442695, %v689_v0  ;;  %v690_v12 = vld [vmem:[%s7662_s20 + $0x90] sm:$0xff] }
  0x52   : > { %7339 = vpow2.f32 %v5238_v20  ;;  %v5247_v14 = vmul.f32 -1.442695, %v688_v4  ;;  %v693_v15 = vld [vmem:[%s7662_s20 + $0xa8] sm:$0xff]  ;;  %v5250_v17 = vmul.f32 -1.442695, %v691_v8  ;;  %v692_v18 = vld [vmem:[%s7662_s20 + $0xa0] sm:$0xff] }
  0x53   : > { %7341 = vpow2.f32 %v5237_v22  ;;  %v5249_v21 = vmul.f32 -1.442695, %v690_v12  ;;  %v695_v22 = vld [vmem:[%s7662_s20 + $0xb8] sm:$0xff]  ;;  %s7936_s18 = sld [smem:[#allocation7 + $0x1]]  ;;  %s9547_s10 = sld [smem:[#allocation35_spill]] }
  0x54   : > { %v7324_v27 = vpop.eup %7323  ;;  %7343 = vpow2.f32 %v5240_v24  ;;  %s5268_s4 = sshll.u32 %s1406_s27, 4  ;;  %s7953_s5 = sld [smem:[#allocation4 + $0x3]] }
  0x55   : > { %v7326_v28 = vpop.eup %7325  ;;  %v801_v29 = vadd.f32 1.0, %v7324_v27  ;;  %7345 = vpow2.f32 %v5239_v25  ;;  %v5252_v25 = vmul.f32 -1.442695, %v693_v15  ;;  %s7957_s0 = sld [smem:[#allocation7]]  ;;  %s7975_s6 = sld [smem:[#allocation4 + $0x4]] }
  0x56   : > { %v7328_v30 = vpop.eup %7327  ;;  %v800_v31 = vadd.f32 1.0, %v7326_v28  ;;  %7347 = vpow2.f32 %v5242_v26  ;;  %v694_v26 = vld [vmem:[%s7662_s20 + $0xb0] sm:$0xff]  ;;  %v5251_v28 = vmul.f32 -1.442695, %v692_v18  ;;  %s8044_s16 = sld [smem:[#allocation4 + $0x7]]  ;;  %s8376_s30 = sld [smem:[#allocation7 + $0xd]] }
  0x57   : > { %v7330_v32 = vpop.eup %7329  ;;  %7349 = vrcp.f32 %v801_v29  ;;  %v1323_v33 = vadd.f32 1.0, %v7328_v30  ;;  %v5254_v30 = vmul.f32 -1.442695, %v695_v22  ;;  %v702_v18 = vld [vmem:[%s7662_s20 + $0xf0] sm:$0xff]  ;;  %v703_v22 = vld [vmem:[%s7662_s20 + $0xf8] sm:$0xff] }
  0x58   : > { %v7332_v34 = vpop.eup %7331  ;;  %7351 = vrcp.f32 %v800_v31  ;;  %v1322_v35 = vadd.f32 1.0, %v7330_v32 }
  0x59   : > { %v7334_v36 = vpop.eup %7333  ;;  %7353 = vrcp.f32 %v1323_v33  ;;  %v803_v37 = vadd.f32 1.0, %v7332_v34  ;;  %v5253_v33 = vmul.f32 -1.442695, %v694_v26 }
  0x5a   : > { %v7336_v38 = vpop.eup %7335  ;;  %7355 = vrcp.f32 %v1322_v35  ;;  %v802_v39 = vadd.f32 1.0, %v7334_v36  ;;  %s5283_s8 = sshll.u32 %s7953_s5, 4 }
  0x5b   : > { %v7338_v40 = vpop.eup %7337  ;;  %7357 = vrcp.f32 %v803_v37  ;;  %v805_v41 = vadd.f32 1.0, %v7336_v38 }
  0x5c   : > { %v7340_v42 = vpop.eup %7339  ;;  %7359 = vrcp.f32 %v802_v39  ;;  %v804_v43 = vadd.f32 1.0, %v7338_v40 }
  0x5d   : > { %v7342_v44 = vpop.eup %7341  ;;  %7361 = vrcp.f32 %v805_v41  ;;  %v807_v45 = vadd.f32 1.0, %v7340_v42 }
  0x5e   : > { %v7344_v47 = vpop.eup %7343  ;;  %7363 = vrcp.f32 %v804_v43  ;;  %v806_v48 = vadd.f32 1.0, %v7342_v44 }
  0x5f   : > { %v7346_v50 = vpop.eup %7345  ;;  %7365 = vrcp.f32 %v807_v45  ;;  %v809_v51 = vadd.f32 1.0, %v7344_v47 }
  0x60   : > { %v7348_v53 = vpop.eup %7347  ;;  %7367 = vrcp.f32 %v806_v48  ;;  %v808_v54 = vadd.f32 1.0, %v7346_v50 }
  0x61   : > { %v7350_v57 = vpop.eup %7349  ;;  %7369 = vrcp.f32 %v809_v51  ;;  %v811_v58 = vadd.f32 1.0, %v7348_v53 }
  0x62   : > { %v7352_v61 = vpop.eup %7351  ;;  %v897_v62 = vsub.f32 1.0, %v7350_v57  ;;  %7371 = vrcp.f32 %v808_v54 }
  0x63   : > { %v7354_v1 = vpop.eup %7353  ;;  %v896_v2 = vsub.f32 1.0, %v7352_v61  ;;  %7373 = vrcp.f32 %v811_v58 }
  0x64   : > { %v7356_v5 = vpop.eup %7355  ;;  %967 = vperm.xlu1 %7322, %v897_v62   ;;  %v1329_v6 = vsub.f32 1.0, %v7354_v1  ;;  %7375 = vpow2.f32 %v5241_v55 }
  0x65   : > { %v7358_v9 = vpop.eup %7357  ;;  %962 = vperm.xlu0 %7321, %v896_v2   ;;  %v1328_v10 = vsub.f32 1.0, %v7356_v5  ;;  %7377 = vpow2.f32 %v5244_v59  ;;  %v697_v59 = vld [vmem:[%s7662_s20 + $0xc8] sm:$0xff]  ;;  %v699_v2 = vld [vmem:[%s7662_s20 + $0xd8] sm:$0xff] }
  0x66   : > { %v7360_v13 = vpop.eup %7359  ;;  %7379 = vpow2.f32 %v5243_v63  ;;  %v899_v20 = vsub.f32 1.0, %v7358_v9  ;;  %v696_v63 = vld [vmem:[%s7662_s20 + $0xc0] sm:$0xff]  ;;  %v5256_v5 = vmul.f32 -1.442695, %v697_v59 }
  0x67   : > { %v7362_v16 = vpop.eup %7361  ;;  %7381 = vpow2.f32 %v5246_v3  ;;  %v898_v24 = vsub.f32 1.0, %v7360_v13  ;;  %v5255_v9 = vmul.f32 -1.442695, %v696_v63  ;;  %v5258_v13 = vmul.f32 -1.442695, %v699_v2 }
  0x68   : > { %v7364_v19 = vpop.eup %7363  ;;  %1339 = vperm.xlu1 %7322, %v1329_v6   ;;  %7383 = vpow2.f32 %v5245_v7  ;;  %v901_v32 = vsub.f32 1.0, %v7362_v16  ;;  %v698_v6 = vld [vmem:[%s7662_s20 + $0xd0] sm:$0xff] }
  0x69   : > { %v7366_v23 = vpop.eup %7365  ;;  %1334 = vperm.xlu0 %7321, %v1328_v10   ;;  %7385 = vpow2.f32 %v5248_v11  ;;  %v900_v35 = vsub.f32 1.0, %v7364_v19  ;;  %v701_v10 = vld [vmem:[%s7662_s20 + $0xe8] sm:$0xff] }
  0x6a   : > { %v7368_v27 = vpop.eup %7367  ;;  %7387 = vpow2.f32 %v5247_v14  ;;  %v903_v40 = vsub.f32 1.0, %v7366_v23  ;;  %v700_v14 = vld [vmem:[%s7662_s20 + $0xe0] sm:$0xff]  ;;  %s7955_s20 = sld [smem:[#allocation6]] }
  0x6b   : > { %v7370_v29 = vpop.eup %7369  ;;  %7389 = vpow2.f32 %v5250_v17  ;;  %v902_v43 = vsub.f32 1.0, %v7368_v27  ;;  %v5257_v17 = vmul.f32 -1.442695, %v698_v6  ;;  %v5261_v27 = vmul.f32 -1.442695, %v702_v18 }
  0x6c   : > { %v7372_v31 = vpop.eup %7371  ;;  %977 = vperm.xlu1 %7322, %v899_v20   ;;  %7391 = vpow2.f32 %v5249_v21  ;;  %v905_v50 = vsub.f32 1.0, %v7370_v29  ;;  %v5260_v21 = vmul.f32 -1.442695, %v701_v10  ;;  %v5262_v29 = vmul.f32 -1.442695, %v703_v22  ;;  %v5377_v22 = vld [vmem:[%s9493_s11 + $0xb0] sm:$0xff] }
  0x6d   : > { %v7695_v34 = vpop.eup %7373  ;;  %972 = vperm.xlu0 %7321, %v898_v24   ;;  %7393 = vpow2.f32 %v5252_v25  ;;  %v904_v53 = vsub.f32 1.0, %v7372_v31  ;;  %v5259_v24 = vmul.f32 -1.442695, %v700_v14  ;;  %v5372_v14 = vld [vmem:[%s9493_s11 + $0x88] sm:$0xff] }
  0x6e   : > { %v7376_v36 = vpop.eup %7375  ;;  %7395 = vpow2.f32 %v5251_v28  ;;  %v907_v61 = vsub.f32 1.0, %v7695_v34 }
  0x6f   : > { %v7378_v37 = vpop.eup %7377  ;;  %v810_v38 = vadd.f32 1.0, %v7376_v36  ;;  %7397 = vpow2.f32 %v5254_v30 }
  0x70   : > { %v7380_v39 = vpop.eup %7379  ;;  %987 = vperm.xlu1 %7322, %v901_v32   ;;  %v813_v41 = vadd.f32 1.0, %v7378_v37  ;;  %7399 = vpow2.f32 %v5253_v33 }
  0x71   : > { %v7382_v42 = vpop.eup %7381  ;;  %982 = vperm.xlu0 %7321, %v900_v35   ;;  %7401 = vrcp.f32 %v810_v38  ;;  %v812_v44 = vadd.f32 1.0, %v7380_v39 }
  0x72   : > { %v7384_v45 = vpop.eup %7383  ;;  %7403 = vrcp.f32 %v813_v41  ;;  %v815_v46 = vadd.f32 1.0, %v7382_v42 }
  0x73   : > { %v7386_v47 = vpop.eup %7385  ;;  %7405 = vrcp.f32 %v812_v44  ;;  %v814_v48 = vadd.f32 1.0, %v7384_v45 }
  0x74   : > { %v7388_v49 = vpop.eup %7387  ;;  %997 = vperm.xlu1 %7322, %v903_v40   ;;  %7407 = vrcp.f32 %v815_v46  ;;  %v817_v51 = vadd.f32 1.0, %v7386_v47 }
  0x75   : > { %v7390_v52 = vpop.eup %7389  ;;  %992 = vperm.xlu0 %7321, %v902_v43   ;;  %7409 = vrcp.f32 %v814_v48  ;;  %v816_v54 = vadd.f32 1.0, %v7388_v49 }
  0x76   : > { %v7392_v55 = vpop.eup %7391  ;;  %7411 = vrcp.f32 %v817_v51  ;;  %v819_v56 = vadd.f32 1.0, %v7390_v52 }
  0x77   : > { %v7394_v57 = vpop.eup %7393  ;;  %7413 = vrcp.f32 %v816_v54  ;;  %v818_v58 = vadd.f32 1.0, %v7392_v55 }
  0x78   : > { %v7396_v60 = vpop.eup %7395  ;;  %1007 = vperm.xlu1 %7322, %v905_v50   ;;  %7415 = vrcp.f32 %v819_v56  ;;  %v821_v62 = vadd.f32 1.0, %v7394_v57 }
  0x79   : > { %v7398_v0 = vpop.eup %7397  ;;  %1002 = vperm.xlu0 %7321, %v904_v53   ;;  %7417 = vrcp.f32 %v818_v58  ;;  %v820_v1 = vadd.f32 1.0, %v7396_v60 }
  0x7a   : > { %v7400_v3 = vpop.eup %7399  ;;  %7419 = vrcp.f32 %v821_v62  ;;  %v823_v4 = vadd.f32 1.0, %v7398_v0 }
  0x7b   : > { %v7402_v7 = vpop.eup %7401  ;;  %7421 = vrcp.f32 %v820_v1  ;;  %v822_v8 = vadd.f32 1.0, %v7400_v3 }
  0x7c   : > { %v7404_v11 = vpop.eup %7403  ;;  %1017 = vperm.xlu1 %7322, %v907_v61   ;;  %v906_v12 = vsub.f32 1.0, %v7402_v7  ;;  %7423 = vrcp.f32 %v823_v4 }
  0x7d   : > { %v7406_v15 = vpop.eup %7405  ;;  %v909_v16 = vsub.f32 1.0, %v7404_v11  ;;  %7425 = vrcp.f32 %v822_v8 }
  0x7e   : > { %v7408_v19 = vpop.eup %7407  ;;  %1012 = vperm.xlu0 %7321, %v906_v12   ;;  %v908_v20 = vsub.f32 1.0, %v7406_v15  ;;  %7427 = vpow2.f32 %v5256_v5  ;;  %v5373_v15 = vld [vmem:[%s9493_s11 + $0x90] sm:$0xff] }
  0x7f   : > { %v7410_v23 = vpop.eup %7409  ;;  %7429 = vpow2.f32 %v5255_v9  ;;  %v911_v26 = vsub.f32 1.0, %v7408_v19  ;;  %v5375_v19 = vld [vmem:[%s9493_s11 + $0xa0] sm:$0xff] }
  0x80   : > { %v7412_v25 = vpop.eup %7411  ;;  %1027 = vperm.xlu1 %7322, %v909_v16   ;;  %7431 = vpow2.f32 %v5258_v13  ;;  %v910_v31 = vsub.f32 1.0, %v7410_v23  ;;  %v5371_v13 = vld [vmem:[%s9493_s11 + $0x80] sm:$0xff]  ;;  %v5378_v23 = vld [vmem:[%s9493_s11 + $0xb8] sm:$0xff] }
  0x81   : > { %v7414_v28 = vpop.eup %7413  ;;  %7433 = vpow2.f32 %v5257_v17  ;;  %v913_v34 = vsub.f32 1.0, %v7412_v25  ;;  %v6697_v16 = vpack.c.bf16 %v5372_v14, %v5371_v13  ;;  %v5374_v17 = vld [vmem:[%s9493_s11 + $0x98] sm:$0xff]  ;;  %v5379_v25 = vld [vmem:[%s9493_s11 + $0xc0] sm:$0xff]  ;;  %v5425_v14 = vld [vmem:[%s9493_s11 + $0x230] sm:$0xff] }
  0x82   : > { %v7416_v30 = vpop.eup %7415  ;;  %1022 = vperm.xlu0 %7321, %v908_v20   ;;  %7435 = vpow2.f32 %v5260_v21  ;;  %v912_v37 = vsub.f32 1.0, %v7414_v28  ;;  %v6701_v18 = vpack.c.bf16 %v5374_v17, %v5373_v15  ;;  %v5376_v20 = vld [vmem:[%s9493_s11 + $0xa8] sm:$0xff]  ;;  %v5381_v28 = vld [vmem:[%s9493_s11 + $0xd0] sm:$0xff]  ;;  %v5426_v17 = vld [vmem:[%s9493_s11 + $0x238] sm:$0xff] }
  0x83   : > { %v7418_v32 = vpop.eup %7417  ;;  %7437 = vpow2.f32 %v5259_v24  ;;  %v915_v40 = vsub.f32 1.0, %v7416_v30  ;;  %6698 = vmatprep.subr.bf16.mxu1 %v6697_v16  ;;  %v6705_v21 = vpack.c.bf16 %v5376_v20, %v5375_v19  ;;  %v6709_v24 = vpack.c.bf16 %v5378_v23, %v5377_v22  ;;  %v938_v20 = vld [vmem:[%s7747_s1 + $0x50] sm:$0xff]  ;;  %v5427_v22 = vld [vmem:[%s9493_s11 + $0x240] sm:$0xff] }
  0x84   : > { %v7420_v33 = vpop.eup %7419  ;;  %1037 = vperm.xlu1 %7322, %v911_v26   ;;  %7439 = vpow2.f32 %v5261_v27  ;;  %v914_v44 = vsub.f32 1.0, %v7418_v32  ;;  %6700 = vmatpush3.bf16.msra.mxu1 %v6697_v16  ;;  %v5380_v26 = vld [vmem:[%s9493_s11 + $0xc8] sm:$0xff] }
  0x85   : > { %v7422_v35 = vpop.eup %7421  ;;  %7441 = vpow2.f32 %v5262_v29  ;;  %v917_v49 = vsub.f32 1.0, %v7420_v33  ;;  %6702 = vmatprep.subr.bf16.mxu1 %v6701_v18  ;;  %v6713_v27 = vpack.c.bf16 %v5380_v26, %v5379_v25  ;;  %v5382_v29 = vld [vmem:[%s9493_s11 + $0xd8] sm:$0xff]  ;;  %v5384_v32 = vld [vmem:[%s9493_s11 + $0xe8] sm:$0xff]  ;;  %v928_v33 = vld [vmem:[%s7747_s1] sm:$0xff] }
  0x86   : > { %v7424_v36 = vpop.eup %7423  ;;  %1032 = vperm.xlu0 %7321, %v910_v31   ;;  %v916_v54 = vsub.f32 1.0, %v7422_v35  ;;  %v6717_v30 = vpack.c.bf16 %v5382_v29, %v5381_v28  ;;  %v5383_v31 = vld [vmem:[%s9493_s11 + $0xe0] sm:$0xff]  ;;  %v5428_v25 = vld [vmem:[%s9493_s11 + $0x248] sm:$0xff]  ;;  %v939_v26 = vld [vmem:[%s7747_s1 + $0x58] sm:$0xff] }
  0x87   : > { %v7426_v38 = vpop.eup %7425  ;;  %v919_v58 = vsub.f32 1.0, %v7424_v36  ;;  %v929_v36 = vld [vmem:[%s7747_s1 + $0x8] sm:$0xff]  ;;  %v7838_v28 = vpack.c.bf16 %v5428_v25, %v5427_v22  ;;  %v951_v25 = vld [vmem:[%s7747_s1 + $0xb8] sm:$0xff] }
  0x88   : > { %v7428_v39 = vpop.eup %7427  ;;  %1047 = vperm.xlu1 %7322, %v913_v34   ;;  %v918_v60 = vsub.f32 1.0, %v7426_v38  ;;  %6704 = vmatpush3.bf16.msra.mxu1 %v6701_v18  ;;  %v6721_v34 = vpack.c.bf16 %v5384_v32, %v5383_v31  ;;  %v937_v18 = vld [vmem:[%s7747_s1 + $0x48] sm:$0xff]  ;;  %v1354_v31 = vld [vmem:[%s605_s25] sm:$0xff]  ;;  %v5429_v32 = vld [vmem:[%s9493_s11 + $0x250] sm:$0xff] }
  0x89   : > { %v7430_v41 = vpop.eup %7429  ;;  %v825_v42 = vadd.f32 1.0, %v7428_v39  ;;  %6706 = vmatprep.subr.bf16.mxu1 %v6705_v21  ;;  %v5385_v39 = vld [vmem:[%s9493_s11 + $0xf0] sm:$0xff]  ;;  %9543 = vst [vmem:[#allocation13_spill] sm:$0xff] %v7838_v28 }
  0x8a   : > { %v7432_v43 = vpop.eup %7431  ;;  %1042 = vperm.xlu0 %7321, %v912_v37   ;;  %v824_v45 = vadd.f32 1.0, %v7430_v41  ;;  %v1330_v41 = vld [vmem:[%s596_s17] sm:$0xff] }
  0x8b   : > { %v7434_v46 = vpop.eup %7433  ;;  %7443 = vrcp.f32 %v825_v42  ;;  %v827_v47 = vadd.f32 1.0, %v7432_v43 }
  0x8c   : > { %v7436_v48 = vpop.eup %7435  ;;  %1057 = vperm.xlu1 %7322, %v915_v40   ;;  %7445 = vrcp.f32 %v824_v45  ;;  %v826_v50 = vadd.f32 1.0, %v7434_v46  ;;  %6708 = vmatpush3.bf16.msra.mxu1 %v6705_v21  ;;  %v5386_v40 = vld [vmem:[%s9493_s11 + $0xf8] sm:$0xff]  ;;  %v7823_v21 = vpack.c.bf16 %v5426_v17, %v5425_v14 }
  0x8d   : > { %v7438_v51 = vpop.eup %7437  ;;  %7447 = vrcp.f32 %v827_v47  ;;  %v829_v52 = vadd.f32 1.0, %v7436_v48  ;;  %6710 = vmatprep.subr.bf16.mxu1 %v6709_v24  ;;  %v6725_v42 = vpack.c.bf16 %v5386_v40, %v5385_v39  ;;  %v1331_v47 = vld [vmem:[%s596_s17 + $0x8] sm:$0xff]  ;;  %v930_v48 = vld [vmem:[%s7747_s1 + $0x10] sm:$0xff]  ;;  %s9502_s17 = sshll.u32 %s9587_s3, 7 }
  0x8e   : > { %v7440_v53 = vpop.eup %7439  ;;  %1052 = vperm.xlu0 %7321, %v914_v44   ;;  %7449 = vrcp.f32 %v826_v50  ;;  %v828_v55 = vadd.f32 1.0, %v7438_v51  ;;  %v5419_v50 = vld [vmem:[%s9493_s11 + $0x200] sm:$0xff]  ;;  %9541 = vst [vmem:[#allocation12_spill] sm:$0xff] %v7823_v21  ;;  %v1355_v39 = vld [vmem:[%s605_s25 + $0x8] sm:$0xff]  ;;  %s5273_s25 = sld [smem:[#allocation5 + $0x1]]  ;;  %s7943_s22 = scalar_lea.vmem %s9547_s10, %s9502_s17 }
  0x8f   : > { %v7442_v56 = vpop.eup %7441  ;;  %7451 = vrcp.f32 %v829_v52  ;;  %v830_v57 = vadd.f32 1.0, %v7440_v53  ;;  %v5420_v52 = vld [vmem:[%s9493_s11 + $0x208] sm:$0xff]  ;;  %s7946_s23 = scalar_lea.vmem %s7943_s22, %s5271_s29  ;;  %s7963_s29 = scalar_lea.vmem %s7943_s22, %s5268_s4 }
  0x90   : > { %1067 = vperm.xlu1 %7322, %v917_v49   ;;  %7453 = vrcp.f32 %v828_v55  ;;  %v831_v59 = vadd.f32 1.0, %v7442_v56  ;;  %6712 = vmatpush3.bf16.msra.mxu1 %v6709_v24  ;;  %v931_v55 = vld [vmem:[%s7747_s1 + $0x18] sm:$0xff]  ;;  %v932_v56 = vld [vmem:[%s7747_s1 + $0x20] sm:$0xff]  ;;  %s7977_s4 = sld [smem:[#allocation5 + $0x4]]  ;;  %s7994_s10 = sld [smem:[#allocation4 + $0x5]] }
  0x91   : > { %7455 = vrcp.f32 %v830_v57  ;;  %6714 = vmatprep.subr.bf16.mxu1 %v6713_v27  ;;  %v7779_v57 = vpack.c.bf16 %v5420_v52, %v5419_v50  ;;  %v944_v52 = vld [vmem:[%s7747_s1 + $0x80] sm:$0xff]  ;;  %s8002_s5 = scalar_lea.vmem %s7943_s22, %s5283_s8  ;;  %s8016_s8 = sld [smem:[#allocation4 + $0x6]] }
  0x92   : > { %1062 = vperm.xlu0 %7321, %v916_v54   ;;  %7457 = vrcp.f32 %v831_v59 }
  0x93   : > { %6826 = vmatprep.subr.bf16.mxu0 %v7779_v57 }
  0x94   : > { %1077 = vperm.xlu1 %7322, %v919_v58   ;;  %6716 = vmatpush3.bf16.msra.mxu1 %v6713_v27  ;;  %s5274_s2 = sshll.u32 %s5273_s25, 4  ;;  %s5267_s25 = sshll.u32 %s1397_s26, 4 }
  0x95   : > { %v7444_v61 = vpop.eup %7443  ;;  %6718 = vmatprep.subr.bf16.mxu1 %v6717_v30  ;;  %6828 = vmatpush3.bf16.msra.mxu0 %v7779_v57  ;;  %s7949_s24 = scalar_lea.vmem %s7943_s22, %s5274_s2  ;;  %s7960_s17 = scalar_lea.vmem %s7943_s22, %s5267_s25 }
  0x96   : > { %v7446_v62 = vpop.eup %7445  ;;  %1072 = vperm.xlu0 %7321, %v918_v60   ;;  %v921_v63 = vsub.f32 1.0, %v7444_v61  ;;  %v5421_v60 = vld [vmem:[%s9493_s11 + $0x210] sm:$0xff]  ;;  %s7965_s2 = sld [smem:[#allocation5 + $0x3]]  ;;  %s7971_s26 = sld [smem:[#allocation6 + $0x2]] }
  0x97   : > { %v7448_v0 = vpop.eup %7447  ;;  %v920_v1 = vsub.f32 1.0, %v7446_v62  ;;  %s7973_s25 = sld [smem:[#allocation7 + $0x2]] }
  0x98   : > { %v7450_v2 = vpop.eup %7449  ;;  %1087 = vperm.xlu1 %7322, %v921_v63   ;;  %v923_v3 = vsub.f32 1.0, %v7448_v0  ;;  %6720 = vmatpush3.bf16.msra.mxu1 %v6717_v30  ;;  %v5422_v63 = vld [vmem:[%s9493_s11 + $0x218] sm:$0xff]  ;;  %v933_v0 = vld [vmem:[%s7747_s1 + $0x28] sm:$0xff]  ;;  %v940_v30 = vld [vmem:[%s7747_s1 + $0x60] sm:$0xff] }
  0x99   : > { %v7452_v4 = vpop.eup %7451  ;;  %v922_v5 = vsub.f32 1.0, %v7450_v2  ;;  %6722 = vmatprep.subr.bf16.mxu1 %v6721_v34 }
  0x9a   : > { %1082 = vperm.xlu0 %7321, %v920_v1   ;;  %v7454_v6 = vpop.eup %7453  ;;  %v925_v7 = vsub.f32 1.0, %v7452_v4  ;;  %v934_v1 = vld [vmem:[%s7747_s1 + $0x30] sm:$0xff] }
  0x9b   : > { %v7456_v8 = vpop.eup %7455  ;;  %v924_v9 = vsub.f32 1.0, %v7454_v6  ;;  %v5424_v6 = vld [vmem:[%s9493_s11 + $0x228] sm:$0xff] }
  0x9c   : > { %1097 = vperm.xlu1 %7322, %v923_v3   ;;  %v7458_v10 = vpop.eup %7457  ;;  %v926_v11 = vsub.f32 1.0, %v7456_v8  ;;  %6724 = vmatpush3.bf16.msra.mxu1 %v6721_v34  ;;  %v7795_v3 = vpack.c.bf16 %v5422_v63, %v5421_v60 }
  0x9d   : > { %v927_v12 = vsub.f32 1.0, %v7458_v10  ;;  %6726 = vmatprep.subr.bf16.mxu1 %v6725_v42  ;;  %v935_v10 = vld [vmem:[%s7747_s1 + $0x38] sm:$0xff] }
  0x9e   : > { %1092 = vperm.xlu0 %7321, %v922_v5   ;;  %v5423_v5 = vld [vmem:[%s9493_s11 + $0x220] sm:$0xff]  ;;  %6830 = vmatprep.subr.bf16.mxu0 %v7795_v3 }
  0x9f   : > { %6832 = vmatpush3.bf16.msra.mxu0 %v7795_v3 }
  0xa0   : > { %1107 = vperm.xlu1 %7322, %v925_v7   ;;  %6728 = vmatpush3.bf16.msra.mxu1 %v6725_v42 }
  0xa2   : > { %1102 = vperm.xlu0 %7321, %v924_v9   ;;  %v7804_v9 = vpack.c.bf16 %v5424_v6, %v5423_v5  ;;  %v5436_v5 = vld [vmem:[%s9493_s11 + $0x288] sm:$0xff]  ;;  %v947_v6 = vld [vmem:[%s7747_s1 + $0x98] sm:$0xff] }
  0xa4   : > { %1112 = vperm.xlu1 %7322, %v926_v11   ;;  %v936_v11 = vld [vmem:[%s7747_s1 + $0x40] sm:$0xff]  ;;  %6834 = vmatprep.subr.bf16.mxu0 %v7804_v9 }
  0xa5   : > { %6836 = vmatpush3.bf16.msra.mxu0 %v7804_v9 }
  0xa6   : > { %1117 = vperm.xlu0 %7321, %v927_v12   ;;  %6838 = vmatprep.subr.bf16.mxu0 %v7823_v21 }
  0xa9   : > { %6840 = vmatpush3.bf16.msra.mxu0 %v7823_v21 }
  0xaa   : > { %6842 = vmatprep.subr.bf16.mxu0 %v7838_v28 }
  0xad   : > { %6844 = vmatpush3.bf16.msra.mxu0 %v7838_v28  ;;  %v5476_v28 = vld [vmem:[%s9493_s11 + $0x3c8] sm:$0xff] }
  0xe3   : > { %v968_v35 = vpop.permute.xlu1 %967 }
  0xe4   : > { %v963_v37 = vpop.permute.xlu0 %962  ;;  %v1121_v43 = vmul.f32 %v968_v35, %v929_v36  ;;  %v5430_v35 = vld [vmem:[%s9493_s11 + $0x258] sm:$0xff]  ;;  %v941_v36 = vld [vmem:[%s7747_s1 + $0x68] sm:$0xff] }
  0xe5   : > { %v1120_v38 = vmul.f32 %v963_v37, %v928_v33  ;;  %v7854_v42 = vpack.c.bf16 %v5430_v35, %v5429_v32 }
  0xe7   : > { %1184 = vrot.lane.b32.xlu0 %v1120_v38, %s9500_s19  ;;  %v1340_v44 = vpop.permute.xlu1 %1339  ;;  %v5265_v38 = vmul.f32 -1.442695, %v1354_v31  ;;  %9544 = vst [vmem:[#allocation14_spill] sm:$0xff] %v7854_v42  ;;  %6846 = vmatprep.subr.bf16.mxu0 %v7854_v42 }
  0xe8   : > { %v1335_v45 = vpop.permute.xlu0 %1334  ;;  %v1343_v53 = vmul.f32 %v1340_v44, %v1331_v47  ;;  %v5432_v44 = vld [vmem:[%s9493_s11 + $0x268] sm:$0xff]  ;;  %6848 = vmatpush3.bf16.msra.mxu0 %v7854_v42 }
  0xe9   : > { %v1342_v46 = vmul.f32 %v1335_v45, %v1330_v41  ;;  %v942_v41 = vld [vmem:[%s7747_s1 + $0x70] sm:$0xff]  ;;  %7459 = vpow2.f32 %v5265_v38 }
  0xeb   : > { %1186 = vrot.lane.b32.xlu0 %v1121_v43, %s9500_s19  ;;  %1346 = vrot.lane.b32.xlu1 %v1342_v46, %s9500_s19  ;;  %v978_v49 = vpop.permute.xlu1 %977  ;;  %v5431_v43 = vld [vmem:[%s9493_s11 + $0x260] sm:$0xff] }
  0xec   : > { %v973_v51 = vpop.permute.xlu0 %972  ;;  %v1123_v61 = vmul.f32 %v978_v49, %v931_v55  ;;  %v7863_v45 = vpack.c.bf16 %v5432_v44, %v5431_v43  ;;  %v943_v49 = vld [vmem:[%s7747_s1 + $0x78] sm:$0xff]  ;;  %v5433_v55 = vld [vmem:[%s9493_s11 + $0x270] sm:$0xff] }
  0xed   : > { %v1122_v54 = vmul.f32 %v973_v51, %v930_v48  ;;  %v5266_v48 = vmul.f32 -1.442695, %v1355_v39  ;;  %v955_v39 = vld [vmem:[%s7747_s1 + $0xd8] sm:$0xff] }
  0xee   : > { %9545 = vst [vmem:[#allocation15_spill] sm:$0xff] %v7863_v45  ;;  %6850 = vmatprep.subr.bf16.mxu0 %v7863_v45 }
  0xef   : > { %1348 = vrot.lane.b32.xlu1 %v1343_v53, %s9500_s19  ;;  %1188 = vrot.lane.b32.xlu0 %v1122_v54, %s9500_s19  ;;  %v988_v58 = vpop.permute.xlu1 %987  ;;  %7461 = vpow2.f32 %v5266_v48  ;;  %v957_v48 = vld [vmem:[%s7747_s1 + $0xe8] sm:$0xff] }
  0xf0   : > { %v983_v59 = vpop.permute.xlu0 %982  ;;  %v1125_v7 = vmul.f32 %v988_v58, %v933_v0  ;;  %6852 = vmatpush3.bf16.msra.mxu0 %v7863_v45  ;;  %v5474_v45 = vld [vmem:[%s9493_s11 + $0x3b8] sm:$0xff] }
  0xf1   : > { %v1124_v62 = vmul.f32 %v983_v59, %v932_v56  ;;  %v945_v56 = vld [vmem:[%s7747_s1 + $0x88] sm:$0xff]  ;;  %v5434_v59 = vld [vmem:[%s9493_s11 + $0x278] sm:$0xff] }
  0xf2   : > { %v7886_v63 = vpack.c.bf16 %v5434_v59, %v5433_v55  ;;  %v959_v59 = vld [vmem:[%s7747_s1 + $0xf8] sm:$0xff] }
  0xf3   : > { %1190 = vrot.lane.b32.xlu1 %v1123_v61, %s9500_s19  ;;  %1192 = vrot.lane.b32.xlu0 %v1124_v62, %s9500_s19  ;;  %v998_v2 = vpop.permute.xlu1 %997  ;;  %v946_v61 = vld [vmem:[%s7747_s1 + $0x90] sm:$0xff]  ;;  %v1857_v62 = vld [vmem:[%s9493_s11] sm:$0xff] }
  0xf4   : > { %v993_v4 = vpop.permute.xlu0 %992  ;;  %v1127_v15 = vmul.f32 %v998_v2, %v935_v10  ;;  %9546 = vst [vmem:[#allocation16_spill] sm:$0xff] %v7886_v63  ;;  %v1858_v2 = vld [vmem:[%s9493_s11 + $0x8] sm:$0xff]  ;;  %6854 = vmatprep.subr.bf16.mxu0 %v7886_v63 }
  0xf5   : > { %v1126_v8 = vmul.f32 %v993_v4, %v934_v1  ;;  %v5435_v4 = vld [vmem:[%s9493_s11 + $0x280] sm:$0xff]  ;;  %6856 = vmatpush3.bf16.msra.mxu0 %v7886_v63  ;;  %v5473_v63 = vld [vmem:[%s9493_s11 + $0x3b0] sm:$0xff] }
  0xf6   : > { %v7901_v10 = vpack.c.bf16 %v5436_v5, %v5435_v4 }
  0xf7   : > { %1194 = vrot.lane.b32.xlu1 %v1125_v7, %s9500_s19  ;;  %1196 = vrot.lane.b32.xlu0 %v1126_v8, %s9500_s19  ;;  %v1008_v12 = vpop.permute.xlu1 %1007  ;;  %v7899_v8 = vpack.c.bf16 %v1858_v2, %v1857_v62  ;;  %v1424_v62 = vld [vmem:[%s7946_s23] sm:$0xff]  ;;  %v1435_v2 = vstv %s7936_s18  ;;  %s7985_s18 = sld [smem:[#allocation6 + $0x3]] }
  0xf8   : > { %v1003_v13 = vpop.permute.xlu0 %1002  ;;  %v1129_v23 = vmul.f32 %v1008_v12, %v937_v18  ;;  %v948_v12 = vld [vmem:[%s7747_s1 + $0xa0] sm:$0xff]  ;;  %6858 = vmatprep.subr.bf16.mxu0 %v7901_v10 }
  0xf9   : > { %v1128_v16 = vmul.f32 %v1003_v13, %v936_v11  ;;  %v7460_v13 = vpop.eup %7459  ;;  %6730 = vmatprep.subr.bf16.mxu1 %v7899_v8 }
  0xfa   : > { %v7462_v18 = vpop.eup %7461  ;;  %v1362_v22 = vadd.f32 1.0, %v7460_v13  ;;  %v1425_v13 = vld [vmem:[%s7946_s23 + $0x8] sm:$0xff]  ;;  %s8007_s23 = sld [smem:[#allocation6 + $0x4]] }
  0xfb   : > { %1198 = vrot.lane.b32.xlu1 %v1127_v15, %s9500_s19  ;;  %1200 = vrot.lane.b32.xlu0 %v1128_v16, %s9500_s19  ;;  %v1018_v19 = vpop.permute.xlu1 %1017  ;;  %v949_v16 = vld [vmem:[%s7747_s1 + $0xa8] sm:$0xff] }
  0xfc   : > { %v1131_v33 = vmul.f32 %v1018_v19, %v939_v26  ;;  %7463 = vrcp.f32 %v1362_v22  ;;  %v1410_v22 = vld [vmem:[%s7963_s29 + $0x8] sm:$0xff] }
  0xfd   : > { %v1013_v24 = vpop.permute.xlu0 %1012 }
  0xfe   : > { %v1130_v27 = vmul.f32 %v1013_v24, %v938_v20  ;;  %v950_v20 = vld [vmem:[%s7747_s1 + $0xb0] sm:$0xff] }
  0xff   : > { %1202 = vrot.lane.b32.xlu1 %v1129_v23, %s9500_s19  ;;  %v1028_v29 = vpop.permute.xlu1 %1027 }
 0x100   : > { %1204 = vrot.lane.b32.xlu0 %v1130_v27, %s9500_s19  ;;  %v1133_v46 = vmul.f32 %v1028_v29, %v941_v36  ;;  %v1363_v27 = vadd.f32 1.0, %v7462_v18  ;;  %v954_v36 = vld [vmem:[%s7747_s1 + $0xd0] sm:$0xff] }
 0x101   : > { %v1023_v34 = vpop.permute.xlu0 %1022 }
 0x102   : > { %v1132_v37 = vmul.f32 %v1023_v34, %v940_v30  ;;  %v952_v30 = vld [vmem:[%s7747_s1 + $0xc0] sm:$0xff]  ;;  %7465 = vrcp.f32 %v1363_v27 }
 0x103   : > { %1206 = vrot.lane.b32.xlu1 %v1131_v33, %s9500_s19  ;;  %v1038_v40 = vpop.permute.xlu1 %1037  ;;  %v953_v33 = vld [vmem:[%s7747_s1 + $0xc8] sm:$0xff] }
 0x104   : > { %1208 = vrot.lane.b32.xlu0 %v1132_v37, %s9500_s19  ;;  %v1135_v53 = vmul.f32 %v1038_v40, %v943_v49 }
 0x105   : > { %v1033_v47 = vpop.permute.xlu0 %1032 }
 0x106   : > { %v1134_v50 = vmul.f32 %v1033_v47, %v942_v41  ;;  %v956_v41 = vld [vmem:[%s7747_s1 + $0xe0] sm:$0xff]  ;;  %v7464_v43 = vpop.eup %7463 }
 0x107   : > { %1210 = vrot.lane.b32.xlu1 %v1133_v46, %s9500_s19  ;;  %v1048_v51 = vpop.permute.xlu1 %1047 }
 0x108   : > { %1212 = vrot.lane.b32.xlu0 %v1134_v50, %s9500_s19  ;;  %v1137_v0 = vmul.f32 %v1048_v51, %v945_v56  ;;  %v7547_v50 = vmov 0.0  }
 0x109   : > { %v1043_v54 = vpop.permute.xlu0 %1042  ;;  %636 = vst [vmem:[#allocation2] sm:$0x1] %v7547_v50  ;;  %637 = vst [vmem:[#allocation2 + $0x18] sm:$0x1] %v7547_v50 }
 0x10a   : > { %v1136_v58 = vmul.f32 %v1043_v54, %v944_v52  ;;  %638 = vst [vmem:[#allocation2 + $0x30] sm:$0x1] %v7547_v50  ;;  %639 = vst [vmem:[#allocation2 + $0x48] sm:$0x1] %v7547_v50  ;;  %v1368_v52 = vsub.f32 1.0, %v7464_v43  ;;  %v958_v54 = vld [vmem:[%s7747_s1 + $0xf0] sm:$0xff] }
 0x10b   : > { %1214 = vrot.lane.b32.xlu1 %v1135_v53, %s9500_s19  ;;  %v1058_v60 = vpop.permute.xlu1 %1057  ;;  %640 = vst [vmem:[#allocation2 + $0x60] sm:$0x1] %v7547_v50  ;;  %641 = vst [vmem:[#allocation2 + $0x78] sm:$0x1] %v7547_v50  ;;  %s5276_s1 = sld [smem:[#allocation4 + $0x2]] }
 0x10c   : > { %1216 = vrot.lane.b32.xlu0 %v1136_v58, %s9500_s19  ;;  %v1139_v14 = vmul.f32 %v1058_v60, %v947_v6  ;;  %642 = vst [vmem:[#allocation2 + $0x90] sm:$0x1] %v7547_v50  ;;  %643 = vst [vmem:[#allocation2 + $0xa8] sm:$0x1] %v7547_v50  ;;  %v7466_v51 = vpop.eup %7465  ;;  %v1400_v6 = vld [vmem:[%s7960_s17] sm:$0xff] }
 0x10d   : > { %v1053_v1 = vpop.permute.xlu0 %1052  ;;  %644 = vst [vmem:[#allocation2 + $0xc0] sm:$0x1] %v7547_v50  ;;  %645 = vst [vmem:[#allocation2 + $0xd8] sm:$0x1] %v7547_v50  ;;  %v1369_v56 = vsub.f32 1.0, %v7466_v51  ;;  %v1472_v51 = vld [vmem:[%s8002_s5 + $0x8] sm:$0xff] }
 0x10e   : > { %v1138_v7 = vmul.f32 %v1053_v1, %v946_v61  ;;  %646 = vst [vmem:[#allocation2 + $0xf0] sm:$0x1] %v7547_v50  ;;  %647 = vst [vmem:[#allocation2 + $0x108] sm:$0x1] %v7547_v50  ;;  %v1433_v1 = vld [vmem:[%s7949_s24] sm:$0xff] }
 0x10f   : > { %1218 = vrot.lane.b32.xlu1 %v1137_v0, %s9500_s19  ;;  %v1068_v11 = vpop.permute.xlu1 %1067  ;;  %648 = vst [vmem:[#allocation2 + $0x120] sm:$0x1] %v7547_v50  ;;  %649 = vst [vmem:[#allocation2 + $0x138] sm:$0x1] %v7547_v50  ;;  %v1426_v0 = vstv %s7934_s28  ;;  %v1436_v5 = vmul.f32 %v1435_v2, %v1433_v1  ;;  %v5438_v1 = vld [vmem:[%s9493_s11 + $0x298] sm:$0xff] }
 0x110   : > { %1220 = vrot.lane.b32.xlu0 %v1138_v7, %s9500_s19  ;;  %v1141_v23 = vmul.f32 %v1068_v11, %v949_v16  ;;  %650 = vst [vmem:[#allocation2 + $0x150] sm:$0x1] %v7547_v50  ;;  %651 = vst [vmem:[#allocation2 + $0x168] sm:$0x1] %v7547_v50  ;;  %v1427_v4 = vmul.f32 %v1426_v0, %v1424_v62  ;;  %v1409_v7 = vld [vmem:[%s7963_s29] sm:$0xff]  ;;  %v1402_v11 = vstv %s7955_s20  ;;  %s5286_s20 = sshll.u32 %s7965_s2, 4 }
 0x111   : > { %v1063_v15 = vpop.permute.xlu0 %1062  ;;  %652 = vst [vmem:[#allocation2 + $0x180] sm:$0x1] %v7547_v50  ;;  %653 = vst [vmem:[#allocation2 + $0x198] sm:$0x1] %v7547_v50  ;;  %s5277_s27 = sshll.u32 %s5276_s1, 4  ;;  %s7992_s1 = sld [smem:[#allocation7 + $0x3]]  ;;  %v1403_v16 = vmul.f32 %v1402_v11, %v1400_v6  ;;  %v1428_v18 = vmul.f32 %v1426_v0, %v1425_v13 }
 0x112   : > { %v1140_v17 = vmul.f32 %v1063_v15, %v948_v12  ;;  %654 = vst [vmem:[#allocation2 + $0x11] sm:$0x1] %v7547_v50  ;;  %655 = vst [vmem:[#allocation2 + $0x29] sm:$0x1] %v7547_v50  ;;  %s7980_s7 = scalar_lea.vmem %s7943_s22, %s5277_s27  ;;  %v1411_v12 = vstv %s7957_s0  ;;  %v1438_v15 = vadd.f32 %v1436_v5, %v1427_v4  ;;  %s5289_s0 = sshll.u32 %s7975_s6, 4  ;;  %v5437_v0 = vld [vmem:[%s9493_s11 + $0x290] sm:$0xff] }
 0x113   : > { %1222 = vrot.lane.b32.xlu1 %v1139_v14, %s9500_s19  ;;  %v1078_v19 = vpop.permute.xlu1 %1077  ;;  %656 = vst [vmem:[#allocation2 + $0x41] sm:$0x1] %v7547_v50  ;;  %657 = vst [vmem:[#allocation2 + $0x59] sm:$0x1] %v7547_v50  ;;  %v1434_v14 = vld [vmem:[%s7949_s24 + $0x8] sm:$0xff]  ;;  %s8009_s24 = sld [smem:[#allocation7 + $0x4]]  ;;  %s8019_s2 = scalar_lea.vmem %s7943_s22, %s5286_s20 }
 0x114   : > { %1224 = vrot.lane.b32.xlu0 %v1140_v17, %s9500_s19  ;;  %v1143_v31 = vmul.f32 %v1078_v19, %v951_v25  ;;  %658 = vst [vmem:[#allocation2 + $0x71] sm:$0x1] %v7547_v50  ;;  %659 = vst [vmem:[#allocation2 + $0x89] sm:$0x1] %v7547_v50  ;;  %v1412_v17 = vmul.f32 %v1411_v12, %v1409_v7  ;;  %v1437_v19 = vmul.f32 %v1435_v2, %v1434_v14  ;;  %s8023_s6 = sld [smem:[#allocation6 + $0x5]]  ;;  %s8031_s29 = scalar_lea.vmem %s7943_s22, %s5289_s0 }
 0x115   : > { %v1073_v24 = vpop.permute.xlu0 %1072  ;;  %660 = vst [vmem:[#allocation2 + $0xa1] sm:$0x1] %v7547_v50  ;;  %661 = vst [vmem:[#allocation2 + $0xb9] sm:$0x1] %v7547_v50  ;;  %s8069_s0 = sld [smem:[#allocation4 + $0x8]]  ;;  %v1496_v7 = vld [vmem:[%s8031_s29 + $0x8] sm:$0xff] }
 0x116   : > { %v1142_v26 = vmul.f32 %v1073_v24, %v950_v20  ;;  %662 = vst [vmem:[#allocation2 + $0xd1] sm:$0x1] %v7547_v50  ;;  %663 = vst [vmem:[#allocation2 + $0xe9] sm:$0x1] %v7547_v50  ;;  %v1401_v20 = vld [vmem:[%s7960_s17 + $0x8] sm:$0xff]  ;;  %v1449_v24 = vstv %s7971_s26  ;;  %s8025_s17 = sld [smem:[#allocation7 + $0x5]] }
 0x117   : > { %1226 = vrot.lane.b32.xlu1 %v1141_v23, %s9500_s19  ;;  %v1088_v29 = vpop.permute.xlu1 %1087  ;;  %664 = vst [vmem:[#allocation2 + $0x101] sm:$0x1] %v7547_v50  ;;  %665 = vst [vmem:[#allocation2 + $0x119] sm:$0x1] %v7547_v50  ;;  %v1447_v23 = vld [vmem:[%s7980_s7] sm:$0xff]  ;;  %s8033_s26 = sld [smem:[#allocation5 + $0x6]] }
 0x118   : > { %1228 = vrot.lane.b32.xlu0 %v1142_v26, %s9500_s19  ;;  %v1145_v37 = vmul.f32 %v1088_v29, %v953_v33  ;;  %666 = vst [vmem:[#allocation2 + $0x131] sm:$0x1] %v7547_v50  ;;  %667 = vst [vmem:[#allocation2 + $0x149] sm:$0x1] %v7547_v50  ;;  %v1458_v26 = vstv %s7973_s25  ;;  %v1404_v29 = vmul.f32 %v1402_v11, %v1401_v20 }
 0x119   : > { %v1083_v32 = vpop.permute.xlu0 %1082  ;;  %668 = vst [vmem:[#allocation2 + $0x161] sm:$0x1] %v7547_v50  ;;  %669 = vst [vmem:[#allocation2 + $0x179] sm:$0x1] %v7547_v50  ;;  %v1450_v33 = vmul.f32 %v1449_v24, %v1447_v23 }
 0x11a   : > { %v1144_v34 = vmul.f32 %v1083_v32, %v952_v30  ;;  %670 = vst [vmem:[#allocation2 + $0x191] sm:$0x1] %v7547_v50  ;;  %671 = vst [vmem:[#allocation2 + $0x1a9] sm:$0x1] %v7547_v50  ;;  %v1413_v30 = vmul.f32 %v1411_v12, %v1410_v22  ;;  %v1439_v32 = vadd.f32 %v1437_v19, %v1428_v18  ;;  %v1521_v13 = vstv %s8023_s6  ;;  %v1859_v18 = vld [vmem:[%s9493_s11 + $0x10] sm:$0xff]  ;;  %s8115_s6 = sld [smem:[#allocation5 + $0x9]] }
 0x11b   : > { %1230 = vrot.lane.b32.xlu1 %v1143_v31, %s9500_s19  ;;  %v1098_v35 = vpop.permute.xlu1 %1097  ;;  %v1414_v31 = vadd.f32 %v1412_v17, %v1403_v16  ;;  %v8106_v19 = vpack.c.bf16 %v5438_v1, %v5437_v0  ;;  %v1863_v1 = vld [vmem:[%s9493_s11 + $0x30] sm:$0xff] }
 0x11c   : > { %1232 = vrot.lane.b32.xlu0 %v1144_v34, %s9500_s19  ;;  %v1147_v44 = vmul.f32 %v1098_v35, %v955_v39  ;;  %v1448_v35 = vld [vmem:[%s7980_s7 + $0x8] sm:$0xff]  ;;  %v1480_v39 = vld [vmem:[%s8019_s2] sm:$0xff]  ;;  %s8048_s7 = sld [smem:[#allocation6 + $0x6]] }
 0x11d   : > { %v1093_v38 = vpop.permute.xlu0 %1092 }
 0x11e   : > { %v1146_v40 = vmul.f32 %v1093_v38, %v954_v36  ;;  %v1473_v38 = vstv %s7985_s18 }
 0x11f   : > { %1234 = vrot.lane.b32.xlu1 %v1145_v37, %s9500_s19  ;;  %v1108_v46 = vpop.permute.xlu1 %1107  ;;  %v1471_v37 = vld [vmem:[%s8002_s5] sm:$0xff]  ;;  %s8098_s5 = sld [smem:[#allocation7 + $0x7]] }
 0x120   : > { %1236 = vrot.lane.b32.xlu0 %v1146_v40, %s9500_s19  ;;  %v1149_v53 = vmul.f32 %v1108_v46, %v957_v48  ;;  %v1482_v40 = vstv %s7992_s1  ;;  %v1451_v46 = vmul.f32 %v1449_v24, %v1448_v35  ;;  %s8059_s1 = sld [smem:[#allocation5 + $0x7]] }
 0x121   : > { %v1103_v47 = vpop.permute.xlu0 %1102  ;;  %v1483_v50 = vmul.f32 %v1482_v40, %v1480_v39 }
 0x122   : > { %v1148_v49 = vmul.f32 %v1103_v47, %v956_v41  ;;  %v1545_v35 = vstv %s8048_s7  ;;  %s8220_s7 = sld [smem:[#allocation6 + $0xa]] }
 0x123   : > { %1238 = vrot.lane.b32.xlu1 %v1147_v44, %s9500_s19  ;;  %v1113_v55 = vpop.permute.xlu1 %1112  ;;  %v1415_v44 = vadd.f32 %v1413_v30, %v1404_v29 }
 0x124   : > { %1240 = vrot.lane.b32.xlu0 %v1148_v49, %s9500_s19  ;;  %v1150_v58 = vmul.f32 %v1113_v55, %v958_v54  ;;  %v1474_v49 = vmul.f32 %v1473_v38, %v1471_v37  ;;  %v1497_v54 = vstv %s8007_s23  ;;  %s5307_s23 = sshll.u32 %s8044_s16, 4 }
 0x125   : > { %v1118_v60 = vpop.permute.xlu0 %1117  ;;  %v1499_v23 = vmul.f32 %v1497_v54, %v1496_v7  ;;  %v1578_v0 = vstv %s8098_s5 }
 0x126   : > { %v1151_v61 = vmul.f32 %v1118_v60, %v959_v59  ;;  %v1475_v60 = vmul.f32 %v1473_v38, %v1472_v51  ;;  %v1485_v4 = vadd.f32 %v1483_v50, %v1474_v49 }
 0x127   : > { %1242 = vrot.lane.b32.xlu1 %v1149_v53, %s9500_s19  ;;  %v1495_v53 = vld [vmem:[%s8031_s29] sm:$0xff] }
 0x128   : > { %1374 = vperm.xlu0 %7321, %v1368_v52   ;;  %v1481_v52 = vld [vmem:[%s8019_s2 + $0x8] sm:$0xff]  ;;  %v1498_v5 = vmul.f32 %v1497_v54, %v1495_v53  ;;  %s5304_s2 = sshll.u32 %s8033_s26, 4  ;;  %s8168_s26 = sld [smem:[#allocation5 + $0xa]] }
 0x129   : > { %s8113_s16 = scalar_lea.vmem %s7943_s22, %s5304_s2  ;;  %s5313_s2 = sshll.u32 %s8069_s0, 4 }
 0x12a   : > { %v1552_v39 = vld [vmem:[%s8113_s16] sm:$0xff]  ;;  %s8188_s0 = sld [smem:[#allocation4 + $0xb]] }
 0x12b   : > { %1379 = vperm.xlu1 %7322, %v1369_v56   ;;  %v1506_v56 = vstv %s8009_s24  ;;  %s8101_s24 = sld [smem:[#allocation4 + $0x9]] }
 0x12c   : > { %1244 = vrot.lane.b32.xlu0 %v1150_v58, %s9500_s19 }
 0x12f   : > { %1246 = vrot.lane.b32.xlu1 %v1151_v61, %s9500_s19  ;;  %s7951_s19 = sld [smem:[#allocation5 + $0x2]]  ;;  %v1484_v61 = vmul.f32 %v1482_v40, %v1481_v52 }
 0x131   : > { %v1486_v20 = vadd.f32 %v1484_v61, %v1475_v60 }
 0x135   : > { %s5280_s28 = sshll.u32 %s7951_s19, 4  ;;  %s7999_s19 = sld [smem:[#allocation5 + $0x5]] }
 0x136   : > { %s7997_s27 = scalar_lea.vmem %s7943_s22, %s5280_s28  ;;  %s5292_s28 = sshll.u32 %s7977_s4, 4 }
 0x137   : > { %v1456_v25 = vld [vmem:[%s7997_s27] sm:$0xff]  ;;  %v1457_v36 = vld [vmem:[%s7997_s27 + $0x8] sm:$0xff]  ;;  %s8040_s25 = scalar_lea.vmem %s7943_s22, %s5292_s28  ;;  %s5295_s4 = sshll.u32 %s7994_s10, 4 }
 0x138   : > { %v1459_v34 = vmul.f32 %v1458_v26, %v1456_v25  ;;  %s8050_s10 = sld [smem:[#allocation7 + $0x6]]  ;;  %v1460_v48 = vmul.f32 %v1458_v26, %v1457_v36  ;;  %s8057_s18 = scalar_lea.vmem %s7943_s22, %s5295_s4  ;;  %v1504_v55 = vld [vmem:[%s8040_s25] sm:$0xff]  ;;  %v1505_v11 = vld [vmem:[%s8040_s25 + $0x8] sm:$0xff]  ;;  %v1860_v26 = vld [vmem:[%s9493_s11 + $0x18] sm:$0xff] }
 0x139   : > { %s8071_s28 = sld [smem:[#allocation5 + $0x8]]  ;;  %v1507_v6 = vmul.f32 %v1506_v56, %v1504_v55  ;;  %s8088_s4 = sld [smem:[#allocation6 + $0x7]]  ;;  %v1519_v12 = vld [vmem:[%s8057_s18] sm:$0xff]  ;;  %v1508_v24 = vmul.f32 %v1506_v56, %v1505_v11  ;;  %v1553_v55 = vld [vmem:[%s8113_s16 + $0x8] sm:$0xff]  ;;  %v5441_v11 = vld [vmem:[%s9493_s11 + $0x2b0] sm:$0xff] }
 0x13a   : > { %v1461_v47 = vadd.f32 %v1459_v34, %v1450_v33  ;;  %v1462_v2 = vadd.f32 %v1460_v48, %v1451_v46  ;;  %v1522_v29 = vmul.f32 %v1521_v13, %v1519_v12  ;;  %v1520_v33 = vld [vmem:[%s8057_s18 + $0x8] sm:$0xff]  ;;  %s8136_s25 = scalar_lea.vmem %s7943_s22, %s5307_s23  ;;  %v5442_v12 = vld [vmem:[%s9493_s11 + $0x2b8] sm:$0xff] }
 0x13b   : > { %s5298_s20 = sshll.u32 %s7999_s19, 4  ;;  %s5301_s19 = sshll.u32 %s8016_s8, 4  ;;  %v1523_v50 = vmul.f32 %v1521_v13, %v1520_v33  ;;  %v1568_v7 = vld [vmem:[%s8136_s25 + $0x8] sm:$0xff] }
 0x13c   : > { %s8066_s27 = scalar_lea.vmem %s7943_s22, %s5298_s20  ;;  %s8096_s20 = scalar_lea.vmem %s7943_s22, %s5301_s19 }
 0x13d   : > { %v1528_v14 = vld [vmem:[%s8066_s27] sm:$0xff]  ;;  %s5310_s19 = sshll.u32 %s8059_s1, 4  ;;  %s8123_s8 = sld [smem:[#allocation6 + $0x8]]  ;;  %v1529_v34 = vld [vmem:[%s8066_s27 + $0x8] sm:$0xff] }
 0x13e   : > { %s8138_s1 = sld [smem:[#allocation7 + $0x8]]  ;;  %v1543_v38 = vld [vmem:[%s8096_s20] sm:$0xff]  ;;  %v1554_v40 = vstv %s8050_s10  ;;  %s8155_s23 = scalar_lea.vmem %s7943_s22, %s5310_s19  ;;  %v1544_v54 = vld [vmem:[%s8096_s20 + $0x8] sm:$0xff] }
 0x13f   : > { %s5316_s29 = sshll.u32 %s8071_s28, 4  ;;  %s8157_s10 = sld [smem:[#allocation4 + $0xa]]  ;;  %v1546_v52 = vmul.f32 %v1545_v35, %v1543_v38  ;;  %v1555_v53 = vmul.f32 %v1554_v40, %v1552_v39  ;;  %v1569_v60 = vstv %s8088_s4  ;;  %v1576_v61 = vld [vmem:[%s8155_s23] sm:$0xff] }
 0x140   : > { %s8166_s19 = sld [smem:[#allocation6 + $0x9]]  ;;  %s8179_s18 = scalar_lea.vmem %s7943_s22, %s5316_s29 }
 0x141   : > { %s8186_s27 = sld [smem:[#allocation7 + $0x9]]  ;;  %s5319_s4 = sshll.u32 %s8101_s24, 4  ;;  %v1557_v13 = vadd.f32 %v1555_v53, %v1546_v52  ;;  %v1867_v52 = vld [vmem:[%s9493_s11 + $0x50] sm:$0xff]  ;;  %v1868_v53 = vld [vmem:[%s9493_s11 + $0x58] sm:$0xff] }
 0x142   : > { %s5322_s20 = sshll.u32 %s8115_s6, 4  ;;  %s8211_s28 = sld [smem:[#allocation5 + $0xb]] }
 0x143   : > { %s8232_s5 = scalar_lea.vmem %s7943_s22, %s5319_s4  ;;  %s8237_s16 = scalar_lea.vmem %s7943_s22, %s5322_s20 }
 0x144   : > { %s5328_s20 = sshll.u32 %s8168_s26, 4  ;;  %s8269_s26 = sld [smem:[#allocation6 + $0xb]] }
 0x145   : > { %s5331_s29 = sshll.u32 %s8188_s0, 4  ;;  %s8291_s24 = sld [smem:[#allocation4 + $0xd]] }
 0x159   : > { %v1185_v27 = vpop.permute.xlu0 %1184 }
 0x15a   : > { %1282 = vst.msk [vmem:[#allocation2 + $0x19] sm:$0xff] %vm1281_vm0, %v1185_v27  ;;  %v1509_v27 = vadd.f32 %v1507_v6, %v1498_v5  ;;  %v1547_v5 = vmul.f32 %v1545_v35, %v1544_v54  ;;  %v1556_v6 = vmul.f32 %v1554_v40, %v1553_v55  ;;  %v5443_v35 = vld [vmem:[%s9493_s11 + $0x2c0] sm:$0xff] }
 0x15b   : > { %1440 = vst.msk [vmem:[#allocation2 + $0x19] sm:$0xff] %vm1416_vm1, %v1438_v15  ;;  %v1530_v15 = vstv %s8025_s17  ;;  %s8176_s17 = scalar_lea.vmem %s7943_s22, %s5313_s2  ;;  %s8259_s2 = sld [smem:[#allocation5 + $0xc]] }
 0x15c   : > { %v1531_v30 = vmul.f32 %v1530_v15, %v1528_v14  ;;  %v1532_v51 = vmul.f32 %v1530_v15, %v1529_v34  ;;  %v1579_v15 = vmul.f32 %v1578_v0, %v1576_v61  ;;  %v1592_v34 = vld [vmem:[%s8176_s17 + $0x8] sm:$0xff] }
 0x15d   : > { %v1347_v41 = vpop.permute.xlu1 %1346  ;;  %v1187_v43 = vpop.permute.xlu0 %1186 }
 0x15e   : > { %1352 = vst.msk [vmem:[#allocation2 + $0x1] sm:$0xff] %vm1281_vm0, %v1347_v41  ;;  %1283 = vst.msk [vmem:[#allocation2 + $0x21] sm:$0xff] %vm1281_vm0, %v1187_v43  ;;  %v8146_v41 = vpack.c.bf16 %v1860_v26, %v1859_v18  ;;  %v1861_v43 = vld [vmem:[%s9493_s11 + $0x20] sm:$0xff]  ;;  %v1533_v49 = vadd.f32 %v1531_v30, %v1522_v29  ;;  %v1866_v30 = vld [vmem:[%s9493_s11 + $0x48] sm:$0xff] }
 0x15f   : > { %1417 = vst.msk [vmem:[#allocation2 + $0x1] sm:$0xff] %vm1416_vm1, %v1414_v31  ;;  %1441 = vst.msk [vmem:[#allocation2 + $0x21] sm:$0xff] %vm1416_vm1, %v1439_v32  ;;  %v5439_v31 = vld [vmem:[%s9493_s11 + $0x2a0] sm:$0xff]  ;;  %v5440_v32 = vld [vmem:[%s9493_s11 + $0x2a8] sm:$0xff] }
 0x160   : > { %v8162_v48 = vpack.c.bf16 %v5440_v32, %v5439_v31  ;;  %v1865_v29 = vld [vmem:[%s9493_s11 + $0x40] sm:$0xff]  ;;  %v1558_v31 = vadd.f32 %v1556_v6, %v1547_v5  ;;  %v1571_v32 = vmul.f32 %v1569_v60, %v1568_v7  ;;  %v1641_v5 = vstv %s8220_s7  ;;  %s8428_s7 = sld [smem:[#allocation6 + $0xe]] }
 0x161   : > { %v1349_v58 = vpop.permute.xlu1 %1348  ;;  %v1189_v59 = vpop.permute.xlu0 %1188 }
 0x162   : > { %1353 = vst.msk [vmem:[#allocation2 + $0x9] sm:$0xff] %vm1281_vm0, %v1349_v58  ;;  %1284 = vst.msk [vmem:[#allocation2 + $0x31] sm:$0xff] %vm1281_vm0, %v1189_v59  ;;  %v8075_v62 = vld [vmem:[#allocation2 + $0x19] sm:$0xff] }
 0x163   : > { %1418 = vst.msk [vmem:[#allocation2 + $0x9] sm:$0xff] %vm1416_vm1, %v1415_v44  ;;  %1464 = vst.msk [vmem:[#allocation2 + $0x31] sm:$0xff] %vm1416_vm1, %v1461_v47  ;;  %6329 = vmatprep.mubr.f32.mxu0 %v8075_v62  ;;  %v1510_v44 = vadd.f32 %v1508_v24, %v1499_v23  ;;  %v1862_v47 = vld [vmem:[%s9493_s11 + $0x28] sm:$0xff]  ;;  %v1567_v59 = vld [vmem:[%s8136_s25] sm:$0xff]  ;;  %s8222_s25 = sld [smem:[#allocation7 + $0xa]]  ;;  %v1602_v23 = vstv %s8138_s1  ;;  %s8305_s1 = sld [smem:[#allocation5 + $0xd]] }
 0x164   : > { %v1570_v14 = vmul.f32 %v1569_v60, %v1567_v59  ;;  %v5446_v59 = vld [vmem:[%s9493_s11 + $0x2d8] sm:$0xff] }
 0x165   : > { %v1191_v16 = vpop.permute.xlu1 %1190  ;;  %v1193_v17 = vpop.permute.xlu0 %1192 }
 0x166   : > { %1285 = vst.msk [vmem:[#allocation2 + $0x39] sm:$0xff] %vm1281_vm0, %v1191_v16  ;;  %1286 = vst.msk [vmem:[#allocation2 + $0x49] sm:$0xff] %vm1281_vm0, %v1193_v17  ;;  %v1873_v22 = vld [vmem:[#allocation2 + $0x1] sm:$0xff] }
 0x167   : > { %v8110_v25 = vld [vmem:[#allocation2 + $0x21] sm:$0xff]  ;;  %1465 = vst.msk [vmem:[#allocation2 + $0x39] sm:$0xff] %vm1416_vm1, %v1462_v2  ;;  %1488 = vst.msk [vmem:[#allocation2 + $0x49] sm:$0xff] %vm1416_vm1, %v1485_v4  ;;  %6009 = vmatprep.mubr.f32.mxu1 %v1873_v22  ;;  %v1864_v2 = vld [vmem:[%s9493_s11 + $0x38] sm:$0xff]  ;;  %v1534_v4 = vadd.f32 %v1532_v51, %v1523_v50 }
 0x168   : > { %6330 = vmatmul.mubr.f32.vlgmr.msra.gmra.mrb[0].mxu0 %v8110_v25  ;;  %v1577_v17 = vld [vmem:[%s8155_s23 + $0x8] sm:$0xff]  ;;  %v1600_v22 = vld [vmem:[%s8179_s18] sm:$0xff]  ;;  %v8240_v24 = vpack.c.bf16 %v1864_v2, %v1863_v1  ;;  %s8244_s23 = sld [smem:[#allocation4 + $0xc]] }
 0x169   : > { %6860 = vmatpush3.bf16.msra.mxu0 %v7901_v10  ;;  %v1195_v36 = vpop.permute.xlu1 %1194  ;;  %v1197_v37 = vpop.permute.xlu0 %1196  ;;  %v1580_v33 = vmul.f32 %v1578_v0, %v1577_v17  ;;  %v1603_v39 = vmul.f32 %v1602_v23, %v1600_v22  ;;  %v1650_v7 = vstv %s8222_s25  ;;  %v5448_v22 = vld [vmem:[%s9493_s11 + $0x2e8] sm:$0xff]  ;;  %s8430_s25 = sld [smem:[#allocation7 + $0xe]] }
 0x16a   : > { %6862 = vmatprep.subr.bf16.mxu0 %v8106_v19  ;;  %1287 = vst.msk [vmem:[#allocation2 + $0x51] sm:$0xff] %vm1281_vm0, %v1195_v36  ;;  %1288 = vst.msk [vmem:[#allocation2 + $0x61] sm:$0xff] %vm1281_vm0, %v1197_v37  ;;  %v1874_v10 = vld [vmem:[#allocation2 + $0x9] sm:$0xff]  ;;  %v1877_v46 = vld [vmem:[#allocation2 + $0x31] sm:$0xff]  ;;  %v1581_v37 = vadd.f32 %v1579_v15, %v1570_v14 }
 0x16b   : > { %1489 = vst.msk [vmem:[#allocation2 + $0x51] sm:$0xff] %vm1416_vm1, %v1486_v20  ;;  %1512 = vst.msk [vmem:[#allocation2 + $0x61] sm:$0xff] %vm1416_vm1, %v1509_v27  ;;  %6010 = vmatmul.mubr.f32.vlgmr.msra.gmra.mrb[0].mxu1 %v1874_v10  ;;  %6332 = vmatprep.mubr.f32.mxu0 %v1877_v46  ;;  %v1593_v20 = vstv %s8123_s8  ;;  %s5325_s8 = sshll.u32 %s8157_s10, 4  ;;  %v8247_v27 = vpack.c.bf16 %v5442_v12, %v5441_v11  ;;  %v5444_v36 = vld [vmem:[%s9493_s11 + $0x2c8] sm:$0xff]  ;;  %v1615_v10 = vld [vmem:[%s8232_s5] sm:$0xff]  ;;  %v1582_v54 = vadd.f32 %v1580_v33, %v1571_v32  ;;  %s8322_s10 = scalar_lea.vmem %s7943_s22, %s5331_s29 }
 0x16c   : > { %6012 = vmatprep.mubr.f32.mxu1 %v8075_v62  ;;  %6732 = vmatpush3.bf16.msra.mxu1 %v7899_v8  ;;  %v8192_v62 = vpack.c.bf16 %v1862_v47, %v1861_v43  ;;  %v1626_v47 = vstv %s8186_s27  ;;  %s8281_s4 = scalar_lea.vmem %s7943_s22, %s5325_s8  ;;  %v8294_v51 = vpack.c.bf16 %v5444_v36, %v5443_v35  ;;  %v1595_v55 = vmul.f32 %v1593_v20, %v1592_v34  ;;  %s8324_s27 = sld [smem:[#allocation6 + $0xc]]  ;;  %v1869_v15 = vld [vmem:[%s9493_s11 + $0x60] sm:$0xff] }
 0x16d   : > { %v1199_v56 = vpop.permute.xlu1 %1198  ;;  %v1201_v58 = vpop.permute.xlu0 %1200  ;;  %6734 = vmatprep.subr.bf16.mxu1 %v8146_v41  ;;  %6864 = vmatpush3.bf16.msra.mxu0 %v8106_v19  ;;  %v1591_v19 = vld [vmem:[%s8176_s17] sm:$0xff]  ;;  %s8271_s17 = sld [smem:[#allocation7 + $0xb]]  ;;  %s8330_s8 = sld [smem:[#allocation7 + $0xc]]  ;;  %v8336_v11 = vpack.c.bf16 %v1868_v53, %v1867_v52  ;;  %v1665_v32 = vstv %s8269_s26 }
 0x16e   : > { %1289 = vst.msk [vmem:[#allocation2 + $0x69] sm:$0xff] %vm1281_vm0, %v1199_v56  ;;  %1290 = vst.msk [vmem:[#allocation2 + $0x79] sm:$0xff] %vm1281_vm0, %v1201_v58  ;;  %v1878_v8 = vld [vmem:[#allocation2 + $0x39] sm:$0xff]  ;;  %6866 = vmatprep.subr.bf16.mxu0 %v8162_v48  ;;  %v1879_v16 = vld [vmem:[#allocation2 + $0x49] sm:$0xff]  ;;  %v1594_v38 = vmul.f32 %v1593_v20, %v1591_v19 }
 0x16f   : > { %1513 = vst.msk [vmem:[#allocation2 + $0x69] sm:$0xff] %vm1416_vm1, %v1510_v44  ;;  %1536 = vst.msk [vmem:[#allocation2 + $0x79] sm:$0xff] %vm1416_vm1, %v1533_v49  ;;  %6013 = vmatmul.mubr.f32.gmra.mrb[2].mxu1 %v8110_v25  ;;  %6333 = vmatmul.mubr.f32.gmra.mrb[2].mxu0 %v1878_v8  ;;  %v1617_v44 = vstv %s8166_s19  ;;  %v5445_v58 = vld [vmem:[%s9493_s11 + $0x2d0] sm:$0xff]  ;;  %v1639_v1 = vld [vmem:[%s8281_s4] sm:$0xff]  ;;  %s8374_s19 = sld [smem:[#allocation6 + $0xd]] }
 0x170   : > { %6015 = vmatprep.mubr.f32.mxu1 %v1877_v46  ;;  %6736 = vmatpush3.bf16.msra.mxu1 %v8146_v41  ;;  %v1601_v41 = vld [vmem:[%s8179_s18 + $0x8] sm:$0xff]  ;;  %v1624_v46 = vld [vmem:[%s8237_s16] sm:$0xff]  ;;  %s8289_s18 = scalar_lea.vmem %s7943_s22, %s5328_s20  ;;  %s5334_s20 = sshll.u32 %s8211_s28, 4  ;;  %v1605_v60 = vadd.f32 %v1603_v39, %v1594_v38  ;;  %v1618_v61 = vmul.f32 %v1617_v44, %v1615_v10  ;;  %v8346_v14 = vpack.c.bf16 %v5446_v59, %v5445_v58  ;;  %v1871_v39 = vld [vmem:[%s9493_s11 + $0x70] sm:$0xff] }
 0x171   : > { %v1203_v18 = vpop.permute.xlu1 %1202  ;;  %6738 = vmatprep.subr.bf16.mxu1 %v8192_v62  ;;  %6335 = vmatprep.mubr.f32.mxu0 %v1879_v16  ;;  %v1604_v56 = vmul.f32 %v1602_v23, %v1601_v41  ;;  %v1627_v0 = vmul.f32 %v1626_v47, %v1624_v46  ;;  %v1648_v6 = vld [vmem:[%s8289_s18] sm:$0xff]  ;;  %s8342_s0 = scalar_lea.vmem %s7943_s22, %s5334_s20  ;;  %s5340_s28 = sshll.u32 %s8259_s2, 4  ;;  %v5450_v46 = vld [vmem:[%s9493_s11 + $0x2f8] sm:$0xff] }
 0x172   : > { %1291 = vst.msk [vmem:[#allocation2 + $0x81] sm:$0xff] %vm1281_vm0, %v1203_v18  ;;  %v1205_v25 = vpop.permute.xlu0 %1204  ;;  %v1880_v26 = vld [vmem:[#allocation2 + $0x51] sm:$0xff]  ;;  %6868 = vmatpush3.bf16.msra.mxu0 %v8162_v48  ;;  %v1881_v40 = vld [vmem:[#allocation2 + $0x61] sm:$0xff]  ;;  %v8285_v48 = vpack.c.bf16 %v1866_v30, %v1865_v29  ;;  %s8359_s20 = sld [smem:[#allocation5 + $0xe]]  ;;  %s8398_s26 = scalar_lea.vmem %s7943_s22, %s5340_s28 }
 0x173   : > { %1537 = vst.msk [vmem:[#allocation2 + $0x81] sm:$0xff] %vm1416_vm1, %v1534_v4  ;;  %6016 = vmatmul.mubr.f32.gmra.mrb[4].mxu1 %v1878_v8  ;;  %6336 = vmatmul.mubr.f32.gmra.mrb[4].mxu0 %v1880_v26  ;;  %v1625_v8 = vld [vmem:[%s8237_s16 + $0x8] sm:$0xff]  ;;  %s5337_s16 = sshll.u32 %s8244_s23, 4  ;;  %v1606_v17 = vadd.f32 %v1604_v56, %v1595_v55  ;;  %v5447_v20 = vld [vmem:[%s9493_s11 + $0x2e0] sm:$0xff]  ;;  %v1629_v23 = vadd.f32 %v1627_v0, %v1618_v61  ;;  %v1674_v34 = vstv %s8271_s17  ;;  %s5343_s23 = sshll.u32 %s8291_s24, 4  ;;  %v1689_v55 = vstv %s8324_s27 }
 0x174   : > { %1292 = vst.msk [vmem:[#allocation2 + $0x91] sm:$0xff] %vm1281_vm0, %v1205_v25  ;;  %6018 = vmatprep.mubr.f32.mxu1 %v1879_v16  ;;  %6740 = vmatpush3.bf16.msra.mxu1 %v8192_v62  ;;  %v1616_v62 = vld [vmem:[%s8232_s5 + $0x8] sm:$0xff]  ;;  %s8332_s5 = sld [smem:[#allocation4 + $0xe]]  ;;  %v1628_v19 = vmul.f32 %v1626_v47, %v1625_v8  ;;  %v1651_v25 = vmul.f32 %v1650_v7, %v1648_v6  ;;  %v1672_v33 = vld [vmem:[%s8342_s0] sm:$0xff]  ;;  %s8386_s15 = scalar_lea.vmem %s7943_s22, %s5337_s16  ;;  %v1698_v58 = vstv %s8330_s8 }
 0x175   : > { %1560 = vst.msk [vmem:[#allocation2 + $0x91] sm:$0xff] %vm1416_vm1, %v1557_v13  ;;  %v1207_v43 = vpop.permute.xlu1 %1206  ;;  %6742 = vmatprep.subr.bf16.mxu1 %v8240_v24  ;;  %6338 = vmatprep.mubr.f32.mxu0 %v1881_v40  ;;  %v1870_v16 = vld [vmem:[%s9493_s11 + $0x68] sm:$0xff]  ;;  %v1619_v18 = vmul.f32 %v1617_v44, %v1616_v62  ;;  %v8402_v38 = vpack.c.bf16 %v5448_v22, %v5447_v20  ;;  %s5346_s2 = sshll.u32 %s8305_s1, 4  ;;  %s8417_s28 = sld [smem:[#allocation5 + $0xf]]  ;;  %v5449_v44 = vld [vmem:[%s9493_s11 + $0x2f0] sm:$0xff]  ;;  %v1696_v56 = vld [vmem:[%s8398_s26] sm:$0xff]  ;;  %v1722_v20 = vstv %s8376_s30 }
 0x176   : > { %1293 = vst.msk [vmem:[#allocation2 + $0x99] sm:$0xff] %vm1281_vm0, %v1207_v43  ;;  %v1209_v49 = vpop.permute.xlu0 %1208  ;;  %v1882_v50 = vld [vmem:[#allocation2 + $0x69] sm:$0xff]  ;;  %6870 = vmatprep.subr.bf16.mxu0 %v8247_v27  ;;  %v1883_v4 = vld [vmem:[#allocation2 + $0x79] sm:$0xff]  ;;  %v8392_v35 = vpack.c.bf16 %v1870_v16, %v1869_v15  ;;  %s8440_s29 = scalar_lea.vmem %s7943_s22, %s5343_s23  ;;  %v8454_v0 = vpack.c.bf16 %v5450_v46, %v5449_v44  ;;  %s8484_s16 = sld [smem:[#allocation6 + $0xf]] }
 0x177   : > { %1561 = vst.msk [vmem:[#allocation2 + $0x99] sm:$0xff] %vm1416_vm1, %v1558_v31  ;;  %6019 = vmatmul.mubr.f32.gmra.mrb[6].mxu1 %v1880_v26  ;;  %6339 = vmatmul.mubr.f32.gmra.mrb[6].mxu0 %v1882_v50  ;;  %v1640_v26 = vld [vmem:[%s8281_s4 + $0x8] sm:$0xff]  ;;  %v1663_v31 = vld [vmem:[%s8322_s10] sm:$0xff]  ;;  %s8388_s4 = sld [smem:[#allocation4 + $0xf]]  ;;  %v1630_v41 = vadd.f32 %v1628_v19, %v1619_v18  ;;  %v1713_v18 = vstv %s8374_s19  ;;  %s5365_s30 = sld [smem:[#allocation6 + $0x11]] }
 0x178   : > { %1294 = vst.msk [vmem:[#allocation2 + $0xa9] sm:$0xff] %vm1281_vm0, %v1209_v49  ;;  %6021 = vmatprep.mubr.f32.mxu1 %v1881_v40  ;;  %6744 = vmatpush3.bf16.msra.mxu1 %v8240_v24  ;;  %v1642_v24 = vmul.f32 %v1641_v5, %v1639_v1  ;;  %v1872_v40 = vld [vmem:[%s9493_s11 + $0x78] sm:$0xff]  ;;  %v1643_v43 = vmul.f32 %v1641_v5, %v1640_v26  ;;  %v5451_v62 = vld [vmem:[%s9493_s11 + $0x300] sm:$0xff]  ;;  %s5352_s1 = sshll.u32 %s8359_s20, 4  ;;  %v5388_v6 = vld [vmem:[%s9493_s11 + $0x108] sm:$0xff]  ;;  %s8486_s24 = sld [smem:[#allocation7 + $0xf]] }
 0x179   : > { %1584 = vst.msk [vmem:[#allocation2 + $0xa9] sm:$0xff] %vm1416_vm1, %v1581_v37  ;;  %v1211_v2 = vpop.permute.xlu1 %1210  ;;  %6872 = vmatpush3.bf16.msra.mxu0 %v8247_v27  ;;  %6746 = vmatprep.subr.bf16.mxu1 %v8285_v48  ;;  %v1649_v27 = vld [vmem:[%s8289_s18 + $0x8] sm:$0xff]  ;;  %v1675_v49 = vmul.f32 %v1674_v34, %v1672_v33  ;;  %v8445_v59 = vpack.c.bf16 %v1872_v40, %v1871_v39  ;;  %v5387_v5 = vld [vmem:[%s9493_s11 + $0x100] sm:$0xff] }
 0x17a   : > { %1295 = vst.msk [vmem:[#allocation2 + $0xb1] sm:$0xff] %vm1281_vm0, %v1211_v2  ;;  %v1213_v12 = vpop.permute.xlu0 %1212  ;;  %v1884_v13 = vld [vmem:[#allocation2 + $0x81] sm:$0xff]  ;;  %6341 = vmatprep.mubr.f32.mxu0 %v1883_v4  ;;  %6874 = vmatprep.subr.bf16.mxu0 %v8294_v51  ;;  %v1652_v10 = vmul.f32 %v1650_v7, %v1649_v27  ;;  %v1653_v47 = vadd.f32 %v1651_v25, %v1642_v24  ;;  %s5349_s6 = sshll.u32 %s8332_s5, 4  ;;  %s8492_s5 = scalar_lea.vmem %s7943_s22, %s5352_s1 }
 0x17b   : > { %1585 = vst.msk [vmem:[#allocation2 + $0xb1] sm:$0xff] %vm1416_vm1, %v1582_v54  ;;  %6022 = vmatmul.mubr.f32.gmra.mrb[8].mxu1 %v1882_v50  ;;  %6342 = vmatmul.mubr.f32.gmra.mrb[8].mxu0 %v1884_v13  ;;  %v1664_v50 = vld [vmem:[%s8322_s10 + $0x8] sm:$0xff]  ;;  %v1687_v54 = vld [vmem:[%s8386_s15] sm:$0xff]  ;;  %s8451_s10 = scalar_lea.vmem %s7943_s22, %s5346_s2  ;;  %s8478_s20 = scalar_lea.vmem %s7943_s22, %s5349_s6  ;;  %v8498_v26 = vpack.c.bf16 %v5388_v6, %v5387_v5 }
 0x17c   : > { %1296 = vst.msk [vmem:[#allocation2 + $0xc1] sm:$0xff] %vm1281_vm0, %v1213_v12  ;;  %6024 = vmatprep.mubr.f32.mxu1 %v1883_v4  ;;  %6748 = vmatpush3.bf16.msra.mxu1 %v8285_v48  ;;  %v1885_v30 = vld [vmem:[#allocation2 + $0x91] sm:$0xff]  ;;  %v1666_v48 = vmul.f32 %v1665_v32, %v1663_v31  ;;  %v1654_v8 = vadd.f32 %v1652_v10, %v1643_v43  ;;  %v5452_v4 = vld [vmem:[%s9493_s11 + $0x308] sm:$0xff]  ;;  %v1711_v15 = vld [vmem:[%s8440_s29] sm:$0xff]  ;;  %s5358_s19 = sshll.u32 %s8417_s28, 4  ;;  %v1746_v10 = vstv %s8430_s25  ;;  %s8609_s6 = sld [smem:[#allocation7 + $0x10]] }
 0x17d   : > { %1608 = vst.msk [vmem:[#allocation2 + $0xc1] sm:$0xff] %vm1416_vm1, %v1605_v60  ;;  %v1215_v29 = vpop.permute.xlu1 %1214  ;;  %6876 = vmatpush3.bf16.msra.mxu0 %v8294_v51  ;;  %6750 = vmatprep.subr.bf16.mxu1 %v8336_v11  ;;  %v1673_v51 = vld [vmem:[%s8342_s0 + $0x8] sm:$0xff]  ;;  %v1667_v1 = vmul.f32 %v1665_v32, %v1664_v50  ;;  %v1699_v12 = vmul.f32 %v1698_v58, %v1696_v56  ;;  %v1720_v19 = vld [vmem:[%s8451_s10] sm:$0xff]  ;;  %v5453_v31 = vld [vmem:[%s9493_s11 + $0x310] sm:$0xff] }
 0x17e   : > { %1297 = vst.msk [vmem:[#allocation2 + $0xc9] sm:$0xff] %vm1281_vm0, %v1215_v29  ;;  %v1217_v36 = vpop.permute.xlu0 %1216  ;;  %v1886_v37 = vld [vmem:[#allocation2 + $0x99] sm:$0xff]  ;;  %6344 = vmatprep.mubr.f32.mxu0 %v1885_v30  ;;  %6878 = vmatprep.subr.bf16.mxu0 %v8346_v14  ;;  %v1676_v2 = vmul.f32 %v1674_v34, %v1673_v51  ;;  %v1677_v7 = vadd.f32 %v1675_v49, %v1666_v48  ;;  %v8524_v44 = vld [vmem:[#allocation2 + $0x22] sm:$0xff]  ;;  %v8553_v6 = vld [vmem:[#allocation2 + $0x4a] sm:$0xff] }
 0x17f   : > { %1609 = vst.msk [vmem:[#allocation2 + $0xc9] sm:$0xff] %vm1416_vm1, %v1606_v17  ;;  %6025 = vmatmul.mubr.f32.gmra.mrb[10].mxu1 %v1884_v13  ;;  %6345 = vmatmul.mubr.f32.gmra.mrb[10].mxu0 %v1886_v37  ;;  %v1688_v13 = vld [vmem:[%s8386_s15 + $0x8] sm:$0xff]  ;;  %s5355_s15 = sshll.u32 %s8388_s4, 4  ;;  %v8496_v24 = vld [vmem:[#allocation2 + $0x1a] sm:$0xff]  ;;  %v6889_v25 = vpack.c.bf16 %v5452_v4, %v5451_v62  ;;  %v1714_v34 = vmul.f32 %v1713_v18, %v1711_v15 }
 0x180   : > { %1298 = vst.msk [vmem:[#allocation2 + $0xd9] sm:$0xff] %vm1281_vm0, %v1217_v36  ;;  %6027 = vmatprep.mubr.f32.mxu1 %v1885_v30  ;;  %6752 = vmatpush3.bf16.msra.mxu1 %v8336_v11  ;;  %v1887_v53 = vld [vmem:[#allocation2 + $0xa9] sm:$0xff]  ;;  %v1690_v11 = vmul.f32 %v1689_v55, %v1687_v54  ;;  %v1678_v27 = vadd.f32 %v1676_v2, %v1667_v1  ;;  %v5454_v32 = vld [vmem:[%s9493_s11 + $0x318] sm:$0xff]  ;;  %v1744_v43 = vld [vmem:[%s8492_s5] sm:$0xff]  ;;  %s8520_s28 = scalar_lea.vmem %s7943_s22, %s5355_s15  ;;  %v1770_v2 = vstv %s8486_s24  ;;  %s8584_s24 = sld [smem:[#allocation5 + $0x10]] }
 0x181   : > { %1632 = vst.msk [vmem:[#allocation2 + $0xd9] sm:$0xff] %vm1416_vm1, %v1629_v23  ;;  %v1219_v52 = vpop.permute.xlu1 %1218  ;;  %6880 = vmatpush3.bf16.msra.mxu0 %v8346_v14  ;;  %6754 = vmatprep.subr.bf16.mxu1 %v8392_v35  ;;  %v1697_v14 = vld [vmem:[%s8398_s26 + $0x8] sm:$0xff]  ;;  %v1691_v29 = vmul.f32 %v1689_v55, %v1688_v13  ;;  %v6893_v48 = vpack.c.bf16 %v5454_v32, %v5453_v31  ;;  %v8550_v4 = vld [vmem:[#allocation2 + $0x3a] sm:$0xff]  ;;  %s8607_s26 = sld [smem:[#allocation6 + $0x10]]  ;;  %s5366_s15 = sld [smem:[#allocation4 + $0x11]] }
 0x182   : > { %1299 = vst.msk [vmem:[#allocation2 + $0xe1] sm:$0xff] %vm1281_vm0, %v1219_v52  ;;  %v1221_v60 = vpop.permute.xlu0 %1220  ;;  %v1888_v61 = vld [vmem:[#allocation2 + $0xb1] sm:$0xff]  ;;  %6347 = vmatprep.mubr.f32.mxu0 %v1887_v53  ;;  %6882 = vmatprep.subr.bf16.mxu0 %v8402_v38  ;;  %v1700_v30 = vmul.f32 %v1698_v58, %v1697_v14  ;;  %v1701_v33 = vadd.f32 %v1699_v12, %v1690_v11  ;;  %v1712_v36 = vld [vmem:[%s8440_s29 + $0x8] sm:$0xff]  ;;  %s8528_s29 = scalar_lea.vmem %s7943_s22, %s5358_s19  ;;  %s5369_s19 = sld [smem:[#allocation5 + $0x11]] }
 0x183   : > { %1633 = vst.msk [vmem:[#allocation2 + $0xe1] sm:$0xff] %vm1416_vm1, %v1630_v41  ;;  %6028 = vmatmul.mubr.f32.gmra.mrb[12].mxu1 %v1886_v37  ;;  %6348 = vmatmul.mubr.f32.gmra.mrb[12].mxu0 %v1888_v61  ;;  %v1721_v37 = vld [vmem:[%s8451_s10 + $0x8] sm:$0xff]  ;;  %v1737_v41 = vstv %s8428_s7  ;;  %v1715_v50 = vmul.f32 %v1713_v18, %v1712_v36  ;;  %v1768_v1 = vld [vmem:[%s8528_s29] sm:$0xff]  ;;  %v5457_v14 = vld [vmem:[%s9493_s11 + $0x330] sm:$0xff] }
 0x184   : > { %1300 = vst.msk [vmem:[#allocation2 + $0xf1] sm:$0xff] %vm1281_vm0, %v1221_v60  ;;  %6030 = vmatprep.mubr.f32.mxu1 %v1887_v53  ;;  %6756 = vmatpush3.bf16.msra.mxu1 %v8392_v35  ;;  %v1889_v17 = vld [vmem:[#allocation2 + $0xc1] sm:$0xff]  ;;  %v1723_v35 = vmul.f32 %v1722_v20, %v1720_v19  ;;  %v1702_v49 = vadd.f32 %v1700_v30, %v1691_v29  ;;  %v5458_v15 = vld [vmem:[%s9493_s11 + $0x338] sm:$0xff] }
 0x185   : > { %1656 = vst.msk [vmem:[#allocation2 + $0xf1] sm:$0xff] %vm1416_vm1, %v1653_v47  ;;  %v1223_v16 = vpop.permute.xlu1 %1222  ;;  %6884 = vmatpush3.bf16.msra.mxu0 %v8402_v38  ;;  %6758 = vmatprep.subr.bf16.mxu1 %v8445_v59  ;;  %v1735_v38 = vld [vmem:[%s8478_s20] sm:$0xff]  ;;  %v8530_v47 = vld [vmem:[#allocation2 + $0x32] sm:$0xff]  ;;  %v1724_v51 = vmul.f32 %v1722_v20, %v1721_v37  ;;  %v1736_v52 = vld [vmem:[%s8478_s20 + $0x8] sm:$0xff]  ;;  %v1771_v19 = vmul.f32 %v1770_v2, %v1768_v1  ;;  %s8641_s20 = scalar_lea.vmem %s9491_s9, %s7667_s21 }
 0x186   : > { %1301 = vst.msk [vmem:[#allocation2 + $0xf9] sm:$0xff] %vm1281_vm0, %v1223_v16  ;;  %v1225_v22 = vpop.permute.xlu0 %1224  ;;  %v1890_v23 = vld [vmem:[#allocation2 + $0xc9] sm:$0xff]  ;;  %6350 = vmatprep.mubr.f32.mxu0 %v1889_v17  ;;  %6886 = vmatprep.subr.bf16.mxu0 %v8454_v0  ;;  %v5455_v53 = vld [vmem:[%s9493_s11 + $0x320] sm:$0xff]  ;;  %v1725_v55 = vadd.f32 %v1723_v35, %v1714_v34  ;;  %v1738_v58 = vmul.f32 %v1737_v41, %v1735_v38  ;;  %s5364_s25 = sshll.u32 %s8584_s24, 4 }
 0x187   : > { %1657 = vst.msk [vmem:[#allocation2 + $0xf9] sm:$0xff] %vm1416_vm1, %v1654_v8  ;;  %6031 = vmatmul.mubr.f32.gmra.mrb[14].mxu1 %v1888_v61  ;;  %6351 = vmatmul.mubr.f32.gmra.mrb[14].mxu0 %v1890_v23  ;;  %v5456_v54 = vld [vmem:[%s9493_s11 + $0x328] sm:$0xff]  ;;  %v1759_v61 = vld [vmem:[%s8520_s28] sm:$0xff]  ;;  %v1761_v8 = vstv %s8484_s16  ;;  %v1726_v11 = vadd.f32 %v1724_v51, %v1715_v50  ;;  %v1739_v12 = vmul.f32 %v1737_v41, %v1736_v52  ;;  %s8582_s16 = sld [smem:[#allocation4 + $0x10]]  ;;  %v5462_v50 = vld [vmem:[%s9493_s11 + $0x358] sm:$0xff]  ;;  %s1791_s1 = scalar_lea.vmem %s7943_s22, %s5364_s25 }
 0x188   : > { %1302 = vst.msk [vmem:[#allocation2 + $0x109] sm:$0xff] %vm1281_vm0, %v1225_v22  ;;  %6033 = vmatprep.mubr.f32.mxu1 %v1889_v17  ;;  %6760 = vmatpush3.bf16.msra.mxu1 %v8445_v59  ;;  %v1891_v40 = vld [vmem:[#allocation2 + $0xd9] sm:$0xff]  ;;  %v1747_v59 = vmul.f32 %v1746_v10, %v1744_v43  ;;  %v1745_v60 = vld [vmem:[%s8492_s5 + $0x8] sm:$0xff]  ;;  %v1762_v18 = vmul.f32 %v1761_v8, %v1759_v61  ;;  %v5465_v1 = vld [vmem:[%s9493_s11 + $0x370] sm:$0xff]  ;;  %s5367_s27 = sshll.u32 %s5366_s15, 4 }
 0x189   : > { %1680 = vst.msk [vmem:[#allocation2 + $0x109] sm:$0xff] %vm1416_vm1, %v1677_v7  ;;  %v1227_v39 = vpop.permute.xlu1 %1226  ;;  %6888 = vmatpush3.bf16.msra.mxu0 %v8454_v0  ;;  %6409 = vmatprep.mubr.f32.mxu0 %v8496_v24  ;;  %v6897_v7 = vpack.c.bf16 %v5456_v54, %v5455_v53  ;;  %v1748_v13 = vmul.f32 %v1746_v10, %v1745_v60  ;;  %v1760_v20 = vld [vmem:[%s8520_s28 + $0x8] sm:$0xff]  ;;  %v5459_v35 = vld [vmem:[%s9493_s11 + $0x340] sm:$0xff]  ;;  %s5370_s28 = sshll.u32 %s5369_s19, 4 }
 0x18a   : > { %1303 = vst.msk [vmem:[#allocation2 + $0x111] sm:$0xff] %vm1281_vm0, %v1227_v39  ;;  %v1229_v46 = vpop.permute.xlu0 %1228  ;;  %6890 = vmatprep.subr.bf16.mxu0 %v6889_v25  ;;  %6762 = vmatprep.subr.bf16.mxu1 %v8498_v26  ;;  %v1892_v56 = vld [vmem:[#allocation2 + $0xe1] sm:$0xff]  ;;  %v1749_v16 = vadd.f32 %v1747_v59, %v1738_v58  ;;  %v6901_v31 = vpack.c.bf16 %v5458_v15, %v5457_v14  ;;  %v8588_v41 = vld [vmem:[#allocation2 + $0x6a] sm:$0xff]  ;;  %v1794_v15 = vstv %s8609_s6  ;;  %s9548_s6 = smov 64   ;;  %s1815_s4 = scalar_lea.vmem %s7943_s22, %s5370_s28 }
 0x18b   : > { %1681 = vst.msk [vmem:[#allocation2 + $0x111] sm:$0xff] %vm1416_vm1, %v1678_v27  ;;  %6034 = vmatmul.mubr.f32.gmra.mrb[16].mxu1 %v1890_v23  ;;  %v1769_v22 = vld [vmem:[%s8528_s29 + $0x8] sm:$0xff]  ;;  %v8568_v27 = vld [vmem:[#allocation2 + $0x52] sm:$0xff]  ;;  %v1750_v32 = vadd.f32 %v1748_v13, %v1739_v12  ;;  %v1773_v37 = vadd.f32 %v1771_v19, %v1762_v18  ;;  %v8591_v10 = vld [vmem:[#allocation2 + $0x7a] sm:$0xff]  ;;  %v1785_v13 = vstv %s8607_s26  ;;  %s5368_s26 = sld [smem:[#allocation7 + $0x11]]  ;;  %s1806_s29 = scalar_lea.vmem %s7943_s22, %s5367_s27 }
 0x18c   : > { %1304 = vst.msk [vmem:[#allocation2 + $0x121] sm:$0xff] %vm1281_vm0, %v1229_v46  ;;  %6036 = vmatprep.mubr.f32.mxu1 %v1891_v40  ;;  %6410 = vmatmul.mubr.f32.vlgmr.msra.gmra.mrb[0].mxu0 %v8524_v44  ;;  %v1893_v62 = vld [vmem:[#allocation2 + $0xf1] sm:$0xff]  ;;  %v8571_v30 = vld [vmem:[#allocation2 + $0x62] sm:$0xff]  ;;  %v1772_v34 = vmul.f32 %v1770_v2, %v1769_v22 }
 0x18d   : > { %1704 = vst.msk [vmem:[#allocation2 + $0x121] sm:$0xff] %vm1416_vm1, %v1701_v33  ;;  %v1231_v0 = vpop.permute.xlu1 %1230  ;;  %6892 = vmatpush3.bf16.msra.mxu0 %v6889_v25  ;;  %6412 = vmatprep.mubr.f32.mxu0 %v8530_v47  ;;  %v1763_v33 = vmul.f32 %v1761_v8, %v1760_v20  ;;  %v5460_v36 = vld [vmem:[%s9493_s11 + $0x348] sm:$0xff]  ;;  %v5463_v58 = vld [vmem:[%s9493_s11 + $0x360] sm:$0xff]  ;;  %s5361_s7 = sshll.u32 %s8582_s16, 4  ;;  %v5466_v2 = vld [vmem:[%s9493_s11 + $0x378] sm:$0xff] }
 0x18e   : > { %1305 = vst.msk [vmem:[#allocation2 + $0x129] sm:$0xff] %vm1281_vm0, %v1231_v0  ;;  %v1233_v5 = vpop.permute.xlu0 %1232  ;;  %6894 = vmatprep.subr.bf16.mxu0 %v6893_v48  ;;  %v1894_v17 = vld [vmem:[#allocation2 + $0xf9] sm:$0xff]  ;;  %v6905_v46 = vpack.c.bf16 %v5460_v36, %v5459_v35  ;;  %v8604_v54 = vld [vmem:[#allocation2 + $0x82] sm:$0xff]  ;;  %s1782_s10 = scalar_lea.vmem %s7943_s22, %s5361_s7 }
 0x18f   : > { %1705 = vst.msk [vmem:[#allocation2 + $0x129] sm:$0xff] %vm1416_vm1, %v1702_v49  ;;  %6037 = vmatmul.mubr.f32.gmra.mrb[18].mxu1 %v1892_v56  ;;  %v5461_v49 = vld [vmem:[%s9493_s11 + $0x350] sm:$0xff]  ;;  %v5464_v59 = vld [vmem:[%s9493_s11 + $0x368] sm:$0xff]  ;;  %v8624_v0 = vld [vmem:[#allocation2 + $0x9a] sm:$0xff] }
 0x190   : > { %1306 = vst.msk [vmem:[#allocation2 + $0x139] sm:$0xff] %vm1281_vm0, %v1233_v5  ;;  %6039 = vmatprep.mubr.f32.mxu1 %v1893_v62  ;;  %6413 = vmatmul.mubr.f32.gmra.mrb[2].mxu0 %v8550_v4  ;;  %v1895_v25 = vld [vmem:[#allocation2 + $0x109] sm:$0xff]  ;;  %v6909_v56 = vpack.c.bf16 %v5462_v50, %v5461_v49  ;;  %v6913_v8 = vpack.c.bf16 %v5464_v59, %v5463_v58  ;;  %v1783_v12 = vld [vmem:[%s1782_s10] sm:$0xff]  ;;  %v8673_v50 = vld [vmem:[#allocation2 + $0x18] sm:$0xff] }
 0x191   : > { %1728 = vst.msk [vmem:[#allocation2 + $0x139] sm:$0xff] %vm1416_vm1, %v1725_v55  ;;  %v1235_v23 = vpop.permute.xlu1 %1234  ;;  %6415 = vmatprep.mubr.f32.mxu0 %v8553_v6  ;;  %6896 = vmatpush3.bf16.msra.mxu0 %v6893_v48  ;;  %v1774_v48 = vadd.f32 %v1772_v34, %v1763_v33  ;;  %v8611_v55 = vld [vmem:[#allocation2 + $0x92] sm:$0xff]  ;;  %v8626_v62 = vld [vmem:[#allocation2 + $0xaa] sm:$0xff]  ;;  %v1792_v14 = vld [vmem:[%s1791_s1] sm:$0xff] }
 0x192   : > { %1307 = vst.msk [vmem:[#allocation2 + $0x141] sm:$0xff] %vm1281_vm0, %v1235_v23  ;;  %v1237_v29 = vpop.permute.xlu0 %1236  ;;  %6898 = vmatprep.subr.bf16.mxu0 %v6897_v7  ;;  %v1896_v38 = vld [vmem:[#allocation2 + $0x111] sm:$0xff]  ;;  %v5467_v18 = vld [vmem:[%s9493_s11 + $0x380] sm:$0xff]  ;;  %v5468_v19 = vld [vmem:[%s9493_s11 + $0x388] sm:$0xff] }
 0x193   : > { %1729 = vst.msk [vmem:[#allocation2 + $0x141] sm:$0xff] %vm1416_vm1, %v1726_v11  ;;  %6040 = vmatmul.mubr.f32.gmra.mrb[20].mxu1 %v1894_v17  ;;  %v8644_v11 = vld [vmem:[#allocation2 + $0xb2] sm:$0xff]  ;;  %v6917_v17 = vpack.c.bf16 %v5466_v2, %v5465_v1  ;;  %v1370_v20 = vld [vmem:[%s8641_s20] sm:$0xff]  ;;  %v1784_v23 = vld [vmem:[%s1782_s10 + $0x8] sm:$0xff]  ;;  %v8663_v35 = vpack.c.bf16 %v5468_v19, %v5467_v18 }
 0x194   : > { %1308 = vst.msk [vmem:[#allocation2 + $0x151] sm:$0xff] %vm1281_vm0, %v1237_v29  ;;  %6042 = vmatprep.mubr.f32.mxu1 %v1895_v25  ;;  %6416 = vmatmul.mubr.f32.gmra.mrb[4].mxu0 %v8568_v27  ;;  %v1897_v40 = vld [vmem:[#allocation2 + $0x121] sm:$0xff]  ;;  %v1786_v29 = vmul.f32 %v1785_v13, %v1783_v12  ;;  %v8659_v33 = vld [vmem:[#allocation2 + $0xca] sm:$0xff]  ;;  %v8719_v19 = vld [vmem:[#allocation2 + $0x112] sm:$0xff] }
 0x195   : > { %1752 = vst.msk [vmem:[#allocation2 + $0x151] sm:$0xff] %vm1416_vm1, %v1749_v16  ;;  %v1239_v39 = vpop.permute.xlu1 %1238  ;;  %6418 = vmatprep.mubr.f32.mxu0 %v8571_v30  ;;  %6900 = vmatpush3.bf16.msra.mxu0 %v6897_v7  ;;  %v8648_v16 = vld [vmem:[#allocation2 + $0xc2] sm:$0xff]  ;;  %v8661_v34 = vld [vmem:[#allocation2 + $0xda] sm:$0xff]  ;;  %v8695_v2 = vld [vmem:[#allocation2 + $0x30] sm:$0xff] }
 0x196   : > { %1309 = vst.msk [vmem:[#allocation2 + $0x159] sm:$0xff] %vm1281_vm0, %v1239_v39  ;;  %v1241_v43 = vpop.permute.xlu0 %1240  ;;  %6902 = vmatprep.subr.bf16.mxu0 %v6901_v31  ;;  %v1898_v51 = vld [vmem:[#allocation2 + $0x129] sm:$0xff]  ;;  %v1825_v25 = vld [vmem:[#allocation2] sm:$0xff] }
 0x197   : > { %1753 = vst.msk [vmem:[#allocation2 + $0x159] sm:$0xff] %vm1416_vm1, %v1750_v32  ;;  %6043 = vmatmul.mubr.f32.gmra.mrb[22].mxu1 %v1896_v38  ;;  %v1793_v32 = vld [vmem:[%s1791_s1 + $0x8] sm:$0xff]  ;;  %v5390_v38 = vld [vmem:[%s9493_s11 + $0x118] sm:$0xff]  ;;  %v8690_v1 = vld [vmem:[#allocation2 + $0x20] sm:$0xff] }
 0x198   : > { %1310 = vst.msk [vmem:[#allocation2 + $0x169] sm:$0xff] %vm1281_vm0, %v1241_v43  ;;  %6045 = vmatprep.mubr.f32.mxu1 %v1897_v40  ;;  %6419 = vmatmul.mubr.f32.gmra.mrb[6].mxu0 %v8588_v41  ;;  %v1899_v53 = vld [vmem:[#allocation2 + $0x139] sm:$0xff]  ;;  %v1371_v40 = vld [vmem:[%s8641_s20 + $0x8] sm:$0xff]  ;;  %s635_s20 = scalar_lea.vmem %s9496_s14, %s9587_s3 }
 0x199   : > { %1776 = vst.msk [vmem:[#allocation2 + $0x169] sm:$0xff] %vm1416_vm1, %v1773_v37  ;;  %v1243_v52 = vpop.permute.xlu1 %1242  ;;  %6421 = vmatprep.mubr.f32.mxu0 %v8591_v10  ;;  %6904 = vmatpush3.bf16.msra.mxu0 %v6901_v31  ;;  %v1795_v31 = vmul.f32 %v1794_v15, %v1792_v14  ;;  %v5389_v37 = vld [vmem:[%s9493_s11 + $0x110] sm:$0xff]  ;;  %v1826_v43 = vld [vmem:[#allocation2 + $0x8] sm:$0xff]  ;;  %v8699_v12 = vld [vmem:[#allocation2 + $0xfa] sm:$0xff] }
 0x19a   : > { %1311 = vst.msk [vmem:[#allocation2 + $0x171] sm:$0xff] %vm1281_vm0, %v1243_v52  ;;  %6906 = vmatprep.subr.bf16.mxu0 %v6905_v46  ;;  %v1900_v60 = vld [vmem:[#allocation2 + $0x141] sm:$0xff]  ;;  %v8709_v14 = vld [vmem:[#allocation2 + $0x10a] sm:$0xff] }
 0x19b   : > { %1777 = vst.msk [vmem:[#allocation2 + $0x171] sm:$0xff] %vm1416_vm1, %v1774_v48  ;;  %6046 = vmatmul.mubr.f32.gmra.mrb[24].mxu1 %v1898_v51  ;;  %v1796_v48 = vmul.f32 %v1794_v15, %v1793_v32  ;;  %v1797_v49 = vadd.f32 %v1795_v31, %v1786_v29  ;;  %v8677_v52 = vld [vmem:[#allocation2 + $0xe2] sm:$0xff]  ;;  %v8713_v15 = vld [vmem:[#allocation2 + $0x38] sm:$0xff]  ;;  %v8737_v32 = vld [vmem:[#allocation2 + $0x12a] sm:$0xff] }
 0x19c   : > { %6048 = vmatprep.mubr.f32.mxu1 %v1899_v53  ;;  %6422 = vmatmul.mubr.f32.gmra.mrb[8].mxu0 %v8604_v54  ;;  %v1901_v61 = vld [vmem:[#allocation2 + $0x151] sm:$0xff]  ;;  %v6765_v53 = vpack.c.bf16 %v5390_v38, %v5389_v37  ;;  %v5392_v58 = vld [vmem:[%s9493_s11 + $0x128] sm:$0xff]  ;;  %v8733_v29 = vld [vmem:[#allocation2 + $0x60] sm:$0xff] }
 0x19d   : > { %6424 = vmatprep.mubr.f32.mxu0 %v8611_v55  ;;  %6908 = vmatpush3.bf16.msra.mxu0 %v6905_v46  ;;  %v1787_v46 = vmul.f32 %v1785_v13, %v1784_v23  ;;  %v5393_v13 = vld [vmem:[%s9493_s11 + $0x130] sm:$0xff]  ;;  %v8728_v23 = vld [vmem:[#allocation2 + $0x122] sm:$0xff]  ;;  %9549 = vst [vmem:[#allocation17_spill] sm:$0xff] %v8733_v29  ;;  %v5398_v37 = vld [vmem:[%s9493_s11 + $0x158] sm:$0xff] }
 0x19e   : > { %6910 = vmatprep.subr.bf16.mxu0 %v6909_v56  ;;  %v1902_v5 = vld [vmem:[#allocation2 + $0x159] sm:$0xff]  ;;  %v8853_v42 = vld [vmem:[#allocation2 + $0x108] sm:$0xff] }
 0x19f   : > { %6049 = vmatmul.mubr.f32.gmra.mrb[26].mxu1 %v1900_v60  ;;  %v8746_v38 = vld [vmem:[#allocation2 + $0x13a] sm:$0xff] }
 0x1a0   : > { %6051 = vmatprep.mubr.f32.mxu1 %v1901_v61  ;;  %6425 = vmatmul.mubr.f32.gmra.mrb[10].mxu0 %v8624_v0  ;;  %v1903_v7 = vld [vmem:[#allocation2 + $0x169] sm:$0xff]  ;;  %v8686_v61 = vld [vmem:[#allocation2 + $0xf2] sm:$0xff]  ;;  %v8867_v21 = vld [vmem:[#allocation2 + $0x120] sm:$0xff] }
 0x1a1   : > { %6427 = vmatprep.mubr.f32.mxu0 %v8626_v62  ;;  %6912 = vmatpush3.bf16.msra.mxu0 %v6909_v56  ;;  %v5391_v56 = vld [vmem:[%s9493_s11 + $0x120] sm:$0xff] }
 0x1a2   : > { %6914 = vmatprep.subr.bf16.mxu0 %v6913_v8  ;;  %v1904_v22 = vld [vmem:[#allocation2 + $0x171] sm:$0xff] }
 0x1a3   : > { %6052 = vmatmul.mubr.f32.gmra.mrb[28].mxu1 %v1902_v5  ;;  %v6769_v5 = vpack.c.bf16 %v5392_v58, %v5391_v56  ;;  %v8769_v56 = vld [vmem:[#allocation2 + $0x90] sm:$0xff] }
 0x1a4   : > { %6054 = vmatprep.mubr.f32.mxu1 %v1903_v7  ;;  %6428 = vmatmul.mubr.f32.gmra.mrb[12].mxu0 %v8644_v11  ;;  %9553 = vst [vmem:[#allocation21_spill] sm:$0xff] %v8769_v56 }
 0x1a5   : > { %6430 = vmatprep.mubr.f32.mxu0 %v8648_v16  ;;  %6916 = vmatpush3.bf16.msra.mxu0 %v6913_v8  ;;  %v1798_v8 = vadd.f32 %v1796_v48, %v1787_v46  ;;  %v8755_v46 = vld [vmem:[#allocation2 + $0x142] sm:$0xff] }
 0x1a6   : > { %6918 = vmatprep.subr.bf16.mxu0 %v6917_v17  ;;  %v5399_v48 = vld [vmem:[%s9493_s11 + $0x160] sm:$0xff] }
 0x1a7   : > { %v1375_v36 = vpop.permute.xlu0 %1374  ;;  %6055 = vmatmul.mubr.f32.gmra.mrb[30].mxu1 %v1904_v22  ;;  %v5396_v22 = vld [vmem:[%s9493_s11 + $0x148] sm:$0xff] }
 0x1a8   : > { %v1382_v39 = vmul.f32 %v1375_v36, %v1370_v20  ;;  %6089 = vmatprep.mubr.f32.mxu1 %v1825_v25  ;;  %6431 = vmatmul.mubr.f32.gmra.mrb[14].mxu0 %v8659_v33  ;;  %v5395_v20 = vld [vmem:[%s9493_s11 + $0x140] sm:$0xff]  ;;  %v8731_v25 = vld [vmem:[#allocation2 + $0x50] sm:$0xff] }
 0x1a9   : > { %6433 = vmatprep.mubr.f32.mxu0 %v8661_v34  ;;  %6920 = vmatpush3.bf16.msra.mxu0 %v6917_v17  ;;  %v8715_v17 = vld [vmem:[#allocation2 + $0x48] sm:$0xff]  ;;  %v6777_v31 = vpack.c.bf16 %v5396_v22, %v5395_v20  ;;  %v5397_v36 = vld [vmem:[%s9493_s11 + $0x150] sm:$0xff]  ;;  %v5403_v20 = vld [vmem:[%s9493_s11 + $0x180] sm:$0xff] }
 0x1aa   : > { %1386 = vrot.lane.b32.xlu0 %v1382_v39, %s9548_s6  ;;  %v1380_v51 = vpop.permute.xlu1 %1379  ;;  %6922 = vmatprep.subr.bf16.mxu0 %v8663_v35  ;;  %v8749_v39 = vld [vmem:[#allocation2 + $0x68] sm:$0xff] }
 0x1ab   : > { %v1383_v59 = vmul.f32 %v1380_v51, %v1371_v40  ;;  %v1245_v60 = vpop.permute.xlu0 %1244  ;;  %6090 = vmatmul.mubr.f32.vlgmr.msra.gmra.mrb[0].mxu1 %v1826_v43  ;;  %9550 = vst [vmem:[#allocation18_spill] sm:$0xff] %v8749_v39  ;;  %v8751_v40 = vld [vmem:[#allocation2 + $0x78] sm:$0xff]  ;;  %v6781_v43 = vpack.c.bf16 %v5398_v37, %v5397_v36  ;;  %v5404_v22 = vld [vmem:[%s9493_s11 + $0x188] sm:$0xff]  ;;  %v8803_v36 = vld [vmem:[#allocation2 + $0xb0] sm:$0xff] }
 0x1ac   : > { %1312 = vst.msk [vmem:[#allocation2 + $0x181] sm:$0xff] %vm1281_vm0, %v1245_v60  ;;  %6092 = vmatprep.mubr.f32.mxu1 %v8673_v50  ;;  %6764 = vmatpush3.bf16.msra.mxu1 %v8498_v26  ;;  %v5394_v26 = vld [vmem:[%s9493_s11 + $0x138] sm:$0xff]  ;;  %9551 = vst [vmem:[#allocation19_spill] sm:$0xff] %v8751_v40  ;;  %v5401_v60 = vld [vmem:[%s9493_s11 + $0x170] sm:$0xff] }
 0x1ad   : > { %1800 = vst.msk [vmem:[#allocation2 + $0x181] sm:$0xff] %vm1416_vm1, %v1797_v49  ;;  %1388 = vrot.lane.b32.xlu1 %v1383_v59, %s9548_s6  ;;  %6434 = vmatmul.mubr.f32.gmra.mrb[16].mxu0 %v8677_v52  ;;  %v6773_v18 = vpack.c.bf16 %v5394_v26, %v5393_v13  ;;  %v5400_v49 = vld [vmem:[%s9493_s11 + $0x168] sm:$0xff]  ;;  %v8764_v51 = vld [vmem:[#allocation2 + $0x152] sm:$0xff]  ;;  %v8773_v59 = vld [vmem:[#allocation2 + $0x15a] sm:$0xff] }
 0x1ae   : > { %v1247_v7 = vpop.permute.xlu1 %1246  ;;  %6766 = vmatprep.subr.bf16.mxu1 %v6765_v53  ;;  %6436 = vmatprep.mubr.f32.mxu0 %v8686_v61  ;;  %v6785_v58 = vpack.c.bf16 %v5400_v49, %v5399_v48  ;;  %v8787_v13 = vld [vmem:[#allocation2 + $0xa8] sm:$0xff]  ;;  %9557 = vst [vmem:[#allocation25_spill] sm:$0xff] %v8803_v36  ;;  %v8805_v37 = vld [vmem:[#allocation2 + $0xc0] sm:$0xff] }
 0x1af   : > { %1313 = vst.msk [vmem:[#allocation2 + $0x189] sm:$0xff] %vm1281_vm0, %v1247_v7  ;;  %6093 = vmatmul.mubr.f32.gmra.mrb[2].mxu1 %v8690_v1  ;;  %v8785_v7 = vld [vmem:[#allocation2 + $0x98] sm:$0xff]  ;;  %9555 = vst [vmem:[#allocation23_spill] sm:$0xff] %v8787_v13  ;;  %v8815_v49 = vld [vmem:[#allocation2 + $0xc8] sm:$0xff] }
 0x1b0   : > { %1801 = vst.msk [vmem:[#allocation2 + $0x189] sm:$0xff] %vm1416_vm1, %v1798_v8  ;;  %6095 = vmatprep.mubr.f32.mxu1 %v8695_v2  ;;  %6768 = vmatpush3.bf16.msra.mxu1 %v6765_v53  ;;  %v8767_v53 = vld [vmem:[#allocation2 + $0x80] sm:$0xff]  ;;  %v5402_v8 = vld [vmem:[%s9493_s11 + $0x178] sm:$0xff]  ;;  %9554 = vst [vmem:[#allocation22_spill] sm:$0xff] %v8785_v7 }
 0x1b1   : > { %6437 = vmatmul.mubr.f32.gmra.mrb[18].mxu0 %v8699_v12  ;;  %6770 = vmatprep.subr.bf16.mxu1 %v6769_v5  ;;  %9552 = vst [vmem:[#allocation20_spill] sm:$0xff] %v8767_v53  ;;  %v6789_v26 = vpack.c.bf16 %v5402_v8, %v5401_v60  ;;  %9558 = vst [vmem:[#allocation26_spill] sm:$0xff] %v8805_v37  ;;  %v5470_v60 = vld [vmem:[%s9493_s11 + $0x398] sm:$0xff] }
 0x1b2   : > { %6439 = vmatprep.mubr.f32.mxu0 %v8709_v14  ;;  %9560 = vst [vmem:[#allocation28_spill] sm:$0xff] %v8815_v49  ;;  %v8823_v8 = vld [vmem:[#allocation2 + $0xd8] sm:$0xff] }
 0x1b3   : > { %6096 = vmatmul.mubr.f32.gmra.mrb[4].mxu1 %v8713_v15  ;;  %9561 = vst [vmem:[#allocation29_spill] sm:$0xff] %v8823_v8 }
 0x1b4   : > { %6098 = vmatprep.mubr.f32.mxu1 %v8715_v17  ;;  %6772 = vmatpush3.bf16.msra.mxu1 %v6769_v5  ;;  %v8782_v5 = vld [vmem:[#allocation2 + $0x16a] sm:$0xff] }
 0x1b5   : > { %6440 = vmatmul.mubr.f32.gmra.mrb[20].mxu0 %v8719_v19  ;;  %6774 = vmatprep.subr.bf16.mxu1 %v6773_v18 }
 0x1b6   : > { %6442 = vmatprep.mubr.f32.mxu0 %v8728_v23 }
 0x1b7   : > { %6099 = vmatmul.mubr.f32.gmra.mrb[6].mxu1 %v8731_v25  ;;  %v8811_v48 = vld [vmem:[#allocation2 + $0x18a] sm:$0xff] }
 0x1b8   : > { %6101 = vmatprep.mubr.f32.mxu1 %v8733_v29  ;;  %6776 = vmatpush3.bf16.msra.mxu1 %v6773_v18  ;;  %v8791_v18 = vld [vmem:[#allocation2 + $0x172] sm:$0xff]  ;;  %9559 = vst [vmem:[#allocation27_spill] sm:$0xff] %v8811_v48 }
 0x1b9   : > { %6443 = vmatmul.mubr.f32.gmra.mrb[22].mxu0 %v8737_v32  ;;  %6778 = vmatprep.subr.bf16.mxu1 %v6777_v31 }
 0x1ba   : > { %6445 = vmatprep.mubr.f32.mxu0 %v8746_v38 }
 0x1bb   : > { %6102 = vmatmul.mubr.f32.gmra.mrb[8].mxu1 %v8749_v39 }
 0x1bc   : > { %6104 = vmatprep.mubr.f32.mxu1 %v8751_v40  ;;  %6780 = vmatpush3.bf16.msra.mxu1 %v6777_v31  ;;  %v8800_v31 = vld [vmem:[#allocation2 + $0x182] sm:$0xff] }
 0x1bd   : > { %6446 = vmatmul.mubr.f32.gmra.mrb[24].mxu0 %v8755_v46  ;;  %6782 = vmatprep.subr.bf16.mxu1 %v6781_v43  ;;  %9556 = vst [vmem:[#allocation24_spill] sm:$0xff] %v8800_v31 }
 0x1be   : > { %6448 = vmatprep.mubr.f32.mxu0 %v8764_v51 }
 0x1bf   : > { %6105 = vmatmul.mubr.f32.gmra.mrb[10].mxu1 %v8767_v53 }
 0x1c0   : > { %6107 = vmatprep.mubr.f32.mxu1 %v8769_v56  ;;  %6784 = vmatpush3.bf16.msra.mxu1 %v6781_v43  ;;  %v8808_v43 = vpack.c.bf16 %v5404_v22, %v5403_v20  ;;  %v5471_v22 = vld [vmem:[%s9493_s11 + $0x3a0] sm:$0xff] }
 0x1c1   : > { %6449 = vmatmul.mubr.f32.gmra.mrb[26].mxu0 %v8773_v59  ;;  %6786 = vmatprep.subr.bf16.mxu1 %v6785_v58 }
 0x1c2   : > { %6451 = vmatprep.mubr.f32.mxu0 %v8782_v5 }
 0x1c3   : > { %6108 = vmatmul.mubr.f32.gmra.mrb[12].mxu1 %v8785_v7 }
 0x1c4   : > { %6110 = vmatprep.mubr.f32.mxu1 %v8787_v13  ;;  %6788 = vmatpush3.bf16.msra.mxu1 %v6785_v58  ;;  %v5469_v58 = vld [vmem:[%s9493_s11 + $0x390] sm:$0xff] }
 0x1c5   : > { %6452 = vmatmul.mubr.f32.gmra.mrb[28].mxu0 %v8791_v18  ;;  %6790 = vmatprep.subr.bf16.mxu1 %v6789_v26  ;;  %v6925_v20 = vpack.c.bf16 %v5470_v60, %v5469_v58  ;;  %v8845_v60 = vld [vmem:[#allocation2 + $0xf8] sm:$0xff] }
 0x1c6   : > { %6454 = vmatprep.mubr.f32.mxu0 %v8800_v31  ;;  %v5472_v31 = vld [vmem:[%s9493_s11 + $0x3a8] sm:$0xff] }
 0x1c7   : > { %6111 = vmatmul.mubr.f32.gmra.mrb[14].mxu1 %v8803_v36  ;;  %v6929_v58 = vpack.c.bf16 %v5472_v31, %v5471_v22  ;;  %v8859_v31 = vld [vmem:[#allocation2 + $0x110] sm:$0xff]  ;;  %v5475_v22 = vld [vmem:[%s9493_s11 + $0x3c0] sm:$0xff] }
 0x1c8   : > { %6113 = vmatprep.mubr.f32.mxu1 %v8805_v37  ;;  %6792 = vmatpush3.bf16.msra.mxu1 %v6789_v26  ;;  %v8830_v26 = vld [vmem:[#allocation2 + $0xe0] sm:$0xff] }
 0x1c9   : > { %6455 = vmatmul.mubr.f32.gmra.mrb[30].mxu0 %v8811_v48  ;;  %6794 = vmatprep.subr.bf16.mxu1 %v8808_v43  ;;  %v8838_v48 = vld [vmem:[#allocation2 + $0xf0] sm:$0xff] }
 0x1ca   : > { %6489 = vmatprep.mubr.f32.mxu0 %v8695_v2 }
 0x1cb   : > { %6114 = vmatmul.mubr.f32.gmra.mrb[16].mxu1 %v8815_v49 }
 0x1cc   : > { %6116 = vmatprep.mubr.f32.mxu1 %v8823_v8 }
 0x1cd   : > { %6490 = vmatmul.mubr.f32.vlgmr.msra.gmra.mrb[0].mxu0 %v8713_v15 }
 0x1ce   : > { %6924 = vmatpush3.bf16.msra.mxu0 %v8663_v35  ;;  %6492 = vmatprep.mubr.f32.mxu0 %v8715_v17  ;;  %v6933_v35 = vpack.c.bf16 %v5474_v45, %v5473_v63  ;;  %v6937_v45 = vpack.c.bf16 %v5476_v28, %v5475_v22  ;;  %v8873_v63 = vld [vmem:[#allocation2 + $0x128] sm:$0xff]  ;;  %v5479_v22 = vld [vmem:[%s9493_s11 + $0x3e0] sm:$0xff] }
 0x1cf   : > { %6117 = vmatmul.mubr.f32.gmra.mrb[18].mxu1 %v8830_v26  ;;  %6926 = vmatprep.subr.bf16.mxu0 %v6925_v20 }
 0x1d0   : > { %6119 = vmatprep.mubr.f32.mxu1 %v8838_v48 }
 0x1d1   : > { %6493 = vmatmul.mubr.f32.gmra.mrb[2].mxu0 %v8731_v25 }
 0x1d2   : > { %6495 = vmatprep.mubr.f32.mxu0 %v8733_v29  ;;  %6928 = vmatpush3.bf16.msra.mxu0 %v6925_v20  ;;  %v5477_v20 = vld [vmem:[%s9493_s11 + $0x3d0] sm:$0xff]  ;;  %v5478_v29 = vld [vmem:[%s9493_s11 + $0x3d8] sm:$0xff] }
 0x1d3   : > { %6120 = vmatmul.mubr.f32.gmra.mrb[20].mxu1 %v8845_v60  ;;  %6930 = vmatprep.subr.bf16.mxu0 %v6929_v58  ;;  %v6941_v28 = vpack.c.bf16 %v5478_v29, %v5477_v20  ;;  %v5481_v20 = vld [vmem:[%s9493_s11 + $0x3f0] sm:$0xff] }
 0x1d4   : > { %6122 = vmatprep.mubr.f32.mxu1 %v8853_v42 }
 0x1d5   : > { %6496 = vmatmul.mubr.f32.gmra.mrb[4].mxu0 %v8749_v39  ;;  %v8881_v39 = vld [vmem:[#allocation2 + $0x138] sm:$0xff] }
 0x1d6   : > { %6498 = vmatprep.mubr.f32.mxu0 %v8751_v40  ;;  %6932 = vmatpush3.bf16.msra.mxu0 %v6929_v58  ;;  %v8887_v58 = vld [vmem:[#allocation2 + $0x140] sm:$0xff]  ;;  %v5480_v40 = vld [vmem:[%s9493_s11 + $0x3e8] sm:$0xff] }
 0x1d7   : > { %6123 = vmatmul.mubr.f32.gmra.mrb[22].mxu1 %v8859_v31  ;;  %6934 = vmatprep.subr.bf16.mxu0 %v6933_v35  ;;  %v6945_v29 = vpack.c.bf16 %v5480_v40, %v5479_v22  ;;  %v5483_v22 = vld [vmem:[%s9493_s11 + $0x400] sm:$0xff] }
 0x1d8   : > { %6125 = vmatprep.mubr.f32.mxu1 %v8867_v21 }
 0x1d9   : > { %6499 = vmatmul.mubr.f32.gmra.mrb[6].mxu0 %v8767_v53  ;;  %v8895_v53 = vld [vmem:[#allocation2 + $0x150] sm:$0xff] }
 0x1da   : > { %6501 = vmatprep.mubr.f32.mxu0 %v8769_v56  ;;  %6936 = vmatpush3.bf16.msra.mxu0 %v6933_v35  ;;  %v8901_v35 = vld [vmem:[#allocation2 + $0x158] sm:$0xff] }
 0x1db   : > { %6126 = vmatmul.mubr.f32.gmra.mrb[24].mxu1 %v8873_v63  ;;  %6938 = vmatprep.subr.bf16.mxu0 %v6937_v45  ;;  %v5482_v56 = vld [vmem:[%s9493_s11 + $0x3f8] sm:$0xff] }
 0x1dc   : > { %6128 = vmatprep.mubr.f32.mxu1 %v8881_v39  ;;  %v6949_v40 = vpack.c.bf16 %v5482_v56, %v5481_v20  ;;  %v5405_v56 = vld [vmem:[%s9493_s11 + $0x190] sm:$0xff] }
 0x1dd   : > { %6502 = vmatmul.mubr.f32.gmra.mrb[8].mxu0 %v8785_v7  ;;  %v8909_v7 = vld [vmem:[#allocation2 + $0x168] sm:$0xff] }
 0x1de   : > { %6504 = vmatprep.mubr.f32.mxu0 %v8787_v13  ;;  %6940 = vmatpush3.bf16.msra.mxu0 %v6937_v45  ;;  %v8915_v45 = vld [vmem:[#allocation2 + $0x170] sm:$0xff]  ;;  %v5484_v13 = vld [vmem:[%s9493_s11 + $0x408] sm:$0xff] }
 0x1df   : > { %6129 = vmatmul.mubr.f32.gmra.mrb[26].mxu1 %v8887_v58  ;;  %6942 = vmatprep.subr.bf16.mxu0 %v6941_v28  ;;  %v8932_v20 = vpack.c.bf16 %v5484_v13, %v5483_v22  ;;  %v5418_v22 = vld [vmem:[%s9493_s11 + $0x1f8] sm:$0xff] }
 0x1e0   : > { %6131 = vmatprep.mubr.f32.mxu1 %v8895_v53 }
 0x1e1   : > { %6505 = vmatmul.mubr.f32.gmra.mrb[10].mxu0 %v8803_v36  ;;  %v2372_v36 = vld [vmem:[#allocation2 + $0x2] sm:$0xff] }
 0x1e2   : > { %6507 = vmatprep.mubr.f32.mxu0 %v8805_v37  ;;  %6944 = vmatpush3.bf16.msra.mxu0 %v6941_v28  ;;  %v5406_v28 = vld [vmem:[%s9493_s11 + $0x198] sm:$0xff]  ;;  %v2373_v37 = vld [vmem:[#allocation2 + $0xa] sm:$0xff] }
 0x1e3   : > { %6132 = vmatmul.mubr.f32.gmra.mrb[28].mxu1 %v8901_v35  ;;  %6946 = vmatprep.subr.bf16.mxu0 %v6945_v29 }
 0x1e4   : > { %6134 = vmatprep.mubr.f32.mxu1 %v8909_v7 }
 0x1e5   : > { %6508 = vmatmul.mubr.f32.gmra.mrb[12].mxu0 %v8815_v49  ;;  %v6797_v49 = vpack.c.bf16 %v5406_v28, %v5405_v56  ;;  %v8999_v56 = vld [vmem:[#allocation2 + $0x188] sm:$0xff] }
 0x1e6   : > { %6510 = vmatprep.mubr.f32.mxu0 %v8823_v8  ;;  %6948 = vmatpush3.bf16.msra.mxu0 %v6945_v29  ;;  %v5407_v8 = vld [vmem:[%s9493_s11 + $0x1a0] sm:$0xff]  ;;  %v5408_v29 = vld [vmem:[%s9493_s11 + $0x1a8] sm:$0xff] }
 0x1e7   : > { %6135 = vmatmul.mubr.f32.gmra.mrb[30].mxu1 %v8915_v45  ;;  %6950 = vmatprep.subr.bf16.mxu0 %v6949_v40  ;;  %v6801_v13 = vpack.c.bf16 %v5408_v29, %v5407_v8  ;;  %v5412_v8 = vld [vmem:[%s9493_s11 + $0x1c8] sm:$0xff] }
 0x1e8   : > { %6169 = vmatprep.mubr.f32.mxu1 %v2372_v36  ;;  %v5409_v36 = vld [vmem:[%s9493_s11 + $0x1b0] sm:$0xff] }
 0x1e9   : > { %6511 = vmatmul.mubr.f32.gmra.mrb[14].mxu0 %v8830_v26 }
 0x1ea   : > { %6513 = vmatprep.mubr.f32.mxu0 %v8838_v48  ;;  %6952 = vmatpush3.bf16.msra.mxu0 %v6949_v40  ;;  %v5416_v40 = vld [vmem:[%s9493_s11 + $0x1e8] sm:$0xff] }
 0x1eb   : > { %6170 = vmatmul.mubr.f32.vlgmr.msra.gmra.mrb[0].mxu1 %v2373_v37  ;;  %6954 = vmatprep.subr.bf16.mxu0 %v8932_v20  ;;  %v5410_v37 = vld [vmem:[%s9493_s11 + $0x1b8] sm:$0xff] }
 0x1ec   : > { %6172 = vmatprep.mubr.f32.mxu1 %v8496_v24  ;;  %6796 = vmatpush3.bf16.msra.mxu1 %v8808_v43  ;;  %v6805_v24 = vpack.c.bf16 %v5410_v37, %v5409_v36  ;;  %v5411_v43 = vld [vmem:[%s9493_s11 + $0x1c0] sm:$0xff]  ;;  %v5489_v36 = vld [vmem:[%s9493_s11 + $0x430] sm:$0xff]  ;;  %v9562_v37 = vld [vmem:[#allocation17_spill] sm:$0xff] }
 0x1ed   : > { %6514 = vmatmul.mubr.f32.gmra.mrb[16].mxu0 %v8845_v60  ;;  %6798 = vmatprep.subr.bf16.mxu1 %v6797_v49 }
 0x1ee   : > { %6516 = vmatprep.mubr.f32.mxu0 %v8853_v42 }
 0x1ef   : > { %6173 = vmatmul.mubr.f32.gmra.mrb[2].mxu1 %v8524_v44  ;;  %v6809_v44 = vpack.c.bf16 %v5412_v8, %v5411_v43  ;;  %v9563_v43 = vld [vmem:[#allocation12_spill] sm:$0xff]  ;;  %v9564_v8 = vld [vmem:[#allocation18_spill] sm:$0xff] }
 0x1f0   : > { %6175 = vmatprep.mubr.f32.mxu1 %v8530_v47  ;;  %6800 = vmatpush3.bf16.msra.mxu1 %v6797_v49  ;;  %v5413_v47 = vld [vmem:[%s9493_s11 + $0x1d0] sm:$0xff]  ;;  %v5414_v49 = vld [vmem:[%s9493_s11 + $0x1d8] sm:$0xff] }
 0x1f1   : > { %6517 = vmatmul.mubr.f32.gmra.mrb[18].mxu0 %v8859_v31  ;;  %6802 = vmatprep.subr.bf16.mxu1 %v6801_v13 }
 0x1f2   : > { %6519 = vmatprep.mubr.f32.mxu0 %v8867_v21 }
 0x1f3   : > { %6176 = vmatmul.mubr.f32.gmra.mrb[4].mxu1 %v8550_v4  ;;  %v6813_v4 = vpack.c.bf16 %v5414_v49, %v5413_v47  ;;  %v9565_v49 = vld [vmem:[#allocation19_spill] sm:$0xff] }
 0x1f4   : > { %6178 = vmatprep.mubr.f32.mxu1 %v8553_v6  ;;  %6804 = vmatpush3.bf16.msra.mxu1 %v6801_v13  ;;  %v5415_v6 = vld [vmem:[%s9493_s11 + $0x1e0] sm:$0xff] }
 0x1f5   : > { %6520 = vmatmul.mubr.f32.gmra.mrb[20].mxu0 %v8873_v63  ;;  %6806 = vmatprep.subr.bf16.mxu1 %v6805_v24 }
 0x1f6   : > { %6522 = vmatprep.mubr.f32.mxu0 %v8881_v39 }
 0x1f7   : > { %6179 = vmatmul.mubr.f32.gmra.mrb[6].mxu1 %v8568_v27  ;;  %v6817_v27 = vpack.c.bf16 %v5416_v40, %v5415_v6  ;;  %v9566_v6 = vld [vmem:[#allocation13_spill] sm:$0xff] }
 0x1f8   : > { %6181 = vmatprep.mubr.f32.mxu1 %v8571_v30  ;;  %6808 = vmatpush3.bf16.msra.mxu1 %v6805_v24  ;;  %v5417_v30 = vld [vmem:[%s9493_s11 + $0x1f0] sm:$0xff]  ;;  %v5491_v24 = vld [vmem:[%s9493_s11 + $0x440] sm:$0xff] }
 0x1f9   : > { %6523 = vmatmul.mubr.f32.gmra.mrb[22].mxu0 %v8887_v58  ;;  %6810 = vmatprep.subr.bf16.mxu1 %v6809_v44  ;;  %v3911_v40 = vld [vmem:[#allocation2 + $0x99] sm:$0xff] }
 0x1fa   : > { %6525 = vmatprep.mubr.f32.mxu0 %v8895_v53 }
 0x1fb   : > { %6182 = vmatmul.mubr.f32.gmra.mrb[8].mxu1 %v8588_v41  ;;  %v8994_v41 = vld [vmem:[#allocation2 + $0x180] sm:$0xff] }
 0x1fc   : > { %6184 = vmatprep.mubr.f32.mxu1 %v8591_v10  ;;  %6812 = vmatpush3.bf16.msra.mxu1 %v6809_v44  ;;  %v6821_v10 = vpack.c.bf16 %v5418_v22, %v5417_v30  ;;  %v3910_v44 = vld [vmem:[#allocation2 + $0x91] sm:$0xff]  ;;  %v3912_v30 = vld [vmem:[#allocation2 + $0xa9] sm:$0xff] }
 0x1fd   : > { %6526 = vmatmul.mubr.f32.gmra.mrb[24].mxu0 %v8901_v35  ;;  %6814 = vmatprep.subr.bf16.mxu1 %v6813_v4 }
 0x1fe   : > { %6528 = vmatprep.mubr.f32.mxu0 %v8909_v7 }
 0x1ff   : > { %6185 = vmatmul.mubr.f32.gmra.mrb[10].mxu1 %v8604_v54  ;;  %v1807_v54 = vld [vmem:[%s1806_s29] sm:$0xff] }
 0x200   : > { %6187 = vmatprep.mubr.f32.mxu1 %v8611_v55  ;;  %6816 = vmatpush3.bf16.msra.mxu1 %v6813_v4  ;;  %v1809_v55 = vstv %s5365_s30  ;;  %v5493_v4 = vld [vmem:[%s9493_s11 + $0x450] sm:$0xff] }
 0x201   : > { %6529 = vmatmul.mubr.f32.gmra.mrb[26].mxu0 %v8915_v45  ;;  %6818 = vmatprep.subr.bf16.mxu1 %v6817_v27 }
 0x202   : > { %6531 = vmatprep.mubr.f32.mxu0 %v8994_v41 }
 0x203   : > { %6188 = vmatmul.mubr.f32.gmra.mrb[12].mxu1 %v8624_v0  ;;  %v1816_v0 = vld [vmem:[%s1815_s4] sm:$0xff] }
 0x204   : > { %6190 = vmatprep.mubr.f32.mxu1 %v8626_v62  ;;  %6820 = vmatpush3.bf16.msra.mxu1 %v6817_v27  ;;  %v1818_v62 = vstv %s5368_s26  ;;  %v9567_v27 = vld [vmem:[#allocation20_spill] sm:$0xff] }
 0x205   : > { %6532 = vmatmul.mubr.f32.gmra.mrb[28].mxu0 %v8999_v56  ;;  %6822 = vmatprep.subr.bf16.mxu1 %v6821_v10 }
 0x207   : > { %6191 = vmatmul.mubr.f32.gmra.mrb[14].mxu1 %v8644_v11  ;;  %v1810_v11 = vmul.f32 %v1809_v55, %v1807_v54  ;;  %v5495_v54 = vld [vmem:[%s9493_s11 + $0x460] sm:$0xff] }
 0x208   : > { %6193 = vmatprep.mubr.f32.mxu1 %v8648_v16  ;;  %6824 = vmatpush3.bf16.msra.mxu1 %v6821_v10  ;;  %v1819_v16 = vmul.f32 %v1818_v62, %v1816_v0  ;;  %v9568_v10 = vld [vmem:[#allocation21_spill] sm:$0xff]  ;;  %v9569_v0 = vld [vmem:[#allocation14_spill] sm:$0xff] }
 0x209   : > { %7017 = vmatprep.subr.bf16.mxu1 %v7779_v57 }
 0x20a   : > { %v1821_v28 = vadd.f32 %v1819_v16, %v1810_v11  ;;  %v9570_v11 = vld [vmem:[#allocation22_spill] sm:$0xff] }
 0x20b   : > { %6194 = vmatmul.mubr.f32.gmra.mrb[16].mxu1 %v8659_v33  ;;  %v1808_v33 = vld [vmem:[%s1806_s29 + $0x8] sm:$0xff] }
 0x20c   : > { %6196 = vmatprep.mubr.f32.mxu1 %v8661_v34  ;;  %v1817_v34 = vld [vmem:[%s1815_s4 + $0x8] sm:$0xff] }
 0x20d   : > { %v3914_v16 = vld [vmem:[#allocation2 + $0xc1] sm:$0xff] }
 0x20f   : > { %6197 = vmatmul.mubr.f32.gmra.mrb[18].mxu1 %v8677_v52  ;;  %v1811_v52 = vmul.f32 %v1809_v55, %v1808_v33  ;;  %v5496_v55 = vld [vmem:[%s9493_s11 + $0x468] sm:$0xff] }
 0x210   : > { %6199 = vmatprep.mubr.f32.mxu1 %v8686_v61  ;;  %v1820_v61 = vmul.f32 %v1818_v62, %v1817_v34  ;;  %v3913_v62 = vld [vmem:[#allocation2 + $0xb1] sm:$0xff]  ;;  %v6977_v33 = vpack.c.bf16 %v5496_v55, %v5495_v54  ;;  %v9571_v34 = vld [vmem:[#allocation23_spill] sm:$0xff] }
 0x211   : > { %v9578_v54 = vld [vmem:[#allocation24_spill] sm:$0xff] }
 0x212   : > { %v1822_v29 = vadd.f32 %v1820_v61, %v1811_v52  ;;  %v5497_v52 = vld [vmem:[%s9493_s11 + $0x470] sm:$0xff]  ;;  %v5498_v61 = vld [vmem:[%s9493_s11 + $0x478] sm:$0xff] }
 0x213   : > { %6200 = vmatmul.mubr.f32.gmra.mrb[20].mxu1 %v8699_v12 }
 0x214   : > { %6202 = vmatprep.mubr.f32.mxu1 %v8709_v14 }
 0x217   : > { %6203 = vmatmul.mubr.f32.gmra.mrb[22].mxu1 %v8719_v19 }
 0x218   : > { %6205 = vmatprep.mubr.f32.mxu1 %v8728_v23  ;;  %v3902_v23 = vld [vmem:[#allocation2 + $0x31] sm:$0xff] }
 0x21b   : > { %6206 = vmatmul.mubr.f32.gmra.mrb[24].mxu1 %v8737_v32 }
 0x21c   : > { %v1387_v12 = vpop.permute.xlu0 %1386  ;;  %6208 = vmatprep.mubr.f32.mxu1 %v8746_v38  ;;  %v5485_v38 = vld [vmem:[%s9493_s11 + $0x410] sm:$0xff] }
 0x21d   : > { %1393 = vst.msk [vmem:[#allocation2 + $0x199] sm:$0xff] %vm1281_vm0, %v1387_v12  ;;  %v3915_v12 = vld [vmem:[#allocation2 + $0xc9] sm:$0xff] }
 0x21e   : > { %1823 = vst.msk [vmem:[#allocation2 + $0x199] sm:$0xff] %vm1416_vm1, %v1821_v28  ;;  %v9572_v28 = vld [vmem:[#allocation15_spill] sm:$0xff] }
 0x21f   : > { %v1389_v14 = vpop.permute.xlu1 %1388  ;;  %6209 = vmatmul.mubr.f32.gmra.mrb[26].mxu1 %v8755_v46  ;;  %v5486_v46 = vld [vmem:[%s9493_s11 + $0x418] sm:$0xff] }
 0x220   : > { %1394 = vst.msk [vmem:[#allocation2 + $0x1a1] sm:$0xff] %vm1281_vm0, %v1389_v14  ;;  %6211 = vmatprep.mubr.f32.mxu1 %v8764_v51  ;;  %v3903_v51 = vld [vmem:[#allocation2 + $0x39] sm:$0xff] }
 0x221   : > { %1824 = vst.msk [vmem:[#allocation2 + $0x1a1] sm:$0xff] %vm1416_vm1, %v1822_v29  ;;  %v9573_v29 = vld [vmem:[#allocation25_spill] sm:$0xff] }
 0x222   : > { %v3916_v14 = vld [vmem:[#allocation2 + $0xd9] sm:$0xff] }
 0x223   : > { %6212 = vmatmul.mubr.f32.gmra.mrb[28].mxu1 %v8773_v59  ;;  %v3904_v59 = vld [vmem:[#allocation2 + $0x49] sm:$0xff] }
 0x224   : > { %6214 = vmatprep.mubr.f32.mxu1 %v8782_v5  ;;  %v6957_v5 = vpack.c.bf16 %v5486_v46, %v5485_v38  ;;  %v3917_v38 = vld [vmem:[#allocation2 + $0xe1] sm:$0xff]  ;;  %v9576_v46 = vld [vmem:[#allocation28_spill] sm:$0xff] }
 0x225   : > { %v3626_v19 = vld [vmem:[#allocation2 + $0x198] sm:$0xff] }
 0x226   : > { %6534 = vmatprep.mubr.f32.mxu0 %v3626_v19  ;;  %v6981_v19 = vpack.c.bf16 %v5498_v61, %v5497_v52 }
 0x227   : > { %6215 = vmatmul.mubr.f32.gmra.mrb[30].mxu1 %v8791_v18  ;;  %v5488_v18 = vld [vmem:[%s9493_s11 + $0x428] sm:$0xff] }
 0x228   : > { %v3627_v32 = vld [vmem:[#allocation2 + $0x1a0] sm:$0xff]  ;;  %6249 = vmatprep.mubr.f32.mxu1 %v8673_v50 }
 0x229   : > { %6535 = vmatmul.mubr.f32.gmra.mrb[30].mxu0 %v3627_v32  ;;  %v5487_v50 = vld [vmem:[%s9493_s11 + $0x420] sm:$0xff]  ;;  %v9575_v32 = vld [vmem:[#allocation16_spill] sm:$0xff] }
 0x22a   : > { %6569 = vmatprep.mubr.f32.mxu0 %v3902_v23  ;;  %v6961_v13 = vpack.c.bf16 %v5488_v18, %v5487_v50  ;;  %v9574_v23 = vld [vmem:[#allocation26_spill] sm:$0xff]  ;;  %v3920_v50 = vld [vmem:[#allocation2 + $0x109] sm:$0xff]  ;;  %v3921_v18 = vld [vmem:[#allocation2 + $0x111] sm:$0xff] }
 0x22b   : > { %6250 = vmatmul.mubr.f32.vlgmr.msra.gmra.mrb[0].mxu1 %v8690_v1  ;;  %v3905_v1 = vld [vmem:[#allocation2 + $0x51] sm:$0xff]  ;;  %v4238_v55 = vld [vmem:[#allocation2 + $0x19a] sm:$0xff] }
 0x22c   : > { %6252 = vmatprep.mubr.f32.mxu1 %v8695_v2  ;;  %7025 = vmatpush3.bf16.msra.mxu1 %v7779_v57  ;;  %v3906_v2 = vld [vmem:[#allocation2 + $0x61] sm:$0xff]  ;;  %v5490_v57 = vld [vmem:[%s9493_s11 + $0x438] sm:$0xff] }
 0x22d   : > { %6570 = vmatmul.mubr.f32.vlgmr.msra.gmra.mrb[0].mxu0 %v3903_v51  ;;  %7018 = vmatprep.subr.bf16.mxu1 %v7795_v3  ;;  %v3918_v51 = vld [vmem:[#allocation2 + $0xf1] sm:$0xff] }
 0x22e   : > { %6956 = vmatpush3.bf16.msra.mxu0 %v8932_v20  ;;  %6572 = vmatprep.mubr.f32.mxu0 %v3904_v59  ;;  %v3908_v20 = vld [vmem:[#allocation2 + $0x79] sm:$0xff] }
 0x22f   : > { %6253 = vmatmul.mubr.f32.gmra.mrb[2].mxu1 %v8713_v15  ;;  %6958 = vmatprep.subr.bf16.mxu0 %v6957_v5  ;;  %v3907_v15 = vld [vmem:[#allocation2 + $0x69] sm:$0xff]  ;;  %v9577_v59 = vld [vmem:[#allocation29_spill] sm:$0xff] }
 0x230   : > { %6255 = vmatprep.mubr.f32.mxu1 %v8715_v17  ;;  %7026 = vmatpush3.bf16.msra.mxu1 %v7795_v3  ;;  %v6965_v17 = vpack.c.bf16 %v5490_v57, %v5489_v36  ;;  %v5492_v3 = vld [vmem:[%s9493_s11 + $0x448] sm:$0xff]  ;;  %v4211_v36 = vld [vmem:[#allocation2 + $0x52] sm:$0xff]  ;;  %v4214_v57 = vld [vmem:[#allocation2 + $0x7a] sm:$0xff] }
 0x231   : > { %6573 = vmatmul.mubr.f32.gmra.mrb[2].mxu0 %v3905_v1  ;;  %7019 = vmatprep.subr.bf16.mxu1 %v7804_v9  ;;  %v6969_v47 = vpack.c.bf16 %v5492_v3, %v5491_v24  ;;  %v3922_v1 = vld [vmem:[#allocation2 + $0x121] sm:$0xff]  ;;  %v4221_v3 = vld [vmem:[#allocation2 + $0xca] sm:$0xff] }
 0x232   : > { %6575 = vmatprep.mubr.f32.mxu0 %v3906_v2  ;;  %6960 = vmatpush3.bf16.msra.mxu0 %v6957_v5  ;;  %v3919_v5 = vld [vmem:[#allocation2 + $0xf9] sm:$0xff]  ;;  %v3923_v2 = vld [vmem:[#allocation2 + $0x129] sm:$0xff] }
 0x233   : > { %6256 = vmatmul.mubr.f32.gmra.mrb[4].mxu1 %v8731_v25  ;;  %6962 = vmatprep.subr.bf16.mxu0 %v6961_v13  ;;  %v3909_v25 = vld [vmem:[#allocation2 + $0x81] sm:$0xff] }
 0x234   : > { %6258 = vmatprep.mubr.f32.mxu1 %v9562_v37  ;;  %7027 = vmatpush3.bf16.msra.mxu1 %v7804_v9  ;;  %v5494_v9 = vld [vmem:[%s9493_s11 + $0x458] sm:$0xff]  ;;  %v4220_v24 = vld [vmem:[#allocation2 + $0xc2] sm:$0xff] }
 0x235   : > { %6576 = vmatmul.mubr.f32.gmra.mrb[4].mxu0 %v3907_v15  ;;  %7020 = vmatprep.subr.bf16.mxu1 %v9563_v43  ;;  %v6973_v22 = vpack.c.bf16 %v5494_v9, %v5493_v4  ;;  %v4216_v15 = vld [vmem:[#allocation2 + $0x92] sm:$0xff]  ;;  %v4228_v4 = vld [vmem:[#allocation2 + $0x122] sm:$0xff]  ;;  %v4229_v9 = vld [vmem:[#allocation2 + $0x12a] sm:$0xff] }
 0x236   : > { %6578 = vmatprep.mubr.f32.mxu0 %v3908_v20  ;;  %6964 = vmatpush3.bf16.msra.mxu0 %v6961_v13  ;;  %v3924_v13 = vld [vmem:[#allocation2 + $0x139] sm:$0xff] }
 0x237   : > { %6259 = vmatmul.mubr.f32.gmra.mrb[6].mxu1 %v9564_v8  ;;  %6966 = vmatprep.subr.bf16.mxu0 %v6965_v17  ;;  %v4217_v20 = vld [vmem:[#allocation2 + $0x9a] sm:$0xff]  ;;  %v4219_v37 = vld [vmem:[#allocation2 + $0xb2] sm:$0xff] }
 0x238   : > { %6261 = vmatprep.mubr.f32.mxu1 %v9565_v49  ;;  %7028 = vmatpush3.bf16.msra.mxu1 %v9563_v43  ;;  %v4222_v43 = vld [vmem:[#allocation2 + $0xda] sm:$0xff]  ;;  %v4224_v8 = vld [vmem:[#allocation2 + $0xf2] sm:$0xff] }
 0x239   : > { %6579 = vmatmul.mubr.f32.gmra.mrb[6].mxu0 %v3909_v25  ;;  %7021 = vmatprep.subr.bf16.mxu1 %v9566_v6  ;;  %v4223_v25 = vld [vmem:[#allocation2 + $0xe2] sm:$0xff]  ;;  %v4227_v49 = vld [vmem:[#allocation2 + $0x112] sm:$0xff] }
 0x23a   : > { %6581 = vmatprep.mubr.f32.mxu0 %v3910_v44  ;;  %6968 = vmatpush3.bf16.msra.mxu0 %v6965_v17  ;;  %v4218_v17 = vld [vmem:[#allocation2 + $0xaa] sm:$0xff]  ;;  %v4225_v44 = vld [vmem:[#allocation2 + $0xfa] sm:$0xff] }
 0x23b   : > { %6262 = vmatmul.mubr.f32.gmra.mrb[8].mxu1 %v9567_v27  ;;  %6970 = vmatprep.subr.bf16.mxu0 %v6969_v47  ;;  %v4232_v27 = vld [vmem:[#allocation2 + $0x152] sm:$0xff] }
 0x23c   : > { %6264 = vmatprep.mubr.f32.mxu1 %v9568_v10  ;;  %7029 = vmatpush3.bf16.msra.mxu1 %v9566_v6  ;;  %v4230_v6 = vld [vmem:[#allocation2 + $0x13a] sm:$0xff]  ;;  %v4235_v10 = vld [vmem:[#allocation2 + $0x172] sm:$0xff] }
 0x23d   : > { %6582 = vmatmul.mubr.f32.gmra.mrb[8].mxu0 %v3911_v40  ;;  %7022 = vmatprep.subr.bf16.mxu1 %v9569_v0  ;;  %v4231_v40 = vld [vmem:[#allocation2 + $0x142] sm:$0xff] }
 0x23e   : > { %6584 = vmatprep.mubr.f32.mxu0 %v3912_v30  ;;  %6972 = vmatpush3.bf16.msra.mxu0 %v6969_v47  ;;  %v4226_v47 = vld [vmem:[#allocation2 + $0x10a] sm:$0xff]  ;;  %v4233_v30 = vld [vmem:[#allocation2 + $0x15a] sm:$0xff] }
 0x23f   : > { %6265 = vmatmul.mubr.f32.gmra.mrb[10].mxu1 %v9570_v11  ;;  %6974 = vmatprep.subr.bf16.mxu0 %v6973_v22 }
 0x240   : > { %6267 = vmatprep.mubr.f32.mxu1 %v9571_v34  ;;  %7030 = vmatpush3.bf16.msra.mxu1 %v9569_v0  ;;  %v9579_v0 = vld [vmem:[#allocation27_spill] sm:$0xff] }
 0x241   : > { %6585 = vmatmul.mubr.f32.gmra.mrb[10].mxu0 %v3913_v62  ;;  %7023 = vmatprep.subr.bf16.mxu1 %v9572_v28  ;;  %v4239_v62 = vld [vmem:[#allocation2 + $0x1a2] sm:$0xff] }
 0x242   : > { %6587 = vmatprep.mubr.f32.mxu0 %v3914_v16  ;;  %6976 = vmatpush3.bf16.msra.mxu0 %v6973_v22  ;;  %v4234_v22 = vld [vmem:[#allocation2 + $0x16a] sm:$0xff] }
 0x243   : > { %6268 = vmatmul.mubr.f32.gmra.mrb[12].mxu1 %v9573_v29  ;;  %6978 = vmatprep.subr.bf16.mxu0 %v6977_v33 }
 0x244   : > { %6270 = vmatprep.mubr.f32.mxu1 %v9574_v23  ;;  %7031 = vmatpush3.bf16.msra.mxu1 %v9572_v28 }
 0x245   : > { %6588 = vmatmul.mubr.f32.gmra.mrb[12].mxu0 %v3915_v12  ;;  %7024 = vmatprep.subr.bf16.mxu1 %v9575_v32 }
 0x246   : > { %6590 = vmatprep.mubr.f32.mxu0 %v3916_v14  ;;  %6980 = vmatpush3.bf16.msra.mxu0 %v6977_v33 }
 0x247   : > { %6271 = vmatmul.mubr.f32.gmra.mrb[14].mxu1 %v9576_v46  ;;  %6982 = vmatprep.subr.bf16.mxu0 %v6981_v19 }
 0x248   : > { %6273 = vmatprep.mubr.f32.mxu1 %v9577_v59  ;;  %7032 = vmatpush3.bf16.msra.mxu1 %v9575_v32 }
 0x249   : > { %6591 = vmatmul.mubr.f32.gmra.mrb[14].mxu0 %v3917_v38 }
 0x24a   : > { %6593 = vmatprep.mubr.f32.mxu0 %v3918_v51  ;;  %6984 = vmatpush3.bf16.msra.mxu0 %v6981_v19 }
 0x24b   : > { %6274 = vmatmul.mubr.f32.gmra.mrb[16].mxu1 %v8830_v26  ;;  %v3925_v26 = vld [vmem:[#allocation2 + $0x141] sm:$0xff] }
 0x24c   : > { %6276 = vmatprep.mubr.f32.mxu1 %v8838_v48  ;;  %v3926_v48 = vld [vmem:[#allocation2 + $0x151] sm:$0xff] }
 0x24d   : > { %6594 = vmatmul.mubr.f32.gmra.mrb[16].mxu0 %v3919_v5 }
 0x24e   : > { %6596 = vmatprep.mubr.f32.mxu0 %v3920_v50 }
 0x24f   : > { %6277 = vmatmul.mubr.f32.gmra.mrb[18].mxu1 %v8845_v60  ;;  %v3927_v60 = vld [vmem:[#allocation2 + $0x159] sm:$0xff] }
 0x250   : > { %6279 = vmatprep.mubr.f32.mxu1 %v8853_v42  ;;  %v3928_v42 = vld [vmem:[#allocation2 + $0x169] sm:$0xff] }
 0x251   : > { %6597 = vmatmul.mubr.f32.gmra.mrb[18].mxu0 %v3921_v18 }
 0x252   : > { %6599 = vmatprep.mubr.f32.mxu0 %v3922_v1 }
 0x253   : > { %6280 = vmatmul.mubr.f32.gmra.mrb[20].mxu1 %v8859_v31  ;;  %v3929_v31 = vld [vmem:[#allocation2 + $0x171] sm:$0xff] }
 0x254   : > { %6282 = vmatprep.mubr.f32.mxu1 %v8867_v21  ;;  %v3930_v21 = vld [vmem:[#allocation2 + $0x181] sm:$0xff] }
 0x255   : > { %6600 = vmatmul.mubr.f32.gmra.mrb[20].mxu0 %v3923_v2 }
 0x256   : > { %6602 = vmatprep.mubr.f32.mxu0 %v3924_v13 }
 0x257   : > { %6283 = vmatmul.mubr.f32.gmra.mrb[22].mxu1 %v8873_v63  ;;  %v3931_v63 = vld [vmem:[#allocation2 + $0x189] sm:$0xff] }
 0x258   : > { %6285 = vmatprep.mubr.f32.mxu1 %v8881_v39  ;;  %v3932_v39 = vld [vmem:[#allocation2 + $0x199] sm:$0xff] }
 0x259   : > { %6603 = vmatmul.mubr.f32.gmra.mrb[22].mxu0 %v3925_v26 }
 0x25a   : > { %6605 = vmatprep.mubr.f32.mxu0 %v3926_v48 }
 0x25b   : > { %6286 = vmatmul.mubr.f32.gmra.mrb[24].mxu1 %v8887_v58  ;;  %v3933_v58 = vld [vmem:[#allocation2 + $0x1a1] sm:$0xff] }
 0x25c   : > { %6288 = vmatprep.mubr.f32.mxu1 %v8895_v53  ;;  %v4208_v53 = vld [vmem:[#allocation2 + $0x32] sm:$0xff] }
 0x25d   : > { %6606 = vmatmul.mubr.f32.gmra.mrb[24].mxu0 %v3927_v60 }
 0x25e   : > { %6608 = vmatprep.mubr.f32.mxu0 %v3928_v42 }
 0x25f   : > { %6289 = vmatmul.mubr.f32.gmra.mrb[26].mxu1 %v8901_v35  ;;  %v4209_v35 = vld [vmem:[#allocation2 + $0x3a] sm:$0xff] }
 0x260   : > { %6291 = vmatprep.mubr.f32.mxu1 %v8909_v7  ;;  %v4210_v7 = vld [vmem:[#allocation2 + $0x4a] sm:$0xff] }
 0x261   : > { %6609 = vmatmul.mubr.f32.gmra.mrb[26].mxu0 %v3929_v31 }
 0x262   : > { %6611 = vmatprep.mubr.f32.mxu0 %v3930_v21 }
 0x263   : > { %6292 = vmatmul.mubr.f32.gmra.mrb[28].mxu1 %v8915_v45  ;;  %v4212_v45 = vld [vmem:[#allocation2 + $0x62] sm:$0xff] }
 0x264   : > { %6294 = vmatprep.mubr.f32.mxu1 %v8994_v41  ;;  %v4213_v41 = vld [vmem:[#allocation2 + $0x6a] sm:$0xff] }
 0x265   : > { %6612 = vmatmul.mubr.f32.gmra.mrb[28].mxu0 %v3931_v63 }
 0x266   : > { %6614 = vmatprep.mubr.f32.mxu0 %v3932_v39 }
 0x267   : > { %6295 = vmatmul.mubr.f32.gmra.mrb[30].mxu1 %v8999_v56  ;;  %v4215_v56 = vld [vmem:[#allocation2 + $0x82] sm:$0xff] }
 0x268   : > { %6353 = vmatprep.mubr.f32.mxu1 %v3916_v14 }
 0x269   : > { %6615 = vmatmul.mubr.f32.gmra.mrb[30].mxu0 %v3933_v58 }
 0x26a   : > { %6649 = vmatprep.mubr.f32.mxu0 %v4208_v53 }
 0x26b   : > { %6354 = vmatmul.mubr.f32.vlgmr.msra.gmra.mrb[16].mxu1 %v3917_v38 }
 0x26c   : > { %6356 = vmatprep.mubr.f32.mxu1 %v3918_v51 }
 0x26d   : > { %6650 = vmatmul.mubr.f32.vlgmr.msra.gmra.mrb[0].mxu0 %v4209_v35 }
 0x26e   : > { %6652 = vmatprep.mubr.f32.mxu0 %v4210_v7 }
 0x26f   : > { %6357 = vmatmul.mubr.f32.gmra.mrb[18].mxu1 %v3919_v5 }
 0x270   : > { %6359 = vmatprep.mubr.f32.mxu1 %v3920_v50 }
 0x271   : > { %6653 = vmatmul.mubr.f32.gmra.mrb[2].mxu0 %v4211_v36 }
 0x272   : > { %6655 = vmatprep.mubr.f32.mxu0 %v4212_v45 }
 0x273   : > { %6360 = vmatmul.mubr.f32.gmra.mrb[20].mxu1 %v3921_v18  ;;  %v9139_v18 = vld [vmem:[%s9494_s12] ss:$0 sm:$0xff] }
 0x274   : > { %6362 = vmatprep.mubr.f32.mxu1 %v3922_v1 }
 0x275   : > { %6656 = vmatmul.mubr.f32.gmra.mrb[4].mxu0 %v4213_v41 }
 0x276   : > { %6658 = vmatprep.mubr.f32.mxu0 %v4214_v57 }
 0x277   : > { %6363 = vmatmul.mubr.f32.gmra.mrb[22].mxu1 %v3923_v2 }
 0x278   : > { %6365 = vmatprep.mubr.f32.mxu1 %v3924_v13 }
 0x279   : > { %6659 = vmatmul.mubr.f32.gmra.mrb[6].mxu0 %v4215_v56 }
 0x27a   : > { %6661 = vmatprep.mubr.f32.mxu0 %v4216_v15 }
 0x27b   : > { %6366 = vmatmul.mubr.f32.gmra.mrb[24].mxu1 %v3925_v26 }
 0x27c   : > { %6368 = vmatprep.mubr.f32.mxu1 %v3926_v48 }
 0x27d   : > { %6662 = vmatmul.mubr.f32.gmra.mrb[8].mxu0 %v4217_v20 }
 0x27e   : > { %6664 = vmatprep.mubr.f32.mxu0 %v4218_v17 }
 0x27f   : > { %6369 = vmatmul.mubr.f32.gmra.mrb[26].mxu1 %v3927_v60 }
 0x280   : > { %6371 = vmatprep.mubr.f32.mxu1 %v3928_v42 }
 0x281   : > { %6665 = vmatmul.mubr.f32.gmra.mrb[10].mxu0 %v4219_v37 }
 0x282   : > { %6667 = vmatprep.mubr.f32.mxu0 %v4220_v24 }
 0x283   : > { %6372 = vmatmul.mubr.f32.gmra.mrb[28].mxu1 %v3929_v31 }
 0x284   : > { %6374 = vmatprep.mubr.f32.mxu1 %v3930_v21 }
 0x285   : > { %6668 = vmatmul.mubr.f32.gmra.mrb[12].mxu0 %v4221_v3 }
 0x286   : > { %6670 = vmatprep.mubr.f32.mxu0 %v4222_v43 }
 0x287   : > { %6375 = vmatmul.mubr.f32.gmra.mrb[30].mxu1 %v3931_v63 }
 0x289   : > { %6671 = vmatmul.mubr.f32.gmra.mrb[14].mxu0 %v4223_v25 }
 0x28a   : > { %6673 = vmatprep.mubr.f32.mxu0 %v4224_v8 }
 0x28d   : > { %6674 = vmatmul.mubr.f32.gmra.mrb[16].mxu0 %v4225_v44 }
 0x28e   : > { %6676 = vmatprep.mubr.f32.mxu0 %v4226_v47 }
 0x291   : > { %6677 = vmatmul.mubr.f32.gmra.mrb[18].mxu0 %v4227_v49 }
 0x292   : > { %6679 = vmatprep.mubr.f32.mxu0 %v4228_v4 }
 0x295   : > { %6680 = vmatmul.mubr.f32.gmra.mrb[20].mxu0 %v4229_v9 }
 0x296   : > { %6682 = vmatprep.mubr.f32.mxu0 %v4230_v6 }
 0x299   : > { %6683 = vmatmul.mubr.f32.gmra.mrb[22].mxu0 %v4231_v40 }
 0x29a   : > { %6685 = vmatprep.mubr.f32.mxu0 %v4232_v27 }
 0x29d   : > { %6686 = vmatmul.mubr.f32.gmra.mrb[24].mxu0 %v4233_v30 }
 0x29e   : > { %6688 = vmatprep.mubr.f32.mxu0 %v4234_v22 }
 0x2a1   : > { %6689 = vmatmul.mubr.f32.gmra.mrb[26].mxu0 %v4235_v10 }
 0x2a2   : > { %6691 = vmatprep.mubr.f32.mxu0 %v9578_v54 }
 0x2a5   : > { %6692 = vmatmul.mubr.f32.gmra.mrb[28].mxu0 %v9579_v0 }
 0x2a6   : > { %6694 = vmatprep.mubr.f32.mxu0 %v4238_v55 }
 0x2a9   : > { %6695 = vmatmul.mubr.f32.gmra.mrb[30].mxu0 %v4239_v62 }
 0x2fe   : > { %v6251_v11 = vpop.f32.mrb[0].mxu1 }
 0x2ff   : > { %v2793_v16 = vpop.f32.mrb[1].mxu1 }
 0x302   : > { %v6254_v33 = vpop.f32.mrb[2].mxu1 }
 0x303   : > { %v2803_v34 = vpop.f32.mrb[3].mxu1 }
 0x306   : > { %v6257_v52 = vpop.f32.mrb[4].mxu1 }
 0x307   : > { %v2813_v61 = vpop.f32.mrb[5].mxu1 }
 0x30a   : > { %v6260_v28 = vpop.f32.mrb[6].mxu1 }
 0x30b   : > { %v2823_v12 = vpop.f32.mrb[7].mxu1 }
 0x30e   : > { %v6263_v29 = vpop.f32.mrb[8].mxu1 }
 0x30f   : > { %v2833_v14 = vpop.f32.mrb[9].mxu1 }
 0x312   : > { %v9120_v19 = vpop.f32.mrb[10].mxu1 }
 0x313   : > { %v9122_v23 = vpop.f32.mrb[11].mxu1 }
 0x316   : > { %v9124_v32 = vpop.f32.mrb[12].mxu1 }
 0x317   : > { %v9126_v38 = vpop.f32.mrb[13].mxu1 }
 0x31a   : > { %v9128_v46 = vpop.f32.mrb[14].mxu1 }
 0x31b   : > { %v9130_v51 = vpop.f32.mrb[15].mxu1 }
 0x33e   : > { %v9132_v59 = vpop.f32.mrb[16].mxu1 }
 0x33f   : > { %v9134_v5 = vpop.f32.mrb[17].mxu1 }
 0x340   : > { %v6651_v50 = vpop.f32.mrb[0].mxu0 }
 0x341   : > { %v7033_v1 = vadd.f32 %v6651_v50, %v6251_v11  ;;  %v4323_v2 = vpop.f32.mrb[1].mxu0 }
 0x342   : > { %v7034_v13 = vadd.f32 %v4323_v2, %v2793_v16  ;;  %v9141_v26 = vpop.f32.mrb[18].mxu1 }
 0x343   : > { %v9144_v48 = vadd.f32 %v7033_v1, %v9139_v18  ;;  %v9146_v60 = vpop.f32.mrb[19].mxu1 }
 0x344   : > { %v9149_v42 = vadd.f32 %v7034_v13, %v9139_v18  ;;  %v6654_v31 = vpop.f32.mrb[2].mxu0 }
 0x345   : > { %v7035_v21 = vadd.f32 %v6654_v31, %v6254_v33  ;;  %v4333_v63 = vpop.f32.mrb[3].mxu0  ;;  %v4554_v39 = vmul.f32 %v9144_v48, %v9144_v48 }
 0x346   : > { %v7036_v58 = vadd.f32 %v4333_v63, %v2803_v34  ;;  %v9153_v53 = vpop.f32.mrb[20].mxu1  ;;  %v4553_v35 = vmul.f32 %v9149_v42, %v9149_v42 }
 0x347   : > { %v9158_v7 = vadd.f32 %v7035_v21, %v9139_v18  ;;  %v9160_v36 = vpop.f32.mrb[21].mxu1  ;;  %4619 = vrot.lane.b32.xlu1 %v4554_v39, %s9548_s6 }
 0x348   : > { %v9164_v45 = vadd.f32 %v7036_v58, %v9139_v18  ;;  %4617 = vrot.lane.b32.xlu0 %v4553_v35, %s9548_s6  ;;  %v6657_v41 = vpop.f32.mrb[4].mxu0 }
 0x349   : > { %v7037_v57 = vadd.f32 %v6657_v41, %v6257_v52  ;;  %v4343_v56 = vpop.f32.mrb[5].mxu0  ;;  %v4556_v15 = vmul.f32 %v9158_v7, %v9158_v7 }
 0x34a   : > { %v7038_v20 = vadd.f32 %v4343_v56, %v2813_v61  ;;  %v9169_v17 = vpop.f32.mrb[22].mxu1  ;;  %v4555_v37 = vmul.f32 %v9164_v45, %v9164_v45 }
 0x34b   : > { %v9174_v24 = vadd.f32 %v7037_v57, %v9139_v18  ;;  %v9176_v3 = vpop.f32.mrb[23].mxu1  ;;  %4623 = vrot.lane.b32.xlu1 %v4556_v15, %s9548_s6 }
 0x34c   : > { %v9180_v43 = vadd.f32 %v7038_v20, %v9139_v18  ;;  %4621 = vrot.lane.b32.xlu0 %v4555_v37, %s9548_s6  ;;  %v6660_v25 = vpop.f32.mrb[6].mxu0 }
 0x34d   : > { %v7039_v8 = vadd.f32 %v6660_v25, %v6260_v28  ;;  %v4353_v44 = vpop.f32.mrb[7].mxu0  ;;  %v4558_v47 = vmul.f32 %v9174_v24, %v9174_v24 }
 0x34e   : > { %v7040_v49 = vadd.f32 %v4353_v44, %v2823_v12  ;;  %v9185_v4 = vpop.f32.mrb[24].mxu1  ;;  %v4557_v9 = vmul.f32 %v9180_v43, %v9180_v43 }
 0x34f   : > { %v9190_v6 = vadd.f32 %v7039_v8, %v9139_v18  ;;  %v9192_v40 = vpop.f32.mrb[25].mxu1  ;;  %4627 = vrot.lane.b32.xlu1 %v4558_v47, %s9548_s6 }
 0x350   : > { %v9196_v27 = vadd.f32 %v7040_v49, %v9139_v18  ;;  %4625 = vrot.lane.b32.xlu0 %v4557_v9, %s9548_s6  ;;  %v6663_v30 = vpop.f32.mrb[8].mxu0 }
 0x351   : > { %v7041_v22 = vadd.f32 %v6663_v30, %v6263_v29  ;;  %v4363_v10 = vpop.f32.mrb[9].mxu0  ;;  %v4560_v54 = vmul.f32 %v9190_v6, %v9190_v6 }
 0x352   : > { %v7042_v55 = vadd.f32 %v4363_v10, %v2833_v14  ;;  %v9201_v0 = vpop.f32.mrb[26].mxu1  ;;  %v4559_v62 = vmul.f32 %v9196_v27, %v9196_v27 }
 0x353   : > { %v9206_v11 = vadd.f32 %v7041_v22, %v9139_v18  ;;  %v9208_v16 = vpop.f32.mrb[27].mxu1  ;;  %4631 = vrot.lane.b32.xlu1 %v4560_v54, %s9548_s6 }
 0x354   : > { %v9212_v33 = vadd.f32 %v7042_v55, %v9139_v18  ;;  %4629 = vrot.lane.b32.xlu0 %v4559_v62, %s9548_s6  ;;  %v6666_v34 = vpop.f32.mrb[10].mxu0 }
 0x355   : > { %v7043_v52 = vadd.f32 %v6666_v34, %v9120_v19  ;;  %v4373_v61 = vpop.f32.mrb[11].mxu0  ;;  %v4562_v28 = vmul.f32 %v9206_v11, %v9206_v11 }
 0x356   : > { %v7044_v12 = vadd.f32 %v4373_v61, %v9122_v23  ;;  %v9219_v29 = vpop.f32.mrb[28].mxu1  ;;  %v4561_v14 = vmul.f32 %v9212_v33, %v9212_v33 }
 0x357   : > { %v9224_v50 = vadd.f32 %v7043_v52, %v9139_v18  ;;  %v9226_v1 = vpop.f32.mrb[29].mxu1  ;;  %4635 = vrot.lane.b32.xlu1 %v4562_v28, %s9548_s6 }
 0x358   : > { %v9230_v19 = vadd.f32 %v7044_v12, %v9139_v18  ;;  %4633 = vrot.lane.b32.xlu0 %v4561_v14, %s9548_s6  ;;  %v6669_v2 = vpop.f32.mrb[12].mxu0 }
 0x359   : > { %v7045_v23 = vadd.f32 %v6669_v2, %v9124_v32  ;;  %v4383_v13 = vpop.f32.mrb[13].mxu0  ;;  %v4564_v31 = vmul.f32 %v9224_v50, %v9224_v50 }
 0x35a   : > { %v7046_v21 = vadd.f32 %v4383_v13, %v9126_v38  ;;  %v9237_v63 = vpop.f32.mrb[30].mxu1  ;;  %v4563_v39 = vmul.f32 %v9230_v19, %v9230_v19 }
 0x35b   : > { %v9242_v58 = vadd.f32 %v7045_v23, %v9139_v18  ;;  %v9244_v35 = vpop.f32.mrb[31].mxu1  ;;  %4639 = vrot.lane.b32.xlu1 %v4564_v31, %s9548_s6 }
 0x35c   : > { %v9248_v32 = vadd.f32 %v7046_v21, %v9139_v18  ;;  %4637 = vrot.lane.b32.xlu0 %v4563_v39, %s9548_s6  ;;  %v6672_v41 = vpop.f32.mrb[14].mxu0 }
 0x35d   : > { %v7047_v38 = vadd.f32 %v6672_v41, %v9128_v46  ;;  %v4393_v57 = vpop.f32.mrb[15].mxu0  ;;  %v4566_v56 = vmul.f32 %v9242_v58, %v9242_v58 }
 0x35e   : > { %v7048_v15 = vadd.f32 %v4393_v57, %v9130_v51  ;;  %v4565_v20 = vmul.f32 %v9248_v32, %v9248_v32 }
 0x35f   : > { %v9258_v37 = vadd.f32 %v7047_v38, %v9139_v18  ;;  %4643 = vrot.lane.b32.xlu1 %v4566_v56, %s9548_s6 }
 0x360   : > { %v9262_v25 = vadd.f32 %v7048_v15, %v9139_v18  ;;  %4641 = vrot.lane.b32.xlu0 %v4565_v20, %s9548_s6  ;;  %v6675_v46 = vpop.f32.mrb[16].mxu0 }
 0x361   : > { %v7049_v8 = vadd.f32 %v6675_v46, %v9132_v59  ;;  %v4403_v44 = vpop.f32.mrb[17].mxu0 }
 0x362   : > { %v7050_v47 = vadd.f32 %v4403_v44, %v9134_v5 }
 0x363   : > { %v9268_v51 = vadd.f32 %v7049_v8, %v9139_v18 }
 0x364   : > { %v9271_v49 = vadd.f32 %v7050_v47, %v9139_v18  ;;  %v6678_v9 = vpop.f32.mrb[18].mxu0 }
 0x365   : > { %v7051_v30 = vadd.f32 %v6678_v9, %v9141_v26  ;;  %v4413_v22 = vpop.f32.mrb[19].mxu0  ;;  %v4570_v10 = vmul.f32 %v9268_v51, %v9268_v51 }
 0x366   : > { %v7052_v54 = vadd.f32 %v4413_v22, %v9146_v60  ;;  %v4569_v59 = vmul.f32 %v9271_v49, %v9271_v49 }
 0x367   : > { %v9280_v5 = vadd.f32 %v7051_v30, %v9139_v18  ;;  %4651 = vrot.lane.b32.xlu1 %v4570_v10, %s9548_s6 }
 0x368   : > { %v9284_v55 = vadd.f32 %v7052_v54, %v9139_v18  ;;  %4649 = vrot.lane.b32.xlu0 %v4569_v59, %s9548_s6  ;;  %v6681_v26 = vpop.f32.mrb[20].mxu0 }
 0x369   : > { %v7053_v62 = vadd.f32 %v6681_v26, %v9153_v53  ;;  %v4423_v34 = vpop.f32.mrb[21].mxu0  ;;  %v4572_v60 = vmul.f32 %v9280_v5, %v9280_v5 }
 0x36a   : > { %v7054_v52 = vadd.f32 %v4423_v34, %v9160_v36  ;;  %v4571_v61 = vmul.f32 %v9284_v55, %v9284_v55 }
 0x36b   : > { %v9294_v28 = vadd.f32 %v7053_v62, %v9139_v18  ;;  %4655 = vrot.lane.b32.xlu1 %v4572_v60, %s9548_s6 }
 0x36c   : > { %v9298_v12 = vadd.f32 %v7054_v52, %v9139_v18  ;;  %4653 = vrot.lane.b32.xlu0 %v4571_v61, %s9548_s6  ;;  %v6684_v53 = vpop.f32.mrb[22].mxu0 }
 0x36d   : > { %v7055_v14 = vadd.f32 %v6684_v53, %v9169_v17  ;;  %v4433_v2 = vpop.f32.mrb[23].mxu0  ;;  %v4574_v36 = vmul.f32 %v9294_v28, %v9294_v28  ;;  %v7548_v53 = vmov 1.0  }
 0x36e   : > { %v7056_v23 = vadd.f32 %v4433_v2, %v9176_v3  ;;  %v4573_v13 = vmul.f32 %v9298_v12, %v9298_v12  ;;  %4809 = vmatprep.mubr.f32.mxu1 %v7548_v53 }
 0x36f   : > { %v9308_v31 = vadd.f32 %v7055_v14, %v9139_v18  ;;  %4659 = vrot.lane.b32.xlu1 %v4574_v36, %s9548_s6  ;;  %v4567_v36 = vmul.f32 %v9262_v25, %v9262_v25 }
 0x370   : > { %v9312_v21 = vadd.f32 %v7056_v23, %v9139_v18  ;;  %4657 = vrot.lane.b32.xlu0 %v4573_v13, %s9548_s6  ;;  %v6687_v17 = vpop.f32.mrb[24].mxu0 }
 0x371   : > { %v7057_v39 = vadd.f32 %v6687_v17, %v9185_v4  ;;  %v4443_v41 = vpop.f32.mrb[25].mxu0  ;;  %v4576_v3 = vmul.f32 %v9308_v31, %v9308_v31 }
 0x372   : > { %v7058_v38 = vadd.f32 %v4443_v41, %v9192_v40  ;;  %v4575_v57 = vmul.f32 %v9312_v21, %v9312_v21 }
 0x373   : > { %v9322_v56 = vadd.f32 %v7057_v39, %v9139_v18  ;;  %4663 = vrot.lane.b32.xlu1 %v4576_v3, %s9548_s6 }
 0x374   : > { %v9326_v15 = vadd.f32 %v7058_v38, %v9139_v18  ;;  %4661 = vrot.lane.b32.xlu0 %v4575_v57, %s9548_s6  ;;  %v6690_v4 = vpop.f32.mrb[26].mxu0 }
 0x375   : > { %v7059_v20 = vadd.f32 %v6690_v4, %v9201_v0  ;;  %v4453_v46 = vpop.f32.mrb[27].mxu0  ;;  %v4578_v40 = vmul.f32 %v9322_v56, %v9322_v56 }
 0x376   : > { %v7060_v8 = vadd.f32 %v4453_v46, %v9208_v16  ;;  %v4577_v44 = vmul.f32 %v9326_v15, %v9326_v15 }
 0x377   : > { %v9336_v47 = vadd.f32 %v7059_v20, %v9139_v18  ;;  %4667 = vrot.lane.b32.xlu1 %v4578_v40, %s9548_s6 }
 0x378   : > { %v9340_v9 = vadd.f32 %v7060_v8, %v9139_v18  ;;  %4665 = vrot.lane.b32.xlu0 %v4577_v44, %s9548_s6  ;;  %v6693_v0 = vpop.f32.mrb[28].mxu0 }
 0x379   : > { %v7061_v30 = vadd.f32 %v6693_v0, %v9219_v29  ;;  %v4463_v22 = vpop.f32.mrb[29].mxu0  ;;  %v4580_v16 = vmul.f32 %v9336_v47, %v9336_v47 }
 0x37a   : > { %v7062_v10 = vadd.f32 %v4463_v22, %v9226_v1  ;;  %v4579_v54 = vmul.f32 %v9340_v9, %v9340_v9 }
 0x37b   : > { %v9350_v59 = vadd.f32 %v7061_v30, %v9139_v18  ;;  %4671 = vrot.lane.b32.xlu1 %v4580_v16, %s9548_s6 }
 0x37c   : > { %v9354_v26 = vadd.f32 %v7062_v10, %v9139_v18  ;;  %4669 = vrot.lane.b32.xlu0 %v4579_v54, %s9548_s6  ;;  %v6696_v29 = vpop.f32.mrb[30].mxu0 }
 0x37d   : > { %v4582_v62 = vmul.f32 %v9350_v59, %v9350_v59  ;;  %v7063_v34 = vadd.f32 %v6696_v29, %v9237_v63  ;;  %v4473_v1 = vpop.f32.mrb[31].mxu0 }
 0x37e   : > { %v4581_v60 = vmul.f32 %v9354_v26, %v9354_v26  ;;  %v7064_v52 = vadd.f32 %v4473_v1, %v9244_v35  ;;  %v4568_v35 = vmul.f32 %v9258_v37, %v9258_v37 }
 0x37f   : > { %v9364_v61 = vadd.f32 %v7063_v34, %v9139_v18  ;;  %4675 = vrot.lane.b32.xlu1 %v4582_v62, %s9548_s6 }
 0x380   : > { %v9369_v14 = vadd.f32 %v7064_v52, %v9139_v18  ;;  %4673 = vrot.lane.b32.xlu0 %v4581_v60, %s9548_s6 }
 0x381   : > { %v4584_v63 = vmul.f32 %v9364_v61, %v9364_v61 }
 0x382   : > { %v4583_v2 = vmul.f32 %v9369_v14, %v9369_v14 }
 0x383   : > { %4679 = vrot.lane.b32.xlu1 %v4584_v63, %s9548_s6 }
 0x384   : > { %4677 = vrot.lane.b32.xlu0 %v4583_v2, %s9548_s6 }
 0x387   : > { %4647 = vrot.lane.b32.xlu1 %v4568_v35, %s9548_s6 }
 0x388   : > { %4645 = vrot.lane.b32.xlu0 %v4567_v36, %s9548_s6  ;;  %s9580_s6 = sshll.u32 %s9587_s3, 7 }
 0x389   : > { %s9454_s2 = scalar_lea.vmem %s9495_s13, %s9580_s6 }
 0x3b9   : > { %v4620_v18 = vpop.permute.xlu1 %4619 }
 0x3ba   : > { %v4618_v23 = vpop.permute.xlu0 %4617  ;;  %v4714_v41 = vsel %vm1416_vm1, %v9144_v48, %v4620_v18 }
 0x3bb   : > { %v4713_v13 = vsel %vm1416_vm1, %v9149_v42, %v4618_v23 }
 0x3bc   : > { %4816 = vxpose.xlu0.b32.start [1/16] (narrow) %v4713_v13, 64 }
 0x3bd   : > { %v4624_v17 = vpop.permute.xlu1 %4623 }
 0x3be   : > { %v4622_v39 = vpop.permute.xlu0 %4621  ;;  %v4716_v46 = vsel %vm1416_vm1, %v9158_v7, %v4624_v17 }
 0x3bf   : > { %v4715_v57 = vsel %vm1416_vm1, %v9164_v45, %v4622_v39 }
 0x3c0   : > { %4817 = vxpose.xlu0.b32.cont [2/16] (narrow) %v4714_v41, 64 }
 0x3c1   : > { %v4628_v3 = vpop.permute.xlu1 %4627 }
 0x3c2   : > { %v4626_v38 = vpop.permute.xlu0 %4625  ;;  %v4718_v48 = vsel %vm1416_vm1, %v9174_v24, %v4628_v3 }
 0x3c3   : > { %v4717_v8 = vsel %vm1416_vm1, %v9180_v43, %v4626_v38 }
 0x3c4   : > { %4818 = vxpose.xlu0.b32.cont [3/16] (narrow) %v4715_v57, 64 }
 0x3c5   : > { %v4632_v4 = vpop.permute.xlu1 %4631 }
 0x3c6   : > { %v4630_v20 = vpop.permute.xlu0 %4629  ;;  %v4720_v7 = vsel %vm1416_vm1, %v9190_v6, %v4632_v4 }
 0x3c7   : > { %v4719_v45 = vsel %vm1416_vm1, %v9196_v27, %v4630_v20  ;;  %v6987_v27 = vpack.c.bf16 %v4714_v41, %v4713_v13 }
 0x3c8   : > { %4819 = vxpose.xlu0.b32.cont [4/16] (narrow) %v4716_v46, 64 }
 0x3c9   : > { %v4636_v42 = vpop.permute.xlu1 %4635 }
 0x3ca   : > { %v4634_v40 = vpop.permute.xlu0 %4633 }
 0x3cb   : > { %v4721_v24 = vsel %vm1416_vm1, %v9212_v33, %v4634_v40 }
 0x3cc   : > { %4820 = vxpose.xlu0.b32.cont [5/16] (narrow) %v4717_v8, 64 }
 0x3cd   : > { %v4640_v44 = vpop.permute.xlu1 %4639 }
 0x3ce   : > { %v4638_v0 = vpop.permute.xlu0 %4637 }
 0x3d0   : > { %4821 = vxpose.xlu0.b32.cont [6/16] (narrow) %v4718_v48, 64 }
 0x3d1   : > { %v4644_v30 = vpop.permute.xlu1 %4643 }
 0x3d2   : > { %v4642_v22 = vpop.permute.xlu0 %4641 }
 0x3d4   : > { %4822 = vxpose.xlu0.b32.cont [7/16] (narrow) %v4719_v45, 64 }
 0x3d8   : > { %4823 = vxpose.xlu0.b32.cont [8/16] (narrow) %v4720_v7, 64 }
 0x3d9   : > { %v4652_v16 = vpop.permute.xlu1 %4651 }
 0x3da   : > { %v4730_v43 = vsel %vm1416_vm1, %v9268_v51, %v4652_v16  ;;  %v4650_v10 = vpop.permute.xlu0 %4649  ;;  %v4722_v51 = vsel %vm1416_vm1, %v9206_v11, %v4636_v42 }
 0x3db   : > { %v4729_v54 = vsel %vm1416_vm1, %v9271_v49, %v4650_v10  ;;  %v6991_v49 = vpack.c.bf16 %v4716_v46, %v4715_v57 }
 0x3dc   : > { %v6985_v29 = vpack.c.bf16 %v4730_v43, %v4729_v54  ;;  %4848 = vxpose.xlu1.b32.start [1/16] (narrow) %v4729_v54, 64  ;;  %4824 = vxpose.xlu0.b32.cont [9/16] (narrow) %v4721_v24, 64 }
 0x3dd   : > { %v4656_v62 = vpop.permute.xlu1 %4655 }
 0x3de   : > { %v4732_v6 = vsel %vm1416_vm1, %v9280_v5, %v4656_v62  ;;  %6986 = vmatprep.subr.bf16.mxu1 %v6985_v29  ;;  %v4654_v34 = vpop.permute.xlu0 %4653  ;;  %v4723_v5 = vsel %vm1416_vm1, %v9230_v19, %v4638_v0 }
 0x3df   : > { %v4731_v1 = vsel %vm1416_vm1, %v9284_v55, %v4654_v34  ;;  %6988 = vmatpush3.bf16.msra.mxu1 %v6987_v27  ;;  %v6995_v55 = vpack.c.bf16 %v4718_v48, %v4717_v8 }
 0x3e0   : > { %v6989_v33 = vpack.c.bf16 %v4732_v6, %v4731_v1  ;;  %4849 = vxpose.xlu1.b32.cont [2/16] (narrow) %v4730_v43, 64  ;;  %4825 = vxpose.xlu0.b32.cont [10/16] (narrow) %v4722_v51, 64 }
 0x3e1   : > { %v4660_v60 = vpop.permute.xlu1 %4659 }
 0x3e2   : > { %v4734_v52 = vsel %vm1416_vm1, %v9294_v28, %v4660_v60  ;;  %6990 = vmatprep.subr.bf16.mxu1 %v6989_v33  ;;  %v4658_v63 = vpop.permute.xlu0 %4657  ;;  %v4724_v28 = vsel %vm1416_vm1, %v9224_v50, %v4640_v44 }
 0x3e3   : > { %v4733_v11 = vsel %vm1416_vm1, %v9298_v12, %v4658_v63  ;;  %6992 = vmatpush3.bf16.msra.mxu1 %v6991_v49  ;;  %v6999_v12 = vpack.c.bf16 %v4720_v7, %v4719_v45 }
 0x3e4   : > { %v6993_v2 = vpack.c.bf16 %v4734_v52, %v4733_v11  ;;  %4850 = vxpose.xlu1.b32.cont [3/16] (narrow) %v4731_v1, 64  ;;  %4826 = vxpose.xlu0.b32.cont [11/16] (narrow) %v4723_v5, 64 }
 0x3e5   : > { %v4664_v35 = vpop.permute.xlu1 %4663 }
 0x3e6   : > { %v4736_v36 = vsel %vm1416_vm1, %v9308_v31, %v4664_v35  ;;  %6994 = vmatprep.subr.bf16.mxu1 %v6993_v2  ;;  %v4662_v18 = vpop.permute.xlu0 %4661  ;;  %v4725_v31 = vsel %vm1416_vm1, %v9248_v32, %v4642_v22 }
 0x3e7   : > { %v4735_v19 = vsel %vm1416_vm1, %v9312_v21, %v4662_v18  ;;  %6996 = vmatpush3.bf16.msra.mxu1 %v6995_v55  ;;  %v7003_v21 = vpack.c.bf16 %v4722_v51, %v4721_v24 }
 0x3e8   : > { %v6997_v23 = vpack.c.bf16 %v4736_v36, %v4735_v19  ;;  %4851 = vxpose.xlu1.b32.cont [4/16] (narrow) %v4732_v6, 64  ;;  %4827 = vxpose.xlu0.b32.cont [12/16] (narrow) %v4724_v28, 64 }
 0x3e9   : > { %v4668_v13 = vpop.permute.xlu1 %4667 }
 0x3ea   : > { %v4738_v17 = vsel %vm1416_vm1, %v9322_v56, %v4668_v13  ;;  %6998 = vmatprep.subr.bf16.mxu1 %v6997_v23  ;;  %v4666_v39 = vpop.permute.xlu0 %4665  ;;  %v4726_v56 = vsel %vm1416_vm1, %v9242_v58, %v4644_v30 }
 0x3eb   : > { %v4737_v50 = vsel %vm1416_vm1, %v9326_v15, %v4666_v39  ;;  %7000 = vmatpush3.bf16.msra.mxu1 %v6999_v12  ;;  %v7007_v15 = vpack.c.bf16 %v4724_v28, %v4723_v5  ;;  %v7011_v58 = vpack.c.bf16 %v4726_v56, %v4725_v31 }
 0x3ec   : > { %v7001_v41 = vpack.c.bf16 %v4738_v17, %v4737_v50  ;;  %4852 = vxpose.xlu1.b32.cont [5/16] (narrow) %v4733_v11, 64  ;;  %4828 = vxpose.xlu0.b32.cont [13/16] (narrow) %v4725_v31, 64 }
 0x3ed   : > { %v4672_v3 = vpop.permute.xlu1 %4671 }
 0x3ee   : > { %v4740_v38 = vsel %vm1416_vm1, %v9336_v47, %v4672_v3  ;;  %7002 = vmatprep.subr.bf16.mxu1 %v7001_v41  ;;  %v4670_v57 = vpop.permute.xlu0 %4669 }
 0x3ef   : > { %v4739_v32 = vsel %vm1416_vm1, %v9340_v9, %v4670_v57  ;;  %7004 = vmatpush3.bf16.msra.mxu1 %v7003_v21 }
 0x3f0   : > { %v7005_v4 = vpack.c.bf16 %v4740_v38, %v4739_v32  ;;  %4853 = vxpose.xlu1.b32.cont [6/16] (narrow) %v4734_v52, 64  ;;  %4829 = vxpose.xlu0.b32.cont [14/16] (narrow) %v4726_v56, 64 }
 0x3f1   : > { %v4676_v20 = vpop.permute.xlu1 %4675 }
 0x3f2   : > { %v4742_v46 = vsel %vm1416_vm1, %v9350_v59, %v4676_v20  ;;  %7006 = vmatprep.subr.bf16.mxu1 %v7005_v4  ;;  %v4674_v42 = vpop.permute.xlu0 %4673 }
 0x3f3   : > { %v4741_v47 = vsel %vm1416_vm1, %v9354_v26, %v4674_v42  ;;  %7008 = vmatpush3.bf16.msra.mxu1 %v7007_v15 }
 0x3f4   : > { %v7009_v40 = vpack.c.bf16 %v4742_v46, %v4741_v47  ;;  %4854 = vxpose.xlu1.b32.cont [7/16] (narrow) %v4735_v19, 64 }
 0x3f5   : > { %v4680_v8 = vpop.permute.xlu1 %4679 }
 0x3f6   : > { %v4744_v9 = vsel %vm1416_vm1, %v9364_v61, %v4680_v8  ;;  %7010 = vmatprep.subr.bf16.mxu1 %v7009_v40  ;;  %v4678_v48 = vpop.permute.xlu0 %4677 }
 0x3f7   : > { %v4743_v44 = vsel %vm1416_vm1, %v9369_v14, %v4678_v48  ;;  %7012 = vmatpush3.bf16.msra.mxu1 %v7011_v58 }
 0x3f8   : > { %v7013_v59 = vpack.c.bf16 %v4744_v9, %v4743_v44  ;;  %4855 = vxpose.xlu1.b32.cont [8/16] (narrow) %v4736_v36, 64 }
 0x3f9   : > { %v4648_v0 = vpop.permute.xlu1 %4647 }
 0x3fa   : > { %v4728_v26 = vsel %vm1416_vm1, %v9258_v37, %v4648_v0  ;;  %7014 = vmatprep.subr.bf16.mxu1 %v7013_v59  ;;  %v4646_v45 = vpop.permute.xlu0 %4645 }
 0x3fb   : > { %v4727_v30 = vsel %vm1416_vm1, %v9262_v25, %v4646_v45 }
 0x3fc   : > { %v7015_v22 = vpack.c.bf16 %v4728_v26, %v4727_v30  ;;  %4856 = vxpose.xlu1.b32.cont [9/16] (narrow) %v4737_v50, 64  ;;  %4830 = vxpose.xlu0.b32.cont [15/16] (narrow) %v4727_v30, 64 }
 0x3fe   : > { %7016 = vmatpush3.bf16.msra.mxu1 %v7015_v22 }
 0x400   : > { %4857 = vxpose.xlu1.b32.cont [10/16] (narrow) %v4738_v17, 64  ;;  %4831 = vxpose.xlu0.b32.end [16/16] (narrow) %v4728_v26, 64 }
 0x401   : > { %4810 = vmatmul.mubr.f32.vlgmr.msra.gmra.mrb[32].mxu1 %v7548_v53 }
 0x404   : > { %4858 = vxpose.xlu1.b32.cont [11/16] (narrow) %v4739_v32, 64 }
 0x408   : > { %4859 = vxpose.xlu1.b32.cont [12/16] (narrow) %v4740_v38, 64 }
 0x40c   : > { %4860 = vxpose.xlu1.b32.cont [13/16] (narrow) %v4741_v47, 64 }
 0x410   : > { %4861 = vxpose.xlu1.b32.cont [14/16] (narrow) %v4742_v46, 64 }
 0x414   : > { %4862 = vxpose.xlu1.b32.cont [15/16] (narrow) %v4743_v44, 64 }
 0x418   : > { %4863 = vxpose.xlu1.b32.end [16/16] (narrow) %v4744_v9, 64 }
 0x444   : > { %v4832_v37 = vpop.trf.xlu0 }
 0x445   : > { %4880 = vst [vmem:[%s9454_s2] sm:$0xff] %v4832_v37 }
 0x448   : > { %v4833_v25 = vpop.trf.xlu0 }
 0x449   : > { %4882 = vst [vmem:[%s9454_s2 + $0x10] sm:$0xff] %v4833_v25 }
 0x44c   : > { %v4834_v61 = vpop.trf.xlu0 }
 0x44d   : > { %4884 = vst [vmem:[%s9454_s2 + $0x20] sm:$0xff] %v4834_v61 }
 0x450   : > { %v4835_v53 = vpop.trf.xlu0 }
 0x451   : > { %4886 = vst [vmem:[%s9454_s2 + $0x30] sm:$0xff] %v4835_v53 }
 0x454   : > { %v4836_v14 = vpop.trf.xlu0 }
 0x455   : > { %4888 = vst [vmem:[%s9454_s2 + $0x40] sm:$0xff] %v4836_v14 }
 0x458   : > { %v4837_v7 = vpop.trf.xlu0 }
 0x459   : > { %4890 = vst [vmem:[%s9454_s2 + $0x50] sm:$0xff] %v4837_v7 }
 0x45c   : > { %v4864_v16 = vpop.trf.xlu1  ;;  %v4838_v43 = vpop.trf.xlu0 }
 0x45d   : > { %4881 = vst [vmem:[%s9454_s2 + $0x8] sm:$0xff] %v4864_v16  ;;  %4892 = vst [vmem:[%s9454_s2 + $0x60] sm:$0xff] %v4838_v43 }
 0x460   : > { %v4865_v10 = vpop.trf.xlu1  ;;  %v4839_v24 = vpop.trf.xlu0 }
 0x461   : > { %4883 = vst [vmem:[%s9454_s2 + $0x18] sm:$0xff] %v4865_v10  ;;  %4894 = vst [vmem:[%s9454_s2 + $0x70] sm:$0xff] %v4839_v24 }
 0x464   : > { %v4866_v54 = vpop.trf.xlu1 }
 0x465   : > { %4885 = vst [vmem:[%s9454_s2 + $0x28] sm:$0xff] %v4866_v54 }
 0x468   : > { %v4867_v29 = vpop.trf.xlu1 }
 0x469   : > { %4887 = vst [vmem:[%s9454_s2 + $0x38] sm:$0xff] %v4867_v29 }
 0x46c   : > { %v4868_v27 = vpop.trf.xlu1 }
 0x46d   : > { %4889 = vst [vmem:[%s9454_s2 + $0x48] sm:$0xff] %v4868_v27 }
 0x470   : > { %v4869_v62 = vpop.trf.xlu1 }
 0x471   : > { %4891 = vst [vmem:[%s9454_s2 + $0x58] sm:$0xff] %v4869_v62 }
 0x474   : > { %v4870_v6 = vpop.trf.xlu1 }
 0x475   : > { %4893 = vst [vmem:[%s9454_s2 + $0x68] sm:$0xff] %v4870_v6 }
 0x478   : > { %v4871_v34 = vpop.trf.xlu1 }
 0x479   : > { %4895 = vst [vmem:[%s9454_s2 + $0x78] sm:$0xff] %v4871_v34 }
 0x4d4   : > { %v5974_v51 = vpop.f32.mrb[32].mxu1 }
 0x4d5   : > { %v5975_v1 = vpop.f32.mrb[33].mxu1 }
 0x4d6   : > { %v5976_v33 = vadd.f32 %v5975_v1, %v5974_v51 }
 0x4d8   : > { %4815 = vst [vmem:[%s635_s20] sm:$0x1] %v5976_v33 }
 0x4d9 PF: > { %s9581_s16 = sld [smem:[#allocation10_spill]]  ;;  %s9582_s3 = sld [smem:[#allocation9_spill]] }
 0x4da   : > { %s9583_s30 = sld [smem:[#allocation11_spill]] }
 0x4df   : > { %s43_s15 = sadd.s32 1, %s9581_s16  }
 0x4e0   : > { %p40_p11 = scmp.ge.s32.totalorder %s43_s15, 4  }
 0x4e2   :  { %42 = sbr.rel (!%p40_p11) target bundleno = 51 (0x33), region = 177 }

</bundles_post_ra>
